<compile_context>
chip_gen: v7x
topology: tpu7x:2x2x1
jax: 0.10.0
libtpu: 0.0.40
codegen_flags: <defaults>
</compile_context>

<pallas_src>
import functools

import jax
import jax.numpy as jnp
from jax.experimental import pallas as pl
from jax.experimental.pallas import tpu as pltpu


# ----------------------------------------------------------------------------
# Pallas kernels
# ----------------------------------------------------------------------------
def _conv_s1_kernel(*refs, L, K, relu, fuse_res):
    """Stride-1 'same' conv (K taps) on one batch slab, optional fused residual.

    refs: x_pad (1, L+K-1, Cin), w (K, Cin, Cout), b (1, Cout),
          [res (1, L, Cout)], out (1, L, Cout)
    """
    if fuse_res:
        x_ref, w_ref, b_ref, r_ref, o_ref = refs
    else:
        x_ref, w_ref, b_ref, o_ref = refs

    acc = jnp.dot(x_ref[0, 0:L, :], w_ref[0], preferred_element_type=jnp.float32)
    for t in range(1, K):
        acc = acc + jnp.dot(x_ref[0, t:t + L, :], w_ref[t],
                            preferred_element_type=jnp.float32)
    acc = acc + b_ref[...]
    if relu:
        acc = jnp.maximum(acc, 0.0)
    if fuse_res:
        # PyTorch ResidualBlock: relu(conv2(...)) then relu(out + identity).
        acc = jnp.maximum(acc + r_ref[0].astype(jnp.float32), 0.0)
    o_ref[0] = acc.astype(o_ref.dtype)


def _conv_s2_kernel(x_ref, w_ref, b_ref, o_ref, *, L_out, Cin):
    """Conv1d(stride=2, padding=1, K=3).  x_ref row m = [x_pad[2m] | x_pad[2m+1]]
    packed on the lane axis (lanes 0:Cin / Cin:2Cin)."""
    xe0 = x_ref[0, 0:L_out, 0:Cin]            # x_pad[2l]
    xo0 = x_ref[0, 0:L_out, Cin:2 * Cin]      # x_pad[2l+1]
    xe1 = x_ref[0, 1:L_out + 1, 0:Cin]        # x_pad[2l+2]
    acc = jnp.dot(xe0, w_ref[0], preferred_element_type=jnp.float32)
    acc = acc + jnp.dot(xo0, w_ref[1], preferred_element_type=jnp.float32)
    acc = acc + jnp.dot(xe1, w_ref[2], preferred_element_type=jnp.float32)
    acc = jnp.maximum(acc + b_ref[...], 0.0)
    o_ref[0] = acc.astype(o_ref.dtype)


def _tconv_s2_kernel(x_ref, w_ref, b_ref, o_ref, *, L):
    """ConvTranspose1d(stride=2, padding=1, output_padding=1, K=3), polyphase.

    w_ref[t] = W_pt[:, :, K-1-t] (tap-flipped, shape (Cin, Cout)).
      y[2p]   = x[p]   @ W_pt[:,:,1]
      y[2p+1] = x[p]   @ W_pt[:,:,2] + x[p+1] @ W_pt[:,:,0]   (x[L] := 0)
    Even outputs go to lanes 0:Cout, odd to Cout:2Cout; a free reshape outside
    the kernel interleaves them into length 2L.
    """
    x0 = x_ref[0, 0:L, :]          # x[p]
    x1 = x_ref[0, 1:L + 1, :]      # x[p+1] (zero row appended by wrapper)
    even = jnp.dot(x0, w_ref[1], preferred_element_type=jnp.float32) + b_ref[...]
    odd = (jnp.dot(x0, w_ref[0], preferred_element_type=jnp.float32)
           + jnp.dot(x1, w_ref[2], preferred_element_type=jnp.float32)
           + b_ref[...])
    out = jnp.maximum(jnp.concatenate([even, odd], axis=-1), 0.0)
    o_ref[0] = out.astype(o_ref.dtype)


def _head_kernel(x_ref, w1_ref, b1_ref, w2_ref, b2_ref, w3_ref, b3_ref,
                 o_ref, acc_ref):
    """Fused classifier head: logits = fc3(relu(fc2(relu(fc1(x))))).

    Grid tiles the fc1 contraction axis; acc_ref is the fp32 fc1 accumulator.
    fc2/fc3 run only on the last grid step with VMEM-resident intermediates.
    """
    @pl.when(pl.program_id(0) == 0)
    def _():
        acc_ref[...] = jnp.zeros_like(acc_ref)

    acc_ref[...] += jnp.dot(x_ref[...], w1_ref[...],
                            preferred_element_type=jnp.float32)

    @pl.when(pl.program_id(0) == pl.num_programs(0) - 1)
    def _():
        h1 = jnp.maximum(acc_ref[...] + b1_ref[...], 0.0).astype(jnp.bfloat16)
        h2 = jnp.dot(h1, w2_ref[...], preferred_element_type=jnp.float32) + b2_ref[...]
        h2 = jnp.maximum(h2, 0.0).astype(jnp.bfloat16)
        o_ref[...] = (jnp.dot(h2, w3_ref[...], preferred_element_type=jnp.float32)
                      + b3_ref[...]).astype(o_ref.dtype)


# ----------------------------------------------------------------------------
# Wrappers (pallas_call plumbing; reshapes/pads here are cheap layout glue)
# ----------------------------------------------------------------------------
_PARALLEL_B = pltpu.CompilerParams(dimension_semantics=("parallel",))


def conv1d_s1(x, w_kio, b, *, relu=True, residual=None):
    """Stride-1, 'same'-padded conv on channels-last x: (B, L, Cin)."""
    B, L, Cin = x.shape
    K, _, Cout = w_kio.shape
    pad = (K - 1) // 2
    xp = jnp.pad(x, ((0, 0), (pad, pad), (0, 0)))
    Lp = L + 2 * pad
    fuse = residual is not None
    ins = [xp, w_kio, b]
    in_specs = [
        pl.BlockSpec((1, Lp, Cin), lambda bi: (bi, 0, 0)),
        pl.BlockSpec((K, Cin, Cout), lambda bi: (0, 0, 0)),
        pl.BlockSpec((1, Cout), lambda bi: (0, 0)),
    ]
    if fuse:
        ins.append(residual)
        in_specs.append(pl.BlockSpec((1, L, Cout), lambda bi: (bi, 0, 0)))
    return pl.pallas_call(
        functools.partial(_conv_s1_kernel, L=L, K=K, relu=relu, fuse_res=fuse),
        out_shape=jax.ShapeDtypeStruct((B, L, Cout), jnp.bfloat16),
        grid=(B,),
        in_specs=in_specs,
        out_specs=pl.BlockSpec((1, L, Cout), lambda bi: (bi, 0, 0)),
        compiler_params=_PARALLEL_B,
    )(*ins)


def conv1d_s2(x, w_kio, b):
    """PyTorch Conv1d(stride=2, padding=1, K=3) on channels-last x: (B, L, Cin)."""
    B, L, Cin = x.shape
    K, _, Cout = w_kio.shape
    assert K == 3 and L % 2 == 0
    L_out = L // 2
    xp = jnp.pad(x, ((0, 0), (1, 1), (0, 0)))            # (B, L+2, Cin)
    xr = xp.reshape(B, L_out + 1, 2 * Cin)               # free even/odd phase pack
    return pl.pallas_call(
        functools.partial(_conv_s2_kernel, L_out=L_out, Cin=Cin),
        out_shape=jax.ShapeDtypeStruct((B, L_out, Cout), jnp.bfloat16),
        grid=(B,),
        in_specs=[
            pl.BlockSpec((1, L_out + 1, 2 * Cin), lambda bi: (bi, 0, 0)),
            pl.BlockSpec((K, Cin, Cout), lambda bi: (0, 0, 0)),
            pl.BlockSpec((1, Cout), lambda bi: (0, 0)),
        ],
        out_specs=pl.BlockSpec((1, L_out, Cout), lambda bi: (bi, 0, 0)),
        compiler_params=_PARALLEL_B,
    )(xr, w_kio, b)


def conv_transpose1d_s2(x, w_kio, b):
    """PyTorch ConvTranspose1d(stride=2, padding=1, output_padding=1, K=3)."""
    B, L, Cin = x.shape
    K, _, Cout = w_kio.shape
    assert K == 3
    xp = jnp.pad(x, ((0, 0), (0, 1), (0, 0)))            # append one zero row
    out2 = pl.pallas_call(
        functools.partial(_tconv_s2_kernel, L=L),
        out_shape=jax.ShapeDtypeStruct((B, L, 2 * Cout), jnp.bfloat16),
        grid=(B,),
        in_specs=[
            pl.BlockSpec((1, L + 1, Cin), lambda bi: (bi, 0, 0)),
            pl.BlockSpec((K, Cin, Cout), lambda bi: (0, 0, 0)),
            pl.BlockSpec((1, Cout), lambda bi: (0, 0)),
        ],
        out_specs=pl.BlockSpec((1, L, 2 * Cout), lambda bi: (bi, 0, 0)),
        compiler_params=_PARALLEL_B,
    )(xp, w_kio, b)
    return out2.reshape(B, 2 * L, Cout)                  # interleave even/odd (free)


def residual_block(x, w1, w2):
    """(Transpose)ResidualBlock.  Weights are already in direct-conv
    (K, Cin, Cout) orientation (tap-flipped for the transpose variant), so both
    block types share this path.  Final add+ReLU is fused into conv2's epilogue."""
    C = x.shape[-1]
    zero_b = jnp.zeros((1, C), jnp.float32)              # bias=False in PyTorch
    y = conv1d_s1(x, w1, zero_b, relu=True)
    return conv1d_s1(y, w2, zero_b, relu=True, residual=x)


def classifier_head(enc_flat, kp):
    """Fused fc1->relu->fc2->relu->fc3 in one Pallas call, tiling the fc1
    contraction axis with an fp32 VMEM accumulator."""
    B, F = enc_flat.shape
    H1 = kp["fc1_w"].shape[1]
    H2 = kp["fc2_w"].shape[1]
    NC = kp["fc3_w"].shape[1]
    tk = F
    for cand in (2048, 1024, 512, 256, 128):
        if F % cand == 0:
            tk = cand
            break
    nk = F // tk
    return pl.pallas_call(
        _head_kernel,
        out_shape=jax.ShapeDtypeStruct((B, NC), jnp.float32),
        grid=(nk,),
        in_specs=[
            pl.BlockSpec((B, tk), lambda k: (0, k)),
            pl.BlockSpec((tk, H1), lambda k: (k, 0)),
            pl.BlockSpec((1, H1), lambda k: (0, 0)),
            pl.BlockSpec((H1, H2), lambda k: (0, 0)),
            pl.BlockSpec((1, H2), lambda k: (0, 0)),
            pl.BlockSpec((H2, NC), lambda k: (0, 0)),
            pl.BlockSpec((1, NC), lambda k: (0, 0)),
        ],
        out_specs=pl.BlockSpec((B, NC), lambda k: (0, 0)),
        scratch_shapes=[pltpu.VMEM((B, H1), jnp.float32)],
        compiler_params=pltpu.CompilerParams(dimension_semantics=("arbitrary",)),
    )(enc_flat, kp["fc1_w"], kp["fc1_b"], kp["fc2_w"], kp["fc2_b"],
      kp["fc3_w"], kp["fc3_b"])


# ----------------------------------------------------------------------------
# DeepModel forward
# ----------------------------------------------------------------------------
def deep_model_forward(kp, x_ncl):
    """x_ncl: (B, 1, L) NCL input.  Returns (encoded_flat, decoded, logits)."""
    x = jnp.transpose(x_ncl, (0, 2, 1)).astype(jnp.bfloat16)    # (B, L, 1)

    # --- encoder ---
    h = conv1d_s2(x, kp["enc1_w"], kp["enc1_b"])
    h = residual_block(h, kp["enc_rb1_w1"], kp["enc_rb1_w2"])
    h = conv1d_s2(h, kp["enc2_w"], kp["enc2_b"])
    h = residual_block(h, kp["enc_rb2_w1"], kp["enc_rb2_w2"])
    encoded = conv1d_s2(h, kp["enc3_w"], kp["enc3_b"])          # (B, L/8, 128)

    # --- decoder ---
    d = conv_transpose1d_s2(encoded, kp["dec1_w"], kp["dec1_b"])
    d = residual_block(d, kp["dec_rb1_w1"], kp["dec_rb1_w2"])
    d = conv_transpose1d_s2(d, kp["dec2_w"], kp["dec2_b"])
    d = residual_block(d, kp["dec_rb2_w1"], kp["dec_rb2_w2"])
    d = conv_transpose1d_s2(d, kp["dec3_w"], kp["dec3_b"])      # (B, L, 1)
    decoded_ncl = jnp.transpose(d, (0, 2, 1)).astype(jnp.float32)

    # --- classifier head (flatten in PyTorch (C, L) order) ---
    enc_ncl = jnp.transpose(encoded, (0, 2, 1))                 # (B, 128, L/8)
    B = enc_ncl.shape[0]
    enc_flat = enc_ncl.reshape(B, -1)                           # (B, 128*L/8) bf16
    logits = classifier_head(enc_flat, kp)
    return enc_flat.astype(jnp.float32), decoded_ncl, logits


# ----------------------------------------------------------------------------
# Parameters (synthetic, deterministic; shapes follow the PyTorch module)
# ----------------------------------------------------------------------------
def init_params(key, flat_dim, num_classes):
    """PyTorch-layout params: Conv1d (Cout,Cin,K); ConvTranspose1d (Cin,Cout,K)."""
    keys = iter(jax.random.split(key, 64))

    def w(shape, fan_in):
        return jax.random.normal(next(keys), shape, jnp.float32) * (float(fan_in) ** -0.5)

    p = {}
    p["enc1_w"] = w((32, 1, 3), 3);        p["enc1_b"] = w((32,), 32)
    p["enc_rb1_w1"] = w((32, 32, 3), 96);  p["enc_rb1_w2"] = w((32, 32, 3), 96)
    p["enc2_w"] = w((64, 32, 3), 96);      p["enc2_b"] = w((64,), 64)
    p["enc_rb2_w1"] = w((64, 64, 3), 192); p["enc_rb2_w2"] = w((64, 64, 3), 192)
    p["enc3_w"] = w((128, 64, 3), 192);    p["enc3_b"] = w((128,), 128)
    p["dec1_w"] = w((128, 64, 3), 384);    p["dec1_b"] = w((64,), 64)
    p["dec_rb1_w1"] = w((64, 64, 3), 192); p["dec_rb1_w2"] = w((64, 64, 3), 192)
    p["dec2_w"] = w((64, 32, 3), 192);     p["dec2_b"] = w((32,), 32)
    p["dec_rb2_w1"] = w((32, 32, 3), 96);  p["dec_rb2_w2"] = w((32, 32, 3), 96)
    p["dec3_w"] = w((32, 1, 3), 96);       p["dec3_b"] = w((1,), 1)
    p["fc1_w"] = w((flat_dim, 128), flat_dim); p["fc1_b"] = w((128,), 128)
    p["fc2_w"] = w((128, 64), 128);            p["fc2_b"] = w((64,), 64)
    p["fc3_w"] = w((64, num_classes), 64);     p["fc3_b"] = w((num_classes,), num_classes)
    return p


def prepare_params(p):
    """Convert to kernel layout once: conv weights -> (K, Cin, Cout) bf16
    (transpose-conv weights additionally tap-flipped), biases -> (1, C) fp32,
    FC weights -> bf16, FC biases -> (1, N) fp32."""
    def conv_w(w):                       # Conv1d (Cout, Cin, K) -> (K, Cin, Cout)
        return jnp.transpose(w, (2, 1, 0)).astype(jnp.bfloat16)

    def tconv_w(w):                      # ConvT (Cin, Cout, K) -> flipped (K, Cin, Cout)
        return jnp.transpose(w[:, :, ::-1], (2, 0, 1)).astype(jnp.bfloat16)

    def bias(b):
        return b.reshape(1, -1).astype(jnp.float32)

    kp = {}
    for name in ("enc1", "enc2", "enc3"):
        kp[name + "_w"] = conv_w(p[name + "_w"]); kp[name + "_b"] = bias(p[name + "_b"])
    for name in ("enc_rb1_w1", "enc_rb1_w2", "enc_rb2_w1", "enc_rb2_w2"):
        kp[name] = conv_w(p[name])
    for name in ("dec1", "dec2", "dec3"):
        kp[name + "_w"] = tconv_w(p[name + "_w"]); kp[name + "_b"] = bias(p[name + "_b"])
    for name in ("dec_rb1_w1", "dec_rb1_w2", "dec_rb2_w1", "dec_rb2_w2"):
        kp[name] = tconv_w(p[name])
    for name in ("fc1", "fc2", "fc3"):
        kp[name + "_w"] = p[name + "_w"].astype(jnp.bfloat16)
        kp[name + "_b"] = bias(p[name + "_b"])
    return kp


if __name__ == "__main__":
    # Reference module uses k=6 (L=4096, fc1 in = 4**8).  Keep the structural
    # relation 128*(L/8) == 4**(k+2) but use k=3 for a small smoke test:
    # L = 64, fc1 in = 1024.
    K_PARAM = 3
    FLAT_DIM = 4 ** (K_PARAM + 2)          # fc1 input features
    L = FLAT_DIM // 16                     # input sequence length (=> 64)
    B = 2
    NUM_CLASSES = 5

    key = jax.random.PRNGKey(0)
    pkey, xkey = jax.random.split(key)
    params = init_params(pkey, FLAT_DIM, NUM_CLASSES)
    kparams = prepare_params(params)
    x = jax.random.normal(xkey, (B, 1, L), jnp.float32)     # NCL, like PyTorch

    fwd = jax.jit(deep_model_forward)
    enc_flat, decoded, logits = fwd(kparams, x)
    jax.block_until_ready((enc_flat, decoded, logits))

    assert enc_flat.shape == (B, FLAT_DIM), enc_flat.shape
    assert decoded.shape == (B, 1, L), decoded.shape
    assert logits.shape == (B, NUM_CLASSES), logits.shape
    assert bool(jnp.all(jnp.isfinite(enc_flat)))
    assert bool(jnp.all(jnp.isfinite(decoded)))
    assert bool(jnp.all(jnp.isfinite(logits)))
    print("KERNEL_OK")
</pallas_src>

<mosaic_0001>
module attributes {stable_mosaic.version = 11 : i64} {
  func.func @_conv_s2_kernel(%arg0: i32, %arg1: memref<1x33x2xbf16, #tpu.memory_space<vmem>>, %arg2: memref<3x1x32xbf16, #tpu.memory_space<vmem>>, %arg3: memref<1x32xf32, #tpu.memory_space<vmem>>, %arg4: memref<1x32x32xbf16, #tpu.memory_space<vmem>>) attributes {dimension_semantics = [#tpu.dimension_semantics<parallel>], iteration_bounds = array<i64: 2>, scalar_prefetch = 0 : i64, scratch_operands = 0 : i64, tpu.core_type = #tpu.core_type<tc>, window_params = [{transform_indices = @transform_0, window_bounds = array<i64: 1, 33, 2>}, {pipeline_mode = #tpu.pipeline_mode<synchronous>, transform_indices = @transform_1, window_bounds = array<i64: 3, 1, 32>}, {pipeline_mode = #tpu.pipeline_mode<synchronous>, transform_indices = @transform_2, window_bounds = array<i64: 1, 32>}, {transform_indices = @transform_3, window_bounds = array<i64: 1, 32, 32>}]} {
    %c0 = arith.constant 0 : index
    %c0_0 = arith.constant 0 : index
    %c0_1 = arith.constant 0 : index
    %0 = vector.load %arg1[%c0, %c0_0, %c0_1] : memref<1x33x2xbf16, #tpu.memory_space<vmem>>, vector<1x32x1xbf16>
    %1 = vector.shape_cast %0 : vector<1x32x1xbf16> to vector<32x1xbf16>
    %c0_2 = arith.constant 0 : index
    %c0_3 = arith.constant 0 : index
    %c1 = arith.constant 1 : index
    %2 = vector.load %arg1[%c0_2, %c0_3, %c1] : memref<1x33x2xbf16, #tpu.memory_space<vmem>>, vector<1x32x1xbf16>
    %3 = vector.shape_cast %2 : vector<1x32x1xbf16> to vector<32x1xbf16>
    %c0_4 = arith.constant 0 : index
    %c1_5 = arith.constant 1 : index
    %c0_6 = arith.constant 0 : index
    %4 = vector.load %arg1[%c0_4, %c1_5, %c0_6] : memref<1x33x2xbf16, #tpu.memory_space<vmem>>, vector<1x32x1xbf16>
    %5 = vector.shape_cast %4 : vector<1x32x1xbf16> to vector<32x1xbf16>
    %c0_7 = arith.constant 0 : index
    %c0_8 = arith.constant 0 : index
    %c0_9 = arith.constant 0 : index
    %6 = vector.load %arg2[%c0_7, %c0_8, %c0_9] : memref<3x1x32xbf16, #tpu.memory_space<vmem>>, vector<1x1x32xbf16>
    %7 = vector.shape_cast %6 : vector<1x1x32xbf16> to vector<1x32xbf16>
    %cst = arith.constant dense<0.000000e+00> : vector<32x32xf32>
    %8 = tpu.matmul %1, %7, %cst {dimension_numbers = #tpu.dot_dimension_numbers<[1], [0], [0], [1], [0, 0, 1, 1], [], []>} : vector<32x1xbf16>, vector<1x32xbf16>, vector<32x32xf32> -> vector<32x32xf32>
    %c1_10 = arith.constant 1 : index
    %c0_11 = arith.constant 0 : index
    %c0_12 = arith.constant 0 : index
    %9 = vector.load %arg2[%c1_10, %c0_11, %c0_12] : memref<3x1x32xbf16, #tpu.memory_space<vmem>>, vector<1x1x32xbf16>
    %10 = vector.shape_cast %9 : vector<1x1x32xbf16> to vector<1x32xbf16>
    %cst_13 = arith.constant dense<0.000000e+00> : vector<32x32xf32>
    %11 = tpu.matmul %3, %10, %cst_13 {dimension_numbers = #tpu.dot_dimension_numbers<[1], [0], [0], [1], [0, 0, 1, 1], [], []>} : vector<32x1xbf16>, vector<1x32xbf16>, vector<32x32xf32> -> vector<32x32xf32>
    %12 = arith.addf %8, %11 : vector<32x32xf32>
    %c2 = arith.constant 2 : index
    %c0_14 = arith.constant 0 : index
    %c0_15 = arith.constant 0 : index
    %13 = vector.load %arg2[%c2, %c0_14, %c0_15] : memref<3x1x32xbf16, #tpu.memory_space<vmem>>, vector<1x1x32xbf16>
    %14 = vector.shape_cast %13 : vector<1x1x32xbf16> to vector<1x32xbf16>
    %cst_16 = arith.constant dense<0.000000e+00> : vector<32x32xf32>
    %15 = tpu.matmul %5, %14, %cst_16 {dimension_numbers = #tpu.dot_dimension_numbers<[1], [0], [0], [1], [0, 0, 1, 1], [], []>} : vector<32x1xbf16>, vector<1x32xbf16>, vector<32x32xf32> -> vector<32x32xf32>
    %16 = arith.addf %12, %15 : vector<32x32xf32>
    %c0_17 = arith.constant 0 : index
    %c0_18 = arith.constant 0 : index
    %17 = vector.load %arg3[%c0_17, %c0_18] : memref<1x32xf32, #tpu.memory_space<vmem>>, vector<1x32xf32>
    %18 = vector.broadcast %17 : vector<1x32xf32> to vector<32x32xf32>
    %19 = arith.addf %16, %18 : vector<32x32xf32>
    %cst_19 = arith.constant 0.000000e+00 : f32
    %20 = vector.broadcast %cst_19 : f32 to vector<32x32xf32>
    %21 = arith.maximumf %19, %20 : vector<32x32xf32>
    %22 = arith.truncf %21 : vector<32x32xf32> to vector<32x32xbf16>
    %c0_20 = arith.constant 0 : index
    %c0_21 = arith.constant 0 : index
    %c0_22 = arith.constant 0 : index
    %23 = vector.load %arg4[%c0_20, %c0_21, %c0_22] : memref<1x32x32xbf16, #tpu.memory_space<vmem>>, vector<1x32x32xbf16>
    %24 = vector.shape_cast %23 : vector<1x32x32xbf16> to vector<32x32xbf16>
    %25 = vector.shape_cast %22 : vector<32x32xbf16> to vector<1x32x32xbf16>
    tpu.vector_store %arg4[%c0_20, %c0_21, %c0_22], %25 {strides = array<i32>} : memref<1x32x32xbf16, #tpu.memory_space<vmem>>, vector<1x32x32xbf16>,
    return
  }
  func.func @transform_0(%arg0: i32) -> (i32, i32, i32) {
    %c0_i32 = arith.constant 0 : i32
    %c0_i32_0 = arith.constant 0 : i32
    %c0_i32_1 = arith.constant 0 : i32
    return %arg0, %c0_i32, %c0_i32_0 : i32, i32, i32
  }
  func.func @transform_1(%arg0: i32) -> (i32, i32, i32) {
    %c0_i32 = arith.constant 0 : i32
    %c0_i32_0 = arith.constant 0 : i32
    %c0_i32_1 = arith.constant 0 : i32
    %c0_i32_2 = arith.constant 0 : i32
    return %c0_i32, %c0_i32_0, %c0_i32_1 : i32, i32, i32
  }
  func.func @transform_2(%arg0: i32) -> (i32, i32) {
    %c0_i32 = arith.constant 0 : i32
    %c0_i32_0 = arith.constant 0 : i32
    %c0_i32_1 = arith.constant 0 : i32
    return %c0_i32, %c0_i32_0 : i32, i32
  }
  func.func @transform_3(%arg0: i32) -> (i32, i32, i32) {
    %c0_i32 = arith.constant 0 : i32
    %c0_i32_0 = arith.constant 0 : i32
    %c0_i32_1 = arith.constant 0 : i32
    return %arg0, %c0_i32, %c0_i32_0 : i32, i32, i32
  }
}

module attributes {stable_mosaic.version = 11 : i64} {
  func.func @_conv_s1_kernel(%arg0: i32, %arg1: memref<1x34x32xbf16, #tpu.memory_space<vmem>>, %arg2: memref<3x32x32xbf16, #tpu.memory_space<vmem>>, %arg3: memref<1x32xf32, #tpu.memory_space<vmem>>, %arg4: memref<1x32x32xbf16, #tpu.memory_space<vmem>>) attributes {dimension_semantics = [#tpu.dimension_semantics<parallel>], iteration_bounds = array<i64: 2>, scalar_prefetch = 0 : i64, scratch_operands = 0 : i64, tpu.core_type = #tpu.core_type<tc>, window_params = [{transform_indices = @transform_0, window_bounds = array<i64: 1, 34, 32>}, {pipeline_mode = #tpu.pipeline_mode<synchronous>, transform_indices = @transform_1, window_bounds = array<i64: 3, 32, 32>}, {pipeline_mode = #tpu.pipeline_mode<synchronous>, transform_indices = @transform_2, window_bounds = array<i64: 1, 32>}, {transform_indices = @transform_3, window_bounds = array<i64: 1, 32, 32>}]} {
    %c0 = arith.constant 0 : index
    %c0_0 = arith.constant 0 : index
    %c0_1 = arith.constant 0 : index
    %0 = vector.load %arg1[%c0, %c0_0, %c0_1] : memref<1x34x32xbf16, #tpu.memory_space<vmem>>, vector<1x32x32xbf16>
    %1 = vector.shape_cast %0 : vector<1x32x32xbf16> to vector<32x32xbf16>
    %c0_2 = arith.constant 0 : index
    %c0_3 = arith.constant 0 : index
    %c0_4 = arith.constant 0 : index
    %2 = vector.load %arg2[%c0_2, %c0_3, %c0_4] : memref<3x32x32xbf16, #tpu.memory_space<vmem>>, vector<1x32x32xbf16>
    %3 = vector.shape_cast %2 : vector<1x32x32xbf16> to vector<32x32xbf16>
    %cst = arith.constant dense<0.000000e+00> : vector<32x32xf32>
    %4 = tpu.matmul %1, %3, %cst {dimension_numbers = #tpu.dot_dimension_numbers<[1], [0], [0], [1], [0, 0, 1, 1], [], []>} : vector<32x32xbf16>, vector<32x32xbf16>, vector<32x32xf32> -> vector<32x32xf32>
    %c0_5 = arith.constant 0 : index
    %c1 = arith.constant 1 : index
    %c0_6 = arith.constant 0 : index
    %5 = vector.load %arg1[%c0_5, %c1, %c0_6] : memref<1x34x32xbf16, #tpu.memory_space<vmem>>, vector<1x32x32xbf16>
    %6 = vector.shape_cast %5 : vector<1x32x32xbf16> to vector<32x32xbf16>
    %c1_7 = arith.constant 1 : index
    %c0_8 = arith.constant 0 : index
    %c0_9 = arith.constant 0 : index
    %7 = vector.load %arg2[%c1_7, %c0_8, %c0_9] : memref<3x32x32xbf16, #tpu.memory_space<vmem>>, vector<1x32x32xbf16>
    %8 = vector.shape_cast %7 : vector<1x32x32xbf16> to vector<32x32xbf16>
    %cst_10 = arith.constant dense<0.000000e+00> : vector<32x32xf32>
    %9 = tpu.matmul %6, %8, %cst_10 {dimension_numbers = #tpu.dot_dimension_numbers<[1], [0], [0], [1], [0, 0, 1, 1], [], []>} : vector<32x32xbf16>, vector<32x32xbf16>, vector<32x32xf32> -> vector<32x32xf32>
    %10 = arith.addf %4, %9 : vector<32x32xf32>
    %c0_11 = arith.constant 0 : index
    %c2 = arith.constant 2 : index
    %c0_12 = arith.constant 0 : index
    %11 = vector.load %arg1[%c0_11, %c2, %c0_12] : memref<1x34x32xbf16, #tpu.memory_space<vmem>>, vector<1x32x32xbf16>
    %12 = vector.shape_cast %11 : vector<1x32x32xbf16> to vector<32x32xbf16>
    %c2_13 = arith.constant 2 : index
    %c0_14 = arith.constant 0 : index
    %c0_15 = arith.constant 0 : index
    %13 = vector.load %arg2[%c2_13, %c0_14, %c0_15] : memref<3x32x32xbf16, #tpu.memory_space<vmem>>, vector<1x32x32xbf16>
    %14 = vector.shape_cast %13 : vector<1x32x32xbf16> to vector<32x32xbf16>
    %cst_16 = arith.constant dense<0.000000e+00> : vector<32x32xf32>
    %15 = tpu.matmul %12, %14, %cst_16 {dimension_numbers = #tpu.dot_dimension_numbers<[1], [0], [0], [1], [0, 0, 1, 1], [], []>} : vector<32x32xbf16>, vector<32x32xbf16>, vector<32x32xf32> -> vector<32x32xf32>
    %16 = arith.addf %10, %15 : vector<32x32xf32>
    %c0_17 = arith.constant 0 : index
    %c0_18 = arith.constant 0 : index
    %17 = vector.load %arg3[%c0_17, %c0_18] : memref<1x32xf32, #tpu.memory_space<vmem>>, vector<1x32xf32>
    %18 = vector.broadcast %17 : vector<1x32xf32> to vector<32x32xf32>
    %19 = arith.addf %16, %18 : vector<32x32xf32>
    %cst_19 = arith.constant 0.000000e+00 : f32
    %20 = vector.broadcast %cst_19 : f32 to vector<32x32xf32>
    %21 = arith.maximumf %19, %20 : vector<32x32xf32>
    %22 = arith.truncf %21 : vector<32x32xf32> to vector<32x32xbf16>
    %c0_20 = arith.constant 0 : index
    %c0_21 = arith.constant 0 : index
    %c0_22 = arith.constant 0 : index
    %23 = vector.load %arg4[%c0_20, %c0_21, %c0_22] : memref<1x32x32xbf16, #tpu.memory_space<vmem>>, vector<1x32x32xbf16>
    %24 = vector.shape_cast %23 : vector<1x32x32xbf16> to vector<32x32xbf16>
    %25 = vector.shape_cast %22 : vector<32x32xbf16> to vector<1x32x32xbf16>
    tpu.vector_store %arg4[%c0_20, %c0_21, %c0_22], %25 {strides = array<i32>} : memref<1x32x32xbf16, #tpu.memory_space<vmem>>, vector<1x32x32xbf16>,
    return
  }
  func.func @transform_0(%arg0: i32) -> (i32, i32, i32) {
    %c0_i32 = arith.constant 0 : i32
    %c0_i32_0 = arith.constant 0 : i32
    %c0_i32_1 = arith.constant 0 : i32
    return %arg0, %c0_i32, %c0_i32_0 : i32, i32, i32
  }
  func.func @transform_1(%arg0: i32) -> (i32, i32, i32) {
    %c0_i32 = arith.constant 0 : i32
    %c0_i32_0 = arith.constant 0 : i32
    %c0_i32_1 = arith.constant 0 : i32
    %c0_i32_2 = arith.constant 0 : i32
    return %c0_i32, %c0_i32_0, %c0_i32_1 : i32, i32, i32
  }
  func.func @transform_2(%arg0: i32) -> (i32, i32) {
    %c0_i32 = arith.constant 0 : i32
    %c0_i32_0 = arith.constant 0 : i32
    %c0_i32_1 = arith.constant 0 : i32
    return %c0_i32, %c0_i32_0 : i32, i32
  }
  func.func @transform_3(%arg0: i32) -> (i32, i32, i32) {
    %c0_i32 = arith.constant 0 : i32
    %c0_i32_0 = arith.constant 0 : i32
    %c0_i32_1 = arith.constant 0 : i32
    return %arg0, %c0_i32, %c0_i32_0 : i32, i32, i32
  }
}

module attributes {stable_mosaic.version = 11 : i64} {
  func.func @_conv_s1_kernel(%arg0: i32, %arg1: memref<1x34x32xbf16, #tpu.memory_space<vmem>>, %arg2: memref<3x32x32xbf16, #tpu.memory_space<vmem>>, %arg3: memref<1x32xf32, #tpu.memory_space<vmem>>, %arg4: memref<1x32x32xbf16, #tpu.memory_space<vmem>>, %arg5: memref<1x32x32xbf16, #tpu.memory_space<vmem>>) attributes {dimension_semantics = [#tpu.dimension_semantics<parallel>], iteration_bounds = array<i64: 2>, scalar_prefetch = 0 : i64, scratch_operands = 0 : i64, tpu.core_type = #tpu.core_type<tc>, window_params = [{transform_indices = @transform_0, window_bounds = array<i64: 1, 34, 32>}, {pipeline_mode = #tpu.pipeline_mode<synchronous>, transform_indices = @transform_1, window_bounds = array<i64: 3, 32, 32>}, {pipeline_mode = #tpu.pipeline_mode<synchronous>, transform_indices = @transform_2, window_bounds = array<i64: 1, 32>}, {transform_indices = @transform_3, window_bounds = array<i64: 1, 32, 32>}, {transform_indices = @transform_4, window_bounds = array<i64: 1, 32, 32>}]} {
    %c0 = arith.constant 0 : index
    %c0_0 = arith.constant 0 : index
    %c0_1 = arith.constant 0 : index
    %0 = vector.load %arg1[%c0, %c0_0, %c0_1] : memref<1x34x32xbf16, #tpu.memory_space<vmem>>, vector<1x32x32xbf16>
    %1 = vector.shape_cast %0 : vector<1x32x32xbf16> to vector<32x32xbf16>
    %c0_2 = arith.constant 0 : index
    %c0_3 = arith.constant 0 : index
    %c0_4 = arith.constant 0 : index
    %2 = vector.load %arg2[%c0_2, %c0_3, %c0_4] : memref<3x32x32xbf16, #tpu.memory_space<vmem>>, vector<1x32x32xbf16>
    %3 = vector.shape_cast %2 : vector<1x32x32xbf16> to vector<32x32xbf16>
    %cst = arith.constant dense<0.000000e+00> : vector<32x32xf32>
    %4 = tpu.matmul %1, %3, %cst {dimension_numbers = #tpu.dot_dimension_numbers<[1], [0], [0], [1], [0, 0, 1, 1], [], []>} : vector<32x32xbf16>, vector<32x32xbf16>, vector<32x32xf32> -> vector<32x32xf32>
    %c0_5 = arith.constant 0 : index
    %c1 = arith.constant 1 : index
    %c0_6 = arith.constant 0 : index
    %5 = vector.load %arg1[%c0_5, %c1, %c0_6] : memref<1x34x32xbf16, #tpu.memory_space<vmem>>, vector<1x32x32xbf16>
    %6 = vector.shape_cast %5 : vector<1x32x32xbf16> to vector<32x32xbf16>
    %c1_7 = arith.constant 1 : index
    %c0_8 = arith.constant 0 : index
    %c0_9 = arith.constant 0 : index
    %7 = vector.load %arg2[%c1_7, %c0_8, %c0_9] : memref<3x32x32xbf16, #tpu.memory_space<vmem>>, vector<1x32x32xbf16>
    %8 = vector.shape_cast %7 : vector<1x32x32xbf16> to vector<32x32xbf16>
    %cst_10 = arith.constant dense<0.000000e+00> : vector<32x32xf32>
    %9 = tpu.matmul %6, %8, %cst_10 {dimension_numbers = #tpu.dot_dimension_numbers<[1], [0], [0], [1], [0, 0, 1, 1], [], []>} : vector<32x32xbf16>, vector<32x32xbf16>, vector<32x32xf32> -> vector<32x32xf32>
    %10 = arith.addf %4, %9 : vector<32x32xf32>
    %c0_11 = arith.constant 0 : index
    %c2 = arith.constant 2 : index
    %c0_12 = arith.constant 0 : index
    %11 = vector.load %arg1[%c0_11, %c2, %c0_12] : memref<1x34x32xbf16, #tpu.memory_space<vmem>>, vector<1x32x32xbf16>
    %12 = vector.shape_cast %11 : vector<1x32x32xbf16> to vector<32x32xbf16>
    %c2_13 = arith.constant 2 : index
    %c0_14 = arith.constant 0 : index
    %c0_15 = arith.constant 0 : index
    %13 = vector.load %arg2[%c2_13, %c0_14, %c0_15] : memref<3x32x32xbf16, #tpu.memory_space<vmem>>, vector<1x32x32xbf16>
    %14 = vector.shape_cast %13 : vector<1x32x32xbf16> to vector<32x32xbf16>
    %cst_16 = arith.constant dense<0.000000e+00> : vector<32x32xf32>
    %15 = tpu.matmul %12, %14, %cst_16 {dimension_numbers = #tpu.dot_dimension_numbers<[1], [0], [0], [1], [0, 0, 1, 1], [], []>} : vector<32x32xbf16>, vector<32x32xbf16>, vector<32x32xf32> -> vector<32x32xf32>
    %16 = arith.addf %10, %15 : vector<32x32xf32>
    %c0_17 = arith.constant 0 : index
    %c0_18 = arith.constant 0 : index
    %17 = vector.load %arg3[%c0_17, %c0_18] : memref<1x32xf32, #tpu.memory_space<vmem>>, vector<1x32xf32>
    %18 = vector.broadcast %17 : vector<1x32xf32> to vector<32x32xf32>
    %19 = arith.addf %16, %18 : vector<32x32xf32>
    %cst_19 = arith.constant 0.000000e+00 : f32
    %20 = vector.broadcast %cst_19 : f32 to vector<32x32xf32>
    %21 = arith.maximumf %19, %20 : vector<32x32xf32>
    %c0_20 = arith.constant 0 : index
    %c0_21 = arith.constant 0 : index
    %c0_22 = arith.constant 0 : index
    %22 = vector.load %arg4[%c0_20, %c0_21, %c0_22] : memref<1x32x32xbf16, #tpu.memory_space<vmem>>, vector<1x32x32xbf16>
    %23 = vector.shape_cast %22 : vector<1x32x32xbf16> to vector<32x32xbf16>
    %24 = arith.extf %23 : vector<32x32xbf16> to vector<32x32xf32>
    %25 = arith.addf %21, %24 : vector<32x32xf32>
    %cst_23 = arith.constant 0.000000e+00 : f32
    %26 = vector.broadcast %cst_23 : f32 to vector<32x32xf32>
    %27 = arith.maximumf %25, %26 : vector<32x32xf32>
    %28 = arith.truncf %27 : vector<32x32xf32> to vector<32x32xbf16>
    %c0_24 = arith.constant 0 : index
    %c0_25 = arith.constant 0 : index
    %c0_26 = arith.constant 0 : index
    %29 = vector.load %arg5[%c0_24, %c0_25, %c0_26] : memref<1x32x32xbf16, #tpu.memory_space<vmem>>, vector<1x32x32xbf16>
    %30 = vector.shape_cast %29 : vector<1x32x32xbf16> to vector<32x32xbf16>
    %31 = vector.shape_cast %28 : vector<32x32xbf16> to vector<1x32x32xbf16>
    tpu.vector_store %arg5[%c0_24, %c0_25, %c0_26], %31 {strides = array<i32>} : memref<1x32x32xbf16, #tpu.memory_space<vmem>>, vector<1x32x32xbf16>,
    return
  }
  func.func @transform_0(%arg0: i32) -> (i32, i32, i32) {
    %c0_i32 = arith.constant 0 : i32
    %c0_i32_0 = arith.constant 0 : i32
    %c0_i32_1 = arith.constant 0 : i32
    return %arg0, %c0_i32, %c0_i32_0 : i32, i32, i32
  }
  func.func @transform_1(%arg0: i32) -> (i32, i32, i32) {
    %c0_i32 = arith.constant 0 : i32
    %c0_i32_0 = arith.constant 0 : i32
    %c0_i32_1 = arith.constant 0 : i32
    %c0_i32_2 = arith.constant 0 : i32
    return %c0_i32, %c0_i32_0, %c0_i32_1 : i32, i32, i32
  }
  func.func @transform_2(%arg0: i32) -> (i32, i32) {
    %c0_i32 = arith.constant 0 : i32
    %c0_i32_0 = arith.constant 0 : i32
    %c0_i32_1 = arith.constant 0 : i32
    return %c0_i32, %c0_i32_0 : i32, i32
  }
  func.func @transform_3(%arg0: i32) -> (i32, i32, i32) {
    %c0_i32 = arith.constant 0 : i32
    %c0_i32_0 = arith.constant 0 : i32
    %c0_i32_1 = arith.constant 0 : i32
    return %arg0, %c0_i32, %c0_i32_0 : i32, i32, i32
  }
  func.func @transform_4(%arg0: i32) -> (i32, i32, i32) {
    %c0_i32 = arith.constant 0 : i32
    %c0_i32_0 = arith.constant 0 : i32
    %c0_i32_1 = arith.constant 0 : i32
    return %arg0, %c0_i32, %c0_i32_0 : i32, i32, i32
  }
}

module attributes {stable_mosaic.version = 11 : i64} {
  func.func @_conv_s2_kernel(%arg0: i32, %arg1: memref<1x17x64xbf16, #tpu.memory_space<vmem>>, %arg2: memref<3x32x64xbf16, #tpu.memory_space<vmem>>, %arg3: memref<1x64xf32, #tpu.memory_space<vmem>>, %arg4: memref<1x16x64xbf16, #tpu.memory_space<vmem>>) attributes {dimension_semantics = [#tpu.dimension_semantics<parallel>], iteration_bounds = array<i64: 2>, scalar_prefetch = 0 : i64, scratch_operands = 0 : i64, tpu.core_type = #tpu.core_type<tc>, window_params = [{transform_indices = @transform_0, window_bounds = array<i64: 1, 17, 64>}, {pipeline_mode = #tpu.pipeline_mode<synchronous>, transform_indices = @transform_1, window_bounds = array<i64: 3, 32, 64>}, {pipeline_mode = #tpu.pipeline_mode<synchronous>, transform_indices = @transform_2, window_bounds = array<i64: 1, 64>}, {transform_indices = @transform_3, window_bounds = array<i64: 1, 16, 64>}]} {
    %c0 = arith.constant 0 : index
    %c0_0 = arith.constant 0 : index
    %c0_1 = arith.constant 0 : index
    %0 = vector.load %arg1[%c0, %c0_0, %c0_1] : memref<1x17x64xbf16, #tpu.memory_space<vmem>>, vector<1x16x32xbf16>
    %1 = vector.shape_cast %0 : vector<1x16x32xbf16> to vector<16x32xbf16>
    %c0_2 = arith.constant 0 : index
    %c0_3 = arith.constant 0 : index
    %c32 = arith.constant 32 : index
    %2 = vector.load %arg1[%c0_2, %c0_3, %c32] : memref<1x17x64xbf16, #tpu.memory_space<vmem>>, vector<1x16x32xbf16>
    %3 = vector.shape_cast %2 : vector<1x16x32xbf16> to vector<16x32xbf16>
    %c0_4 = arith.constant 0 : index
    %c1 = arith.constant 1 : index
    %c0_5 = arith.constant 0 : index
    %4 = vector.load %arg1[%c0_4, %c1, %c0_5] : memref<1x17x64xbf16, #tpu.memory_space<vmem>>, vector<1x16x32xbf16>
    %5 = vector.shape_cast %4 : vector<1x16x32xbf16> to vector<16x32xbf16>
    %c0_6 = arith.constant 0 : index
    %c0_7 = arith.constant 0 : index
    %c0_8 = arith.constant 0 : index
    %6 = vector.load %arg2[%c0_6, %c0_7, %c0_8] : memref<3x32x64xbf16, #tpu.memory_space<vmem>>, vector<1x32x64xbf16>
    %7 = vector.shape_cast %6 : vector<1x32x64xbf16> to vector<32x64xbf16>
    %cst = arith.constant dense<0.000000e+00> : vector<16x64xf32>
    %8 = tpu.matmul %1, %7, %cst {dimension_numbers = #tpu.dot_dimension_numbers<[1], [0], [0], [1], [0, 0, 1, 1], [], []>} : vector<16x32xbf16>, vector<32x64xbf16>, vector<16x64xf32> -> vector<16x64xf32>
    %c1_9 = arith.constant 1 : index
    %c0_10 = arith.constant 0 : index
    %c0_11 = arith.constant 0 : index
    %9 = vector.load %arg2[%c1_9, %c0_10, %c0_11] : memref<3x32x64xbf16, #tpu.memory_space<vmem>>, vector<1x32x64xbf16>
    %10 = vector.shape_cast %9 : vector<1x32x64xbf16> to vector<32x64xbf16>
    %cst_12 = arith.constant dense<0.000000e+00> : vector<16x64xf32>
    %11 = tpu.matmul %3, %10, %cst_12 {dimension_numbers = #tpu.dot_dimension_numbers<[1], [0], [0], [1], [0, 0, 1, 1], [], []>} : vector<16x32xbf16>, vector<32x64xbf16>, vector<16x64xf32> -> vector<16x64xf32>
    %12 = arith.addf %8, %11 : vector<16x64xf32>
    %c2 = arith.constant 2 : index
    %c0_13 = arith.constant 0 : index
    %c0_14 = arith.constant 0 : index
    %13 = vector.load %arg2[%c2, %c0_13, %c0_14] : memref<3x32x64xbf16, #tpu.memory_space<vmem>>, vector<1x32x64xbf16>
    %14 = vector.shape_cast %13 : vector<1x32x64xbf16> to vector<32x64xbf16>
    %cst_15 = arith.constant dense<0.000000e+00> : vector<16x64xf32>
    %15 = tpu.matmul %5, %14, %cst_15 {dimension_numbers = #tpu.dot_dimension_numbers<[1], [0], [0], [1], [0, 0, 1, 1], [], []>} : vector<16x32xbf16>, vector<32x64xbf16>, vector<16x64xf32> -> vector<16x64xf32>
    %16 = arith.addf %12, %15 : vector<16x64xf32>
    %c0_16 = arith.constant 0 : index
    %c0_17 = arith.constant 0 : index
    %17 = vector.load %arg3[%c0_16, %c0_17] : memref<1x64xf32, #tpu.memory_space<vmem>>, vector<1x64xf32>
    %18 = vector.broadcast %17 : vector<1x64xf32> to vector<16x64xf32>
    %19 = arith.addf %16, %18 : vector<16x64xf32>
    %cst_18 = arith.constant 0.000000e+00 : f32
    %20 = vector.broadcast %cst_18 : f32 to vector<16x64xf32>
    %21 = arith.maximumf %19, %20 : vector<16x64xf32>
    %22 = arith.truncf %21 : vector<16x64xf32> to vector<16x64xbf16>
    %c0_19 = arith.constant 0 : index
    %c0_20 = arith.constant 0 : index
    %c0_21 = arith.constant 0 : index
    %23 = vector.load %arg4[%c0_19, %c0_20, %c0_21] : memref<1x16x64xbf16, #tpu.memory_space<vmem>>, vector<1x16x64xbf16>
    %24 = vector.shape_cast %23 : vector<1x16x64xbf16> to vector<16x64xbf16>
    %25 = vector.shape_cast %22 : vector<16x64xbf16> to vector<1x16x64xbf16>
    tpu.vector_store %arg4[%c0_19, %c0_20, %c0_21], %25 {strides = array<i32>} : memref<1x16x64xbf16, #tpu.memory_space<vmem>>, vector<1x16x64xbf16>,
    return
  }
  func.func @transform_0(%arg0: i32) -> (i32, i32, i32) {
    %c0_i32 = arith.constant 0 : i32
    %c0_i32_0 = arith.constant 0 : i32
    %c0_i32_1 = arith.constant 0 : i32
    return %arg0, %c0_i32, %c0_i32_0 : i32, i32, i32
  }
  func.func @transform_1(%arg0: i32) -> (i32, i32, i32) {
    %c0_i32 = arith.constant 0 : i32
    %c0_i32_0 = arith.constant 0 : i32
    %c0_i32_1 = arith.constant 0 : i32
    %c0_i32_2 = arith.constant 0 : i32
    return %c0_i32, %c0_i32_0, %c0_i32_1 : i32, i32, i32
  }
  func.func @transform_2(%arg0: i32) -> (i32, i32) {
    %c0_i32 = arith.constant 0 : i32
    %c0_i32_0 = arith.constant 0 : i32
    %c0_i32_1 = arith.constant 0 : i32
    return %c0_i32, %c0_i32_0 : i32, i32
  }
  func.func @transform_3(%arg0: i32) -> (i32, i32, i32) {
    %c0_i32 = arith.constant 0 : i32
    %c0_i32_0 = arith.constant 0 : i32
    %c0_i32_1 = arith.constant 0 : i32
    return %arg0, %c0_i32, %c0_i32_0 : i32, i32, i32
  }
}

module attributes {stable_mosaic.version = 11 : i64} {
  func.func @_conv_s1_kernel(%arg0: i32, %arg1: memref<1x18x64xbf16, #tpu.memory_space<vmem>>, %arg2: memref<3x64x64xbf16, #tpu.memory_space<vmem>>, %arg3: memref<1x64xf32, #tpu.memory_space<vmem>>, %arg4: memref<1x16x64xbf16, #tpu.memory_space<vmem>>) attributes {dimension_semantics = [#tpu.dimension_semantics<parallel>], iteration_bounds = array<i64: 2>, scalar_prefetch = 0 : i64, scratch_operands = 0 : i64, tpu.core_type = #tpu.core_type<tc>, window_params = [{transform_indices = @transform_0, window_bounds = array<i64: 1, 18, 64>}, {pipeline_mode = #tpu.pipeline_mode<synchronous>, transform_indices = @transform_1, window_bounds = array<i64: 3, 64, 64>}, {pipeline_mode = #tpu.pipeline_mode<synchronous>, transform_indices = @transform_2, window_bounds = array<i64: 1, 64>}, {transform_indices = @transform_3, window_bounds = array<i64: 1, 16, 64>}]} {
    %c0 = arith.constant 0 : index
    %c0_0 = arith.constant 0 : index
    %c0_1 = arith.constant 0 : index
    %0 = vector.load %arg1[%c0, %c0_0, %c0_1] : memref<1x18x64xbf16, #tpu.memory_space<vmem>>, vector<1x16x64xbf16>
    %1 = vector.shape_cast %0 : vector<1x16x64xbf16> to vector<16x64xbf16>
    %c0_2 = arith.constant 0 : index
    %c0_3 = arith.constant 0 : index
    %c0_4 = arith.constant 0 : index
    %2 = vector.load %arg2[%c0_2, %c0_3, %c0_4] : memref<3x64x64xbf16, #tpu.memory_space<vmem>>, vector<1x64x64xbf16>
    %3 = vector.shape_cast %2 : vector<1x64x64xbf16> to vector<64x64xbf16>
    %cst = arith.constant dense<0.000000e+00> : vector<16x64xf32>
    %4 = tpu.matmul %1, %3, %cst {dimension_numbers = #tpu.dot_dimension_numbers<[1], [0], [0], [1], [0, 0, 1, 1], [], []>} : vector<16x64xbf16>, vector<64x64xbf16>, vector<16x64xf32> -> vector<16x64xf32>
    %c0_5 = arith.constant 0 : index
    %c1 = arith.constant 1 : index
    %c0_6 = arith.constant 0 : index
    %5 = vector.load %arg1[%c0_5, %c1, %c0_6] : memref<1x18x64xbf16, #tpu.memory_space<vmem>>, vector<1x16x64xbf16>
    %6 = vector.shape_cast %5 : vector<1x16x64xbf16> to vector<16x64xbf16>
    %c1_7 = arith.constant 1 : index
    %c0_8 = arith.constant 0 : index
    %c0_9 = arith.constant 0 : index
    %7 = vector.load %arg2[%c1_7, %c0_8, %c0_9] : memref<3x64x64xbf16, #tpu.memory_space<vmem>>, vector<1x64x64xbf16>
    %8 = vector.shape_cast %7 : vector<1x64x64xbf16> to vector<64x64xbf16>
    %cst_10 = arith.constant dense<0.000000e+00> : vector<16x64xf32>
    %9 = tpu.matmul %6, %8, %cst_10 {dimension_numbers = #tpu.dot_dimension_numbers<[1], [0], [0], [1], [0, 0, 1, 1], [], []>} : vector<16x64xbf16>, vector<64x64xbf16>, vector<16x64xf32> -> vector<16x64xf32>
    %10 = arith.addf %4, %9 : vector<16x64xf32>
    %c0_11 = arith.constant 0 : index
    %c2 = arith.constant 2 : index
    %c0_12 = arith.constant 0 : index
    %11 = vector.load %arg1[%c0_11, %c2, %c0_12] : memref<1x18x64xbf16, #tpu.memory_space<vmem>>, vector<1x16x64xbf16>
    %12 = vector.shape_cast %11 : vector<1x16x64xbf16> to vector<16x64xbf16>
    %c2_13 = arith.constant 2 : index
    %c0_14 = arith.constant 0 : index
    %c0_15 = arith.constant 0 : index
    %13 = vector.load %arg2[%c2_13, %c0_14, %c0_15] : memref<3x64x64xbf16, #tpu.memory_space<vmem>>, vector<1x64x64xbf16>
    %14 = vector.shape_cast %13 : vector<1x64x64xbf16> to vector<64x64xbf16>
    %cst_16 = arith.constant dense<0.000000e+00> : vector<16x64xf32>
    %15 = tpu.matmul %12, %14, %cst_16 {dimension_numbers = #tpu.dot_dimension_numbers<[1], [0], [0], [1], [0, 0, 1, 1], [], []>} : vector<16x64xbf16>, vector<64x64xbf16>, vector<16x64xf32> -> vector<16x64xf32>
    %16 = arith.addf %10, %15 : vector<16x64xf32>
    %c0_17 = arith.constant 0 : index
    %c0_18 = arith.constant 0 : index
    %17 = vector.load %arg3[%c0_17, %c0_18] : memref<1x64xf32, #tpu.memory_space<vmem>>, vector<1x64xf32>
    %18 = vector.broadcast %17 : vector<1x64xf32> to vector<16x64xf32>
    %19 = arith.addf %16, %18 : vector<16x64xf32>
    %cst_19 = arith.constant 0.000000e+00 : f32
    %20 = vector.broadcast %cst_19 : f32 to vector<16x64xf32>
    %21 = arith.maximumf %19, %20 : vector<16x64xf32>
    %22 = arith.truncf %21 : vector<16x64xf32> to vector<16x64xbf16>
    %c0_20 = arith.constant 0 : index
    %c0_21 = arith.constant 0 : index
    %c0_22 = arith.constant 0 : index
    %23 = vector.load %arg4[%c0_20, %c0_21, %c0_22] : memref<1x16x64xbf16, #tpu.memory_space<vmem>>, vector<1x16x64xbf16>
    %24 = vector.shape_cast %23 : vector<1x16x64xbf16> to vector<16x64xbf16>
    %25 = vector.shape_cast %22 : vector<16x64xbf16> to vector<1x16x64xbf16>
    tpu.vector_store %arg4[%c0_20, %c0_21, %c0_22], %25 {strides = array<i32>} : memref<1x16x64xbf16, #tpu.memory_space<vmem>>, vector<1x16x64xbf16>,
    return
  }
  func.func @transform_0(%arg0: i32) -> (i32, i32, i32) {
    %c0_i32 = arith.constant 0 : i32
    %c0_i32_0 = arith.constant 0 : i32
    %c0_i32_1 = arith.constant 0 : i32
    return %arg0, %c0_i32, %c0_i32_0 : i32, i32, i32
  }
  func.func @transform_1(%arg0: i32) -> (i32, i32, i32) {
    %c0_i32 = arith.constant 0 : i32
    %c0_i32_0 = arith.constant 0 : i32
    %c0_i32_1 = arith.constant 0 : i32
    %c0_i32_2 = arith.constant 0 : i32
    return %c0_i32, %c0_i32_0, %c0_i32_1 : i32, i32, i32
  }
  func.func @transform_2(%arg0: i32) -> (i32, i32) {
    %c0_i32 = arith.constant 0 : i32
    %c0_i32_0 = arith.constant 0 : i32
    %c0_i32_1 = arith.constant 0 : i32
    return %c0_i32, %c0_i32_0 : i32, i32
  }
  func.func @transform_3(%arg0: i32) -> (i32, i32, i32) {
    %c0_i32 = arith.constant 0 : i32
    %c0_i32_0 = arith.constant 0 : i32
    %c0_i32_1 = arith.constant 0 : i32
    return %arg0, %c0_i32, %c0_i32_0 : i32, i32, i32
  }
}

module attributes {stable_mosaic.version = 11 : i64} {
  func.func @_conv_s2_kernel(%arg0: i32, %arg1: memref<1x9x128xbf16, #tpu.memory_space<vmem>>, %arg2: memref<3x64x128xbf16, #tpu.memory_space<vmem>>, %arg3: memref<1x128xf32, #tpu.memory_space<vmem>>, %arg4: memref<1x8x128xbf16, #tpu.memory_space<vmem>>) attributes {dimension_semantics = [#tpu.dimension_semantics<parallel>], iteration_bounds = array<i64: 2>, scalar_prefetch = 0 : i64, scratch_operands = 0 : i64, tpu.core_type = #tpu.core_type<tc>, window_params = [{transform_indices = @transform_0, window_bounds = array<i64: 1, 9, 128>}, {pipeline_mode = #tpu.pipeline_mode<synchronous>, transform_indices = @transform_1, window_bounds = array<i64: 3, 64, 128>}, {pipeline_mode = #tpu.pipeline_mode<synchronous>, transform_indices = @transform_2, window_bounds = array<i64: 1, 128>}, {transform_indices = @transform_3, window_bounds = array<i64: 1, 8, 128>}]} {
    %c0 = arith.constant 0 : index
    %c0_0 = arith.constant 0 : index
    %c0_1 = arith.constant 0 : index
    %0 = vector.load %arg1[%c0, %c0_0, %c0_1] : memref<1x9x128xbf16, #tpu.memory_space<vmem>>, vector<1x8x64xbf16>
    %1 = vector.shape_cast %0 : vector<1x8x64xbf16> to vector<8x64xbf16>
    %c0_2 = arith.constant 0 : index
    %c0_3 = arith.constant 0 : index
    %c64 = arith.constant 64 : index
    %2 = vector.load %arg1[%c0_2, %c0_3, %c64] : memref<1x9x128xbf16, #tpu.memory_space<vmem>>, vector<1x8x64xbf16>
    %3 = vector.shape_cast %2 : vector<1x8x64xbf16> to vector<8x64xbf16>
    %c0_4 = arith.constant 0 : index
    %c1 = arith.constant 1 : index
    %c0_5 = arith.constant 0 : index
    %4 = vector.load %arg1[%c0_4, %c1, %c0_5] : memref<1x9x128xbf16, #tpu.memory_space<vmem>>, vector<1x8x64xbf16>
    %5 = vector.shape_cast %4 : vector<1x8x64xbf16> to vector<8x64xbf16>
    %c0_6 = arith.constant 0 : index
    %c0_7 = arith.constant 0 : index
    %c0_8 = arith.constant 0 : index
    %6 = vector.load %arg2[%c0_6, %c0_7, %c0_8] : memref<3x64x128xbf16, #tpu.memory_space<vmem>>, vector<1x64x128xbf16>
    %7 = vector.shape_cast %6 : vector<1x64x128xbf16> to vector<64x128xbf16>
    %cst = arith.constant dense<0.000000e+00> : vector<8x128xf32>
    %8 = tpu.matmul %1, %7, %cst {dimension_numbers = #tpu.dot_dimension_numbers<[1], [0], [0], [1], [0, 0, 1, 1], [], []>} : vector<8x64xbf16>, vector<64x128xbf16>, vector<8x128xf32> -> vector<8x128xf32>
    %c1_9 = arith.constant 1 : index
    %c0_10 = arith.constant 0 : index
    %c0_11 = arith.constant 0 : index
    %9 = vector.load %arg2[%c1_9, %c0_10, %c0_11] : memref<3x64x128xbf16, #tpu.memory_space<vmem>>, vector<1x64x128xbf16>
    %10 = vector.shape_cast %9 : vector<1x64x128xbf16> to vector<64x128xbf16>
    %cst_12 = arith.constant dense<0.000000e+00> : vector<8x128xf32>
    %11 = tpu.matmul %3, %10, %cst_12 {dimension_numbers = #tpu.dot_dimension_numbers<[1], [0], [0], [1], [0, 0, 1, 1], [], []>} : vector<8x64xbf16>, vector<64x128xbf16>, vector<8x128xf32> -> vector<8x128xf32>
    %12 = arith.addf %8, %11 : vector<8x128xf32>
    %c2 = arith.constant 2 : index
    %c0_13 = arith.constant 0 : index
    %c0_14 = arith.constant 0 : index
    %13 = vector.load %arg2[%c2, %c0_13, %c0_14] : memref<3x64x128xbf16, #tpu.memory_space<vmem>>, vector<1x64x128xbf16>
    %14 = vector.shape_cast %13 : vector<1x64x128xbf16> to vector<64x128xbf16>
    %cst_15 = arith.constant dense<0.000000e+00> : vector<8x128xf32>
    %15 = tpu.matmul %5, %14, %cst_15 {dimension_numbers = #tpu.dot_dimension_numbers<[1], [0], [0], [1], [0, 0, 1, 1], [], []>} : vector<8x64xbf16>, vector<64x128xbf16>, vector<8x128xf32> -> vector<8x128xf32>
    %16 = arith.addf %12, %15 : vector<8x128xf32>
    %c0_16 = arith.constant 0 : index
    %c0_17 = arith.constant 0 : index
    %17 = vector.load %arg3[%c0_16, %c0_17] : memref<1x128xf32, #tpu.memory_space<vmem>>, vector<1x128xf32>
    %18 = vector.broadcast %17 : vector<1x128xf32> to vector<8x128xf32>
    %19 = arith.addf %16, %18 : vector<8x128xf32>
    %cst_18 = arith.constant 0.000000e+00 : f32
    %20 = vector.broadcast %cst_18 : f32 to vector<8x128xf32>
    %21 = arith.maximumf %19, %20 : vector<8x128xf32>
    %22 = arith.truncf %21 : vector<8x128xf32> to vector<8x128xbf16>
    %c0_19 = arith.constant 0 : index
    %c0_20 = arith.constant 0 : index
    %c0_21 = arith.constant 0 : index
    %23 = vector.load %arg4[%c0_19, %c0_20, %c0_21] : memref<1x8x128xbf16, #tpu.memory_space<vmem>>, vector<1x8x128xbf16>
    %24 = vector.shape_cast %23 : vector<1x8x128xbf16> to vector<8x128xbf16>
    %25 = vector.shape_cast %22 : vector<8x128xbf16> to vector<1x8x128xbf16>
    tpu.vector_store %arg4[%c0_19, %c0_20, %c0_21], %25 {strides = array<i32>} : memref<1x8x128xbf16, #tpu.memory_space<vmem>>, vector<1x8x128xbf16>,
    return
  }
  func.func @transform_0(%arg0: i32) -> (i32, i32, i32) {
    %c0_i32 = arith.constant 0 : i32
    %c0_i32_0 = arith.constant 0 : i32
    %c0_i32_1 = arith.constant 0 : i32
    return %arg0, %c0_i32, %c0_i32_0 : i32, i32, i32
  }
  func.func @transform_1(%arg0: i32) -> (i32, i32, i32) {
    %c0_i32 = arith.constant 0 : i32
    %c0_i32_0 = arith.constant 0 : i32
    %c0_i32_1 = arith.constant 0 : i32
    %c0_i32_2 = arith.constant 0 : i32
    return %c0_i32, %c0_i32_0, %c0_i32_1 : i32, i32, i32
  }
  func.func @transform_2(%arg0: i32) -> (i32, i32) {
    %c0_i32 = arith.constant 0 : i32
    %c0_i32_0 = arith.constant 0 : i32
    %c0_i32_1 = arith.constant 0 : i32
    return %c0_i32, %c0_i32_0 : i32, i32
  }
  func.func @transform_3(%arg0: i32) -> (i32, i32, i32) {
    %c0_i32 = arith.constant 0 : i32
    %c0_i32_0 = arith.constant 0 : i32
    %c0_i32_1 = arith.constant 0 : i32
    return %arg0, %c0_i32, %c0_i32_0 : i32, i32, i32
  }
}

module attributes {stable_mosaic.version = 11 : i64} {
  func.func @_conv_s1_kernel(%arg0: i32, %arg1: memref<1x18x64xbf16, #tpu.memory_space<vmem>>, %arg2: memref<3x64x64xbf16, #tpu.memory_space<vmem>>, %arg3: memref<1x64xf32, #tpu.memory_space<vmem>>, %arg4: memref<1x16x64xbf16, #tpu.memory_space<vmem>>, %arg5: memref<1x16x64xbf16, #tpu.memory_space<vmem>>) attributes {dimension_semantics = [#tpu.dimension_semantics<parallel>], iteration_bounds = array<i64: 2>, scalar_prefetch = 0 : i64, scratch_operands = 0 : i64, tpu.core_type = #tpu.core_type<tc>, window_params = [{transform_indices = @transform_0, window_bounds = array<i64: 1, 18, 64>}, {pipeline_mode = #tpu.pipeline_mode<synchronous>, transform_indices = @transform_1, window_bounds = array<i64: 3, 64, 64>}, {pipeline_mode = #tpu.pipeline_mode<synchronous>, transform_indices = @transform_2, window_bounds = array<i64: 1, 64>}, {transform_indices = @transform_3, window_bounds = array<i64: 1, 16, 64>}, {transform_indices = @transform_4, window_bounds = array<i64: 1, 16, 64>}]} {
    %c0 = arith.constant 0 : index
    %c0_0 = arith.constant 0 : index
    %c0_1 = arith.constant 0 : index
    %0 = vector.load %arg1[%c0, %c0_0, %c0_1] : memref<1x18x64xbf16, #tpu.memory_space<vmem>>, vector<1x16x64xbf16>
    %1 = vector.shape_cast %0 : vector<1x16x64xbf16> to vector<16x64xbf16>
    %c0_2 = arith.constant 0 : index
    %c0_3 = arith.constant 0 : index
    %c0_4 = arith.constant 0 : index
    %2 = vector.load %arg2[%c0_2, %c0_3, %c0_4] : memref<3x64x64xbf16, #tpu.memory_space<vmem>>, vector<1x64x64xbf16>
    %3 = vector.shape_cast %2 : vector<1x64x64xbf16> to vector<64x64xbf16>
    %cst = arith.constant dense<0.000000e+00> : vector<16x64xf32>
    %4 = tpu.matmul %1, %3, %cst {dimension_numbers = #tpu.dot_dimension_numbers<[1], [0], [0], [1], [0, 0, 1, 1], [], []>} : vector<16x64xbf16>, vector<64x64xbf16>, vector<16x64xf32> -> vector<16x64xf32>
    %c0_5 = arith.constant 0 : index
    %c1 = arith.constant 1 : index
    %c0_6 = arith.constant 0 : index
    %5 = vector.load %arg1[%c0_5, %c1, %c0_6] : memref<1x18x64xbf16, #tpu.memory_space<vmem>>, vector<1x16x64xbf16>
    %6 = vector.shape_cast %5 : vector<1x16x64xbf16> to vector<16x64xbf16>
    %c1_7 = arith.constant 1 : index
    %c0_8 = arith.constant 0 : index
    %c0_9 = arith.constant 0 : index
    %7 = vector.load %arg2[%c1_7, %c0_8, %c0_9] : memref<3x64x64xbf16, #tpu.memory_space<vmem>>, vector<1x64x64xbf16>
    %8 = vector.shape_cast %7 : vector<1x64x64xbf16> to vector<64x64xbf16>
    %cst_10 = arith.constant dense<0.000000e+00> : vector<16x64xf32>
    %9 = tpu.matmul %6, %8, %cst_10 {dimension_numbers = #tpu.dot_dimension_numbers<[1], [0], [0], [1], [0, 0, 1, 1], [], []>} : vector<16x64xbf16>, vector<64x64xbf16>, vector<16x64xf32> -> vector<16x64xf32>
    %10 = arith.addf %4, %9 : vector<16x64xf32>
    %c0_11 = arith.constant 0 : index
    %c2 = arith.constant 2 : index
    %c0_12 = arith.constant 0 : index
    %11 = vector.load %arg1[%c0_11, %c2, %c0_12] : memref<1x18x64xbf16, #tpu.memory_space<vmem>>, vector<1x16x64xbf16>
    %12 = vector.shape_cast %11 : vector<1x16x64xbf16> to vector<16x64xbf16>
    %c2_13 = arith.constant 2 : index
    %c0_14 = arith.constant 0 : index
    %c0_15 = arith.constant 0 : index
    %13 = vector.load %arg2[%c2_13, %c0_14, %c0_15] : memref<3x64x64xbf16, #tpu.memory_space<vmem>>, vector<1x64x64xbf16>
    %14 = vector.shape_cast %13 : vector<1x64x64xbf16> to vector<64x64xbf16>
    %cst_16 = arith.constant dense<0.000000e+00> : vector<16x64xf32>
    %15 = tpu.matmul %12, %14, %cst_16 {dimension_numbers = #tpu.dot_dimension_numbers<[1], [0], [0], [1], [0, 0, 1, 1], [], []>} : vector<16x64xbf16>, vector<64x64xbf16>, vector<16x64xf32> -> vector<16x64xf32>
    %16 = arith.addf %10, %15 : vector<16x64xf32>
    %c0_17 = arith.constant 0 : index
    %c0_18 = arith.constant 0 : index
    %17 = vector.load %arg3[%c0_17, %c0_18] : memref<1x64xf32, #tpu.memory_space<vmem>>, vector<1x64xf32>
    %18 = vector.broadcast %17 : vector<1x64xf32> to vector<16x64xf32>
    %19 = arith.addf %16, %18 : vector<16x64xf32>
    %cst_19 = arith.constant 0.000000e+00 : f32
    %20 = vector.broadcast %cst_19 : f32 to vector<16x64xf32>
    %21 = arith.maximumf %19, %20 : vector<16x64xf32>
    %c0_20 = arith.constant 0 : index
    %c0_21 = arith.constant 0 : index
    %c0_22 = arith.constant 0 : index
    %22 = vector.load %arg4[%c0_20, %c0_21, %c0_22] : memref<1x16x64xbf16, #tpu.memory_space<vmem>>, vector<1x16x64xbf16>
    %23 = vector.shape_cast %22 : vector<1x16x64xbf16> to vector<16x64xbf16>
    %24 = arith.extf %23 : vector<16x64xbf16> to vector<16x64xf32>
    %25 = arith.addf %21, %24 : vector<16x64xf32>
    %cst_23 = arith.constant 0.000000e+00 : f32
    %26 = vector.broadcast %cst_23 : f32 to vector<16x64xf32>
    %27 = arith.maximumf %25, %26 : vector<16x64xf32>
    %28 = arith.truncf %27 : vector<16x64xf32> to vector<16x64xbf16>
    %c0_24 = arith.constant 0 : index
    %c0_25 = arith.constant 0 : index
    %c0_26 = arith.constant 0 : index
    %29 = vector.load %arg5[%c0_24, %c0_25, %c0_26] : memref<1x16x64xbf16, #tpu.memory_space<vmem>>, vector<1x16x64xbf16>
    %30 = vector.shape_cast %29 : vector<1x16x64xbf16> to vector<16x64xbf16>
    %31 = vector.shape_cast %28 : vector<16x64xbf16> to vector<1x16x64xbf16>
    tpu.vector_store %arg5[%c0_24, %c0_25, %c0_26], %31 {strides = array<i32>} : memref<1x16x64xbf16, #tpu.memory_space<vmem>>, vector<1x16x64xbf16>,
    return
  }
  func.func @transform_0(%arg0: i32) -> (i32, i32, i32) {
    %c0_i32 = arith.constant 0 : i32
    %c0_i32_0 = arith.constant 0 : i32
    %c0_i32_1 = arith.constant 0 : i32
    return %arg0, %c0_i32, %c0_i32_0 : i32, i32, i32
  }
  func.func @transform_1(%arg0: i32) -> (i32, i32, i32) {
    %c0_i32 = arith.constant 0 : i32
    %c0_i32_0 = arith.constant 0 : i32
    %c0_i32_1 = arith.constant 0 : i32
    %c0_i32_2 = arith.constant 0 : i32
    return %c0_i32, %c0_i32_0, %c0_i32_1 : i32, i32, i32
  }
  func.func @transform_2(%arg0: i32) -> (i32, i32) {
    %c0_i32 = arith.constant 0 : i32
    %c0_i32_0 = arith.constant 0 : i32
    %c0_i32_1 = arith.constant 0 : i32
    return %c0_i32, %c0_i32_0 : i32, i32
  }
  func.func @transform_3(%arg0: i32) -> (i32, i32, i32) {
    %c0_i32 = arith.constant 0 : i32
    %c0_i32_0 = arith.constant 0 : i32
    %c0_i32_1 = arith.constant 0 : i32
    return %arg0, %c0_i32, %c0_i32_0 : i32, i32, i32
  }
  func.func @transform_4(%arg0: i32) -> (i32, i32, i32) {
    %c0_i32 = arith.constant 0 : i32
    %c0_i32_0 = arith.constant 0 : i32
    %c0_i32_1 = arith.constant 0 : i32
    return %arg0, %c0_i32, %c0_i32_0 : i32, i32, i32
  }
}

module attributes {stable_mosaic.version = 11 : i64} {
  func.func @_tconv_s2_kernel(%arg0: i32, %arg1: memref<1x9x128xbf16, #tpu.memory_space<vmem>>, %arg2: memref<3x128x64xbf16, #tpu.memory_space<vmem>>, %arg3: memref<1x64xf32, #tpu.memory_space<vmem>>, %arg4: memref<1x8x128xbf16, #tpu.memory_space<vmem>>) attributes {dimension_semantics = [#tpu.dimension_semantics<parallel>], iteration_bounds = array<i64: 2>, scalar_prefetch = 0 : i64, scratch_operands = 0 : i64, tpu.core_type = #tpu.core_type<tc>, window_params = [{transform_indices = @transform_0, window_bounds = array<i64: 1, 9, 128>}, {pipeline_mode = #tpu.pipeline_mode<synchronous>, transform_indices = @transform_1, window_bounds = array<i64: 3, 128, 64>}, {pipeline_mode = #tpu.pipeline_mode<synchronous>, transform_indices = @transform_2, window_bounds = array<i64: 1, 64>}, {transform_indices = @transform_3, window_bounds = array<i64: 1, 8, 128>}]} {
    %c0 = arith.constant 0 : index
    %c0_0 = arith.constant 0 : index
    %c0_1 = arith.constant 0 : index
    %0 = vector.load %arg1[%c0, %c0_0, %c0_1] : memref<1x9x128xbf16, #tpu.memory_space<vmem>>, vector<1x8x128xbf16>
    %1 = vector.shape_cast %0 : vector<1x8x128xbf16> to vector<8x128xbf16>
    %c0_2 = arith.constant 0 : index
    %c1 = arith.constant 1 : index
    %c0_3 = arith.constant 0 : index
    %2 = vector.load %arg1[%c0_2, %c1, %c0_3] : memref<1x9x128xbf16, #tpu.memory_space<vmem>>, vector<1x8x128xbf16>
    %3 = vector.shape_cast %2 : vector<1x8x128xbf16> to vector<8x128xbf16>
    %c1_4 = arith.constant 1 : index
    %c0_5 = arith.constant 0 : index
    %c0_6 = arith.constant 0 : index
    %4 = vector.load %arg2[%c1_4, %c0_5, %c0_6] : memref<3x128x64xbf16, #tpu.memory_space<vmem>>, vector<1x128x64xbf16>
    %5 = vector.shape_cast %4 : vector<1x128x64xbf16> to vector<128x64xbf16>
    %cst = arith.constant dense<0.000000e+00> : vector<8x64xf32>
    %6 = tpu.matmul %1, %5, %cst {dimension_numbers = #tpu.dot_dimension_numbers<[1], [0], [0], [1], [0, 0, 1, 1], [], []>} : vector<8x128xbf16>, vector<128x64xbf16>, vector<8x64xf32> -> vector<8x64xf32>
    %c0_7 = arith.constant 0 : index
    %c0_8 = arith.constant 0 : index
    %7 = vector.load %arg3[%c0_7, %c0_8] : memref<1x64xf32, #tpu.memory_space<vmem>>, vector<1x64xf32>
    %8 = vector.broadcast %7 : vector<1x64xf32> to vector<8x64xf32>
    %9 = arith.addf %6, %8 : vector<8x64xf32>
    %c0_9 = arith.constant 0 : index
    %c0_10 = arith.constant 0 : index
    %c0_11 = arith.constant 0 : index
    %10 = vector.load %arg2[%c0_9, %c0_10, %c0_11] : memref<3x128x64xbf16, #tpu.memory_space<vmem>>, vector<1x128x64xbf16>
    %11 = vector.shape_cast %10 : vector<1x128x64xbf16> to vector<128x64xbf16>
    %cst_12 = arith.constant dense<0.000000e+00> : vector<8x64xf32>
    %12 = tpu.matmul %1, %11, %cst_12 {dimension_numbers = #tpu.dot_dimension_numbers<[1], [0], [0], [1], [0, 0, 1, 1], [], []>} : vector<8x128xbf16>, vector<128x64xbf16>, vector<8x64xf32> -> vector<8x64xf32>
    %c2 = arith.constant 2 : index
    %c0_13 = arith.constant 0 : index
    %c0_14 = arith.constant 0 : index
    %13 = vector.load %arg2[%c2, %c0_13, %c0_14] : memref<3x128x64xbf16, #tpu.memory_space<vmem>>, vector<1x128x64xbf16>
    %14 = vector.shape_cast %13 : vector<1x128x64xbf16> to vector<128x64xbf16>
    %cst_15 = arith.constant dense<0.000000e+00> : vector<8x64xf32>
    %15 = tpu.matmul %3, %14, %cst_15 {dimension_numbers = #tpu.dot_dimension_numbers<[1], [0], [0], [1], [0, 0, 1, 1], [], []>} : vector<8x128xbf16>, vector<128x64xbf16>, vector<8x64xf32> -> vector<8x64xf32>
    %16 = arith.addf %12, %15 : vector<8x64xf32>
    %c0_16 = arith.constant 0 : index
    %c0_17 = arith.constant 0 : index
    %17 = vector.load %arg3[%c0_16, %c0_17] : memref<1x64xf32, #tpu.memory_space<vmem>>, vector<1x64xf32>
    %18 = vector.broadcast %17 : vector<1x64xf32> to vector<8x64xf32>
    %19 = arith.addf %16, %18 : vector<8x64xf32>
    %20 = tpu.concatenate %9, %19 in 1 : vector<8x64xf32>, vector<8x64xf32> -> vector<8x128xf32>
    %cst_18 = arith.constant 0.000000e+00 : f32
    %21 = vector.broadcast %cst_18 : f32 to vector<8x128xf32>
    %22 = arith.maximumf %20, %21 : vector<8x128xf32>
    %23 = arith.truncf %22 : vector<8x128xf32> to vector<8x128xbf16>
    %c0_19 = arith.constant 0 : index
    %c0_20 = arith.constant 0 : index
    %c0_21 = arith.constant 0 : index
    %24 = vector.load %arg4[%c0_19, %c0_20, %c0_21] : memref<1x8x128xbf16, #tpu.memory_space<vmem>>, vector<1x8x128xbf16>
    %25 = vector.shape_cast %24 : vector<1x8x128xbf16> to vector<8x128xbf16>
    %26 = vector.shape_cast %23 : vector<8x128xbf16> to vector<1x8x128xbf16>
    tpu.vector_store %arg4[%c0_19, %c0_20, %c0_21], %26 {strides = array<i32>} : memref<1x8x128xbf16, #tpu.memory_space<vmem>>, vector<1x8x128xbf16>,
    return
  }
  func.func @transform_0(%arg0: i32) -> (i32, i32, i32) {
    %c0_i32 = arith.constant 0 : i32
    %c0_i32_0 = arith.constant 0 : i32
    %c0_i32_1 = arith.constant 0 : i32
    return %arg0, %c0_i32, %c0_i32_0 : i32, i32, i32
  }
  func.func @transform_1(%arg0: i32) -> (i32, i32, i32) {
    %c0_i32 = arith.constant 0 : i32
    %c0_i32_0 = arith.constant 0 : i32
    %c0_i32_1 = arith.constant 0 : i32
    %c0_i32_2 = arith.constant 0 : i32
    return %c0_i32, %c0_i32_0, %c0_i32_1 : i32, i32, i32
  }
  func.func @transform_2(%arg0: i32) -> (i32, i32) {
    %c0_i32 = arith.constant 0 : i32
    %c0_i32_0 = arith.constant 0 : i32
    %c0_i32_1 = arith.constant 0 : i32
    return %c0_i32, %c0_i32_0 : i32, i32
  }
  func.func @transform_3(%arg0: i32) -> (i32, i32, i32) {
    %c0_i32 = arith.constant 0 : i32
    %c0_i32_0 = arith.constant 0 : i32
    %c0_i32_1 = arith.constant 0 : i32
    return %arg0, %c0_i32, %c0_i32_0 : i32, i32, i32
  }
}

module attributes {stable_mosaic.version = 11 : i64} {
  func.func @_tconv_s2_kernel(%arg0: i32, %arg1: memref<1x17x64xbf16, #tpu.memory_space<vmem>>, %arg2: memref<3x64x32xbf16, #tpu.memory_space<vmem>>, %arg3: memref<1x32xf32, #tpu.memory_space<vmem>>, %arg4: memref<1x16x64xbf16, #tpu.memory_space<vmem>>) attributes {dimension_semantics = [#tpu.dimension_semantics<parallel>], iteration_bounds = array<i64: 2>, scalar_prefetch = 0 : i64, scratch_operands = 0 : i64, tpu.core_type = #tpu.core_type<tc>, window_params = [{transform_indices = @transform_0, window_bounds = array<i64: 1, 17, 64>}, {pipeline_mode = #tpu.pipeline_mode<synchronous>, transform_indices = @transform_1, window_bounds = array<i64: 3, 64, 32>}, {pipeline_mode = #tpu.pipeline_mode<synchronous>, transform_indices = @transform_2, window_bounds = array<i64: 1, 32>}, {transform_indices = @transform_3, window_bounds = array<i64: 1, 16, 64>}]} {
    %c0 = arith.constant 0 : index
    %c0_0 = arith.constant 0 : index
    %c0_1 = arith.constant 0 : index
    %0 = vector.load %arg1[%c0, %c0_0, %c0_1] : memref<1x17x64xbf16, #tpu.memory_space<vmem>>, vector<1x16x64xbf16>
    %1 = vector.shape_cast %0 : vector<1x16x64xbf16> to vector<16x64xbf16>
    %c0_2 = arith.constant 0 : index
    %c1 = arith.constant 1 : index
    %c0_3 = arith.constant 0 : index
    %2 = vector.load %arg1[%c0_2, %c1, %c0_3] : memref<1x17x64xbf16, #tpu.memory_space<vmem>>, vector<1x16x64xbf16>
    %3 = vector.shape_cast %2 : vector<1x16x64xbf16> to vector<16x64xbf16>
    %c1_4 = arith.constant 1 : index
    %c0_5 = arith.constant 0 : index
    %c0_6 = arith.constant 0 : index
    %4 = vector.load %arg2[%c1_4, %c0_5, %c0_6] : memref<3x64x32xbf16, #tpu.memory_space<vmem>>, vector<1x64x32xbf16>
    %5 = vector.shape_cast %4 : vector<1x64x32xbf16> to vector<64x32xbf16>
    %cst = arith.constant dense<0.000000e+00> : vector<16x32xf32>
    %6 = tpu.matmul %1, %5, %cst {dimension_numbers = #tpu.dot_dimension_numbers<[1], [0], [0], [1], [0, 0, 1, 1], [], []>} : vector<16x64xbf16>, vector<64x32xbf16>, vector<16x32xf32> -> vector<16x32xf32>
    %c0_7 = arith.constant 0 : index
    %c0_8 = arith.constant 0 : index
    %7 = vector.load %arg3[%c0_7, %c0_8] : memref<1x32xf32, #tpu.memory_space<vmem>>, vector<1x32xf32>
    %8 = vector.broadcast %7 : vector<1x32xf32> to vector<16x32xf32>
    %9 = arith.addf %6, %8 : vector<16x32xf32>
    %c0_9 = arith.constant 0 : index
    %c0_10 = arith.constant 0 : index
    %c0_11 = arith.constant 0 : index
    %10 = vector.load %arg2[%c0_9, %c0_10, %c0_11] : memref<3x64x32xbf16, #tpu.memory_space<vmem>>, vector<1x64x32xbf16>
    %11 = vector.shape_cast %10 : vector<1x64x32xbf16> to vector<64x32xbf16>
    %cst_12 = arith.constant dense<0.000000e+00> : vector<16x32xf32>
    %12 = tpu.matmul %1, %11, %cst_12 {dimension_numbers = #tpu.dot_dimension_numbers<[1], [0], [0], [1], [0, 0, 1, 1], [], []>} : vector<16x64xbf16>, vector<64x32xbf16>, vector<16x32xf32> -> vector<16x32xf32>
    %c2 = arith.constant 2 : index
    %c0_13 = arith.constant 0 : index
    %c0_14 = arith.constant 0 : index
    %13 = vector.load %arg2[%c2, %c0_13, %c0_14] : memref<3x64x32xbf16, #tpu.memory_space<vmem>>, vector<1x64x32xbf16>
    %14 = vector.shape_cast %13 : vector<1x64x32xbf16> to vector<64x32xbf16>
    %cst_15 = arith.constant dense<0.000000e+00> : vector<16x32xf32>
    %15 = tpu.matmul %3, %14, %cst_15 {dimension_numbers = #tpu.dot_dimension_numbers<[1], [0], [0], [1], [0, 0, 1, 1], [], []>} : vector<16x64xbf16>, vector<64x32xbf16>, vector<16x32xf32> -> vector<16x32xf32>
    %16 = arith.addf %12, %15 : vector<16x32xf32>
    %c0_16 = arith.constant 0 : index
    %c0_17 = arith.constant 0 : index
    %17 = vector.load %arg3[%c0_16, %c0_17] : memref<1x32xf32, #tpu.memory_space<vmem>>, vector<1x32xf32>
    %18 = vector.broadcast %17 : vector<1x32xf32> to vector<16x32xf32>
    %19 = arith.addf %16, %18 : vector<16x32xf32>
    %20 = tpu.concatenate %9, %19 in 1 : vector<16x32xf32>, vector<16x32xf32> -> vector<16x64xf32>
    %cst_18 = arith.constant 0.000000e+00 : f32
    %21 = vector.broadcast %cst_18 : f32 to vector<16x64xf32>
    %22 = arith.maximumf %20, %21 : vector<16x64xf32>
    %23 = arith.truncf %22 : vector<16x64xf32> to vector<16x64xbf16>
    %c0_19 = arith.constant 0 : index
    %c0_20 = arith.constant 0 : index
    %c0_21 = arith.constant 0 : index
    %24 = vector.load %arg4[%c0_19, %c0_20, %c0_21] : memref<1x16x64xbf16, #tpu.memory_space<vmem>>, vector<1x16x64xbf16>
    %25 = vector.shape_cast %24 : vector<1x16x64xbf16> to vector<16x64xbf16>
    %26 = vector.shape_cast %23 : vector<16x64xbf16> to vector<1x16x64xbf16>
    tpu.vector_store %arg4[%c0_19, %c0_20, %c0_21], %26 {strides = array<i32>} : memref<1x16x64xbf16, #tpu.memory_space<vmem>>, vector<1x16x64xbf16>,
    return
  }
  func.func @transform_0(%arg0: i32) -> (i32, i32, i32) {
    %c0_i32 = arith.constant 0 : i32
    %c0_i32_0 = arith.constant 0 : i32
    %c0_i32_1 = arith.constant 0 : i32
    return %arg0, %c0_i32, %c0_i32_0 : i32, i32, i32
  }
  func.func @transform_1(%arg0: i32) -> (i32, i32, i32) {
    %c0_i32 = arith.constant 0 : i32
    %c0_i32_0 = arith.constant 0 : i32
    %c0_i32_1 = arith.constant 0 : i32
    %c0_i32_2 = arith.constant 0 : i32
    return %c0_i32, %c0_i32_0, %c0_i32_1 : i32, i32, i32
  }
  func.func @transform_2(%arg0: i32) -> (i32, i32) {
    %c0_i32 = arith.constant 0 : i32
    %c0_i32_0 = arith.constant 0 : i32
    %c0_i32_1 = arith.constant 0 : i32
    return %c0_i32, %c0_i32_0 : i32, i32
  }
  func.func @transform_3(%arg0: i32) -> (i32, i32, i32) {
    %c0_i32 = arith.constant 0 : i32
    %c0_i32_0 = arith.constant 0 : i32
    %c0_i32_1 = arith.constant 0 : i32
    return %arg0, %c0_i32, %c0_i32_0 : i32, i32, i32
  }
}

module attributes {stable_mosaic.version = 11 : i64} {
  func.func @_tconv_s2_kernel(%arg0: i32, %arg1: memref<1x33x32xbf16, #tpu.memory_space<vmem>>, %arg2: memref<3x32x1xbf16, #tpu.memory_space<vmem>>, %arg3: memref<1x1xf32, #tpu.memory_space<vmem>>, %arg4: memref<1x32x2xbf16, #tpu.memory_space<vmem>>) attributes {dimension_semantics = [#tpu.dimension_semantics<parallel>], iteration_bounds = array<i64: 2>, scalar_prefetch = 0 : i64, scratch_operands = 0 : i64, tpu.core_type = #tpu.core_type<tc>, window_params = [{transform_indices = @transform_0, window_bounds = array<i64: 1, 33, 32>}, {pipeline_mode = #tpu.pipeline_mode<synchronous>, transform_indices = @transform_1, window_bounds = array<i64: 3, 32, 1>}, {pipeline_mode = #tpu.pipeline_mode<synchronous>, transform_indices = @transform_2, window_bounds = array<i64: 1, 1>}, {transform_indices = @transform_3, window_bounds = array<i64: 1, 32, 2>}]} {
    %c0 = arith.constant 0 : index
    %c0_0 = arith.constant 0 : index
    %c0_1 = arith.constant 0 : index
    %0 = vector.load %arg1[%c0, %c0_0, %c0_1] : memref<1x33x32xbf16, #tpu.memory_space<vmem>>, vector<1x32x32xbf16>
    %1 = vector.shape_cast %0 : vector<1x32x32xbf16> to vector<32x32xbf16>
    %c0_2 = arith.constant 0 : index
    %c1 = arith.constant 1 : index
    %c0_3 = arith.constant 0 : index
    %2 = vector.load %arg1[%c0_2, %c1, %c0_3] : memref<1x33x32xbf16, #tpu.memory_space<vmem>>, vector<1x32x32xbf16>
    %3 = vector.shape_cast %2 : vector<1x32x32xbf16> to vector<32x32xbf16>
    %c1_4 = arith.constant 1 : index
    %c0_5 = arith.constant 0 : index
    %c0_6 = arith.constant 0 : index
    %4 = vector.load %arg2[%c1_4, %c0_5, %c0_6] : memref<3x32x1xbf16, #tpu.memory_space<vmem>>, vector<1x32x1xbf16>
    %5 = vector.shape_cast %4 : vector<1x32x1xbf16> to vector<32x1xbf16>
    %cst = arith.constant dense<0.000000e+00> : vector<32x1xf32>
    %6 = tpu.matmul %1, %5, %cst {dimension_numbers = #tpu.dot_dimension_numbers<[1], [0], [0], [1], [0, 0, 1, 1], [], []>} : vector<32x32xbf16>, vector<32x1xbf16>, vector<32x1xf32> -> vector<32x1xf32>
    %c0_7 = arith.constant 0 : index
    %c0_8 = arith.constant 0 : index
    %7 = vector.load %arg3[%c0_7, %c0_8] : memref<1x1xf32, #tpu.memory_space<vmem>>, vector<1x1xf32>
    %8 = vector.broadcast %7 : vector<1x1xf32> to vector<32x1xf32>
    %9 = arith.addf %6, %8 : vector<32x1xf32>
    %c0_9 = arith.constant 0 : index
    %c0_10 = arith.constant 0 : index
    %c0_11 = arith.constant 0 : index
    %10 = vector.load %arg2[%c0_9, %c0_10, %c0_11] : memref<3x32x1xbf16, #tpu.memory_space<vmem>>, vector<1x32x1xbf16>
    %11 = vector.shape_cast %10 : vector<1x32x1xbf16> to vector<32x1xbf16>
    %cst_12 = arith.constant dense<0.000000e+00> : vector<32x1xf32>
    %12 = tpu.matmul %1, %11, %cst_12 {dimension_numbers = #tpu.dot_dimension_numbers<[1], [0], [0], [1], [0, 0, 1, 1], [], []>} : vector<32x32xbf16>, vector<32x1xbf16>, vector<32x1xf32> -> vector<32x1xf32>
    %c2 = arith.constant 2 : index
    %c0_13 = arith.constant 0 : index
    %c0_14 = arith.constant 0 : index
    %13 = vector.load %arg2[%c2, %c0_13, %c0_14] : memref<3x32x1xbf16, #tpu.memory_space<vmem>>, vector<1x32x1xbf16>
    %14 = vector.shape_cast %13 : vector<1x32x1xbf16> to vector<32x1xbf16>
    %cst_15 = arith.constant dense<0.000000e+00> : vector<32x1xf32>
    %15 = tpu.matmul %3, %14, %cst_15 {dimension_numbers = #tpu.dot_dimension_numbers<[1], [0], [0], [1], [0, 0, 1, 1], [], []>} : vector<32x32xbf16>, vector<32x1xbf16>, vector<32x1xf32> -> vector<32x1xf32>
    %16 = arith.addf %12, %15 : vector<32x1xf32>
    %c0_16 = arith.constant 0 : index
    %c0_17 = arith.constant 0 : index
    %17 = vector.load %arg3[%c0_16, %c0_17] : memref<1x1xf32, #tpu.memory_space<vmem>>, vector<1x1xf32>
    %18 = vector.broadcast %17 : vector<1x1xf32> to vector<32x1xf32>
    %19 = arith.addf %16, %18 : vector<32x1xf32>
    %20 = tpu.concatenate %9, %19 in 1 : vector<32x1xf32>, vector<32x1xf32> -> vector<32x2xf32>
    %cst_18 = arith.constant 0.000000e+00 : f32
    %21 = vector.broadcast %cst_18 : f32 to vector<32x2xf32>
    %22 = arith.maximumf %20, %21 : vector<32x2xf32>
    %23 = arith.truncf %22 : vector<32x2xf32> to vector<32x2xbf16>
    %c0_19 = arith.constant 0 : index
    %c0_20 = arith.constant 0 : index
    %c0_21 = arith.constant 0 : index
    %24 = vector.load %arg4[%c0_19, %c0_20, %c0_21] : memref<1x32x2xbf16, #tpu.memory_space<vmem>>, vector<1x32x2xbf16>
    %25 = vector.shape_cast %24 : vector<1x32x2xbf16> to vector<32x2xbf16>
    %26 = vector.shape_cast %23 : vector<32x2xbf16> to vector<1x32x2xbf16>
    tpu.vector_store %arg4[%c0_19, %c0_20, %c0_21], %26 {strides = array<i32>} : memref<1x32x2xbf16, #tpu.memory_space<vmem>>, vector<1x32x2xbf16>,
    return
  }
  func.func @transform_0(%arg0: i32) -> (i32, i32, i32) {
    %c0_i32 = arith.constant 0 : i32
    %c0_i32_0 = arith.constant 0 : i32
    %c0_i32_1 = arith.constant 0 : i32
    return %arg0, %c0_i32, %c0_i32_0 : i32, i32, i32
  }
  func.func @transform_1(%arg0: i32) -> (i32, i32, i32) {
    %c0_i32 = arith.constant 0 : i32
    %c0_i32_0 = arith.constant 0 : i32
    %c0_i32_1 = arith.constant 0 : i32
    %c0_i32_2 = arith.constant 0 : i32
    return %c0_i32, %c0_i32_0, %c0_i32_1 : i32, i32, i32
  }
  func.func @transform_2(%arg0: i32) -> (i32, i32) {
    %c0_i32 = arith.constant 0 : i32
    %c0_i32_0 = arith.constant 0 : i32
    %c0_i32_1 = arith.constant 0 : i32
    return %c0_i32, %c0_i32_0 : i32, i32
  }
  func.func @transform_3(%arg0: i32) -> (i32, i32, i32) {
    %c0_i32 = arith.constant 0 : i32
    %c0_i32_0 = arith.constant 0 : i32
    %c0_i32_1 = arith.constant 0 : i32
    return %arg0, %c0_i32, %c0_i32_0 : i32, i32, i32
  }
}

module attributes {stable_mosaic.version = 11 : i64} {
  func.func @_head_kernel(%arg0: i32, %arg1: memref<2x1024xbf16, #tpu.memory_space<vmem>>, %arg2: memref<1024x128xbf16, #tpu.memory_space<vmem>>, %arg3: memref<1x128xf32, #tpu.memory_space<vmem>>, %arg4: memref<128x64xbf16, #tpu.memory_space<vmem>>, %arg5: memref<1x64xf32, #tpu.memory_space<vmem>>, %arg6: memref<64x5xbf16, #tpu.memory_space<vmem>>, %arg7: memref<1x5xf32, #tpu.memory_space<vmem>>, %arg8: memref<2x5xf32, #tpu.memory_space<vmem>>, %arg9: memref<2x128xf32, #tpu.memory_space<vmem>>) attributes {dimension_semantics = [#tpu.dimension_semantics<arbitrary>], iteration_bounds = array<i64: 1>, scalar_prefetch = 0 : i64, scratch_operands = 1 : i64, tpu.core_type = #tpu.core_type<tc>, window_params = [{transform_indices = @transform_0, window_bounds = array<i64: 2, 1024>}, {transform_indices = @transform_1, window_bounds = array<i64: 1024, 128>}, {pipeline_mode = #tpu.pipeline_mode<synchronous>, transform_indices = @transform_2, window_bounds = array<i64: 1, 128>}, {pipeline_mode = #tpu.pipeline_mode<synchronous>, transform_indices = @transform_3, window_bounds = array<i64: 128, 64>}, {pipeline_mode = #tpu.pipeline_mode<synchronous>, transform_indices = @transform_4, window_bounds = array<i64: 1, 64>}, {pipeline_mode = #tpu.pipeline_mode<synchronous>, transform_indices = @transform_5, window_bounds = array<i64: 64, 5>}, {pipeline_mode = #tpu.pipeline_mode<synchronous>, transform_indices = @transform_6, window_bounds = array<i64: 1, 5>}, {pipeline_mode = #tpu.pipeline_mode<synchronous>, transform_indices = @transform_7, window_bounds = array<i64: 2, 5>}]} {
    %c0_i32 = arith.constant 0 : i32
    %0 = arith.cmpi eq, %arg0, %c0_i32 : i32
    %1 = arith.extui %0 : i1 to i32
    %c0_i32_0 = arith.constant 0 : i32
    %2 = arith.cmpi ne, %1, %c0_i32_0 : i32
    scf.if %2 {
      %cst_10 = arith.constant 0.000000e+00 : f32
      %12 = vector.broadcast %cst_10 : f32 to vector<2x128xf32>
      %c0_11 = arith.constant 0 : index
      %c0_12 = arith.constant 0 : index
      %13 = vector.load %arg9[%c0_11, %c0_12] : memref<2x128xf32, #tpu.memory_space<vmem>>, vector<2x128xf32>
      tpu.vector_store %arg9[%c0_11, %c0_12], %12 {strides = array<i32>} : memref<2x128xf32, #tpu.memory_space<vmem>>, vector<2x128xf32>,
    } else {
    }
    %c0 = arith.constant 0 : index
    %c0_1 = arith.constant 0 : index
    %3 = vector.load %arg9[%c0, %c0_1] : memref<2x128xf32, #tpu.memory_space<vmem>>, vector<2x128xf32>
    %c0_2 = arith.constant 0 : index
    %c0_3 = arith.constant 0 : index
    %4 = vector.load %arg1[%c0_2, %c0_3] : memref<2x1024xbf16, #tpu.memory_space<vmem>>, vector<2x1024xbf16>
    %c0_4 = arith.constant 0 : index
    %c0_5 = arith.constant 0 : index
    %5 = vector.load %arg2[%c0_4, %c0_5] : memref<1024x128xbf16, #tpu.memory_space<vmem>>, vector<1024x128xbf16>
    %cst = arith.constant dense<0.000000e+00> : vector<2x128xf32>
    %6 = tpu.matmul %4, %5, %cst {dimension_numbers = #tpu.dot_dimension_numbers<[1], [0], [0], [1], [0, 0, 1, 1], [], []>} : vector<2x1024xbf16>, vector<1024x128xbf16>, vector<2x128xf32> -> vector<2x128xf32>
    %7 = arith.addf %3, %6 : vector<2x128xf32>
    %c0_6 = arith.constant 0 : index
    %c0_7 = arith.constant 0 : index
    %8 = vector.load %arg9[%c0_6, %c0_7] : memref<2x128xf32, #tpu.memory_space<vmem>>, vector<2x128xf32>
    tpu.vector_store %arg9[%c0_6, %c0_7], %7 {strides = array<i32>} : memref<2x128xf32, #tpu.memory_space<vmem>>, vector<2x128xf32>,
    %c0_i32_8 = arith.constant 0 : i32
    %9 = arith.cmpi eq, %arg0, %c0_i32_8 : i32
    %10 = arith.extui %9 : i1 to i32
    %c0_i32_9 = arith.constant 0 : i32
    %11 = arith.cmpi ne, %10, %c0_i32_9 : i32
    scf.if %11 {
      %c0_10 = arith.constant 0 : index
      %c0_11 = arith.constant 0 : index
      %12 = vector.load %arg9[%c0_10, %c0_11] : memref<2x128xf32, #tpu.memory_space<vmem>>, vector<2x128xf32>
      %c0_12 = arith.constant 0 : index
      %c0_13 = arith.constant 0 : index
      %13 = vector.load %arg3[%c0_12, %c0_13] : memref<1x128xf32, #tpu.memory_space<vmem>>, vector<1x128xf32>
      %14 = vector.broadcast %13 : vector<1x128xf32> to vector<2x128xf32>
      %15 = arith.addf %12, %14 : vector<2x128xf32>
      %cst_14 = arith.constant 0.000000e+00 : f32
      %16 = vector.broadcast %cst_14 : f32 to vector<2x128xf32>
      %17 = arith.maximumf %15, %16 : vector<2x128xf32>
      %18 = arith.truncf %17 : vector<2x128xf32> to vector<2x128xbf16>
      %c0_15 = arith.constant 0 : index
      %c0_16 = arith.constant 0 : index
      %19 = vector.load %arg4[%c0_15, %c0_16] : memref<128x64xbf16, #tpu.memory_space<vmem>>, vector<128x64xbf16>
      %cst_17 = arith.constant dense<0.000000e+00> : vector<2x64xf32>
      %20 = tpu.matmul %18, %19, %cst_17 {dimension_numbers = #tpu.dot_dimension_numbers<[1], [0], [0], [1], [0, 0, 1, 1], [], []>} : vector<2x128xbf16>, vector<128x64xbf16>, vector<2x64xf32> -> vector<2x64xf32>
      %c0_18 = arith.constant 0 : index
      %c0_19 = arith.constant 0 : index
      %21 = vector.load %arg5[%c0_18, %c0_19] : memref<1x64xf32, #tpu.memory_space<vmem>>, vector<1x64xf32>
      %22 = vector.broadcast %21 : vector<1x64xf32> to vector<2x64xf32>
      %23 = arith.addf %20, %22 : vector<2x64xf32>
      %cst_20 = arith.constant 0.000000e+00 : f32
      %24 = vector.broadcast %cst_20 : f32 to vector<2x64xf32>
      %25 = arith.maximumf %23, %24 : vector<2x64xf32>
      %26 = arith.truncf %25 : vector<2x64xf32> to vector<2x64xbf16>
      %c0_21 = arith.constant 0 : index
      %c0_22 = arith.constant 0 : index
      %27 = vector.load %arg6[%c0_21, %c0_22] : memref<64x5xbf16, #tpu.memory_space<vmem>>, vector<64x5xbf16>
      %cst_23 = arith.constant dense<0.000000e+00> : vector<2x5xf32>
      %28 = tpu.matmul %26, %27, %cst_23 {dimension_numbers = #tpu.dot_dimension_numbers<[1], [0], [0], [1], [0, 0, 1, 1], [], []>} : vector<2x64xbf16>, vector<64x5xbf16>, vector<2x5xf32> -> vector<2x5xf32>
      %c0_24 = arith.constant 0 : index
      %c0_25 = arith.constant 0 : index
      %29 = vector.load %arg7[%c0_24, %c0_25] : memref<1x5xf32, #tpu.memory_space<vmem>>, vector<1x5xf32>
      %30 = vector.broadcast %29 : vector<1x5xf32> to vector<2x5xf32>
      %31 = arith.addf %28, %30 : vector<2x5xf32>
      %c0_26 = arith.constant 0 : index
      %c0_27 = arith.constant 0 : index
      %32 = vector.load %arg8[%c0_26, %c0_27] : memref<2x5xf32, #tpu.memory_space<vmem>>, vector<2x5xf32>
      tpu.vector_store %arg8[%c0_26, %c0_27], %31 {strides = array<i32>} : memref<2x5xf32, #tpu.memory_space<vmem>>, vector<2x5xf32>,
    } else {
    }
    return
  }
  func.func @transform_0(%arg0: i32) -> (i32, i32) {
    %c0_i32 = arith.constant 0 : i32
    %c0_i32_0 = arith.constant 0 : i32
    return %c0_i32, %arg0 : i32, i32
  }
  func.func @transform_1(%arg0: i32) -> (i32, i32) {
    %c0_i32 = arith.constant 0 : i32
    %c0_i32_0 = arith.constant 0 : i32
    return %arg0, %c0_i32 : i32, i32
  }
  func.func @transform_2(%arg0: i32) -> (i32, i32) {
    %c0_i32 = arith.constant 0 : i32
    %c0_i32_0 = arith.constant 0 : i32
    %c0_i32_1 = arith.constant 0 : i32
    return %c0_i32, %c0_i32_0 : i32, i32
  }
  func.func @transform_3(%arg0: i32) -> (i32, i32) {
    %c0_i32 = arith.constant 0 : i32
    %c0_i32_0 = arith.constant 0 : i32
    %c0_i32_1 = arith.constant 0 : i32
    return %c0_i32, %c0_i32_0 : i32, i32
  }
  func.func @transform_4(%arg0: i32) -> (i32, i32) {
    %c0_i32 = arith.constant 0 : i32
    %c0_i32_0 = arith.constant 0 : i32
    %c0_i32_1 = arith.constant 0 : i32
    return %c0_i32, %c0_i32_0 : i32, i32
  }
  func.func @transform_5(%arg0: i32) -> (i32, i32) {
    %c0_i32 = arith.constant 0 : i32
    %c0_i32_0 = arith.constant 0 : i32
    %c0_i32_1 = arith.constant 0 : i32
    return %c0_i32, %c0_i32_0 : i32, i32
  }
  func.func @transform_6(%arg0: i32) -> (i32, i32) {
    %c0_i32 = arith.constant 0 : i32
    %c0_i32_0 = arith.constant 0 : i32
    %c0_i32_1 = arith.constant 0 : i32
    return %c0_i32, %c0_i32_0 : i32, i32
  }
  func.func @transform_7(%arg0: i32) -> (i32, i32) {
    %c0_i32 = arith.constant 0 : i32
    %c0_i32_0 = arith.constant 0 : i32
    %c0_i32_1 = arith.constant 0 : i32
    return %c0_i32, %c0_i32_0 : i32, i32
  }
}

</mosaic_0001>

<bundles_post_ra>
// kernel: deep_model_forward.17
= control target key start
LH: loop header
LB: loop body
LE: loop exit
PB: predicated region body
PF: predicated region fallthrough
CT: control target
= control target key end

     0   :  { %s757_s15 = smov 0   ;;  %s814_s0 = inlined_call_operand.vmem [shape: bf16[2,34,32], index: 0, kind: input, shape index: {}]   ;;  %s815_s1 = inlined_call_operand.vmem [shape: bf16[3,32,32], index: 1, kind: input, shape index: {}]   ;;  %s816_s2 = inlined_call_operand.vmem [shape: f32[1,32], index: 2, kind: input, shape index: {}]   ;;  %s817_s3 = inlined_call_operand.vmem [shape: bf16[2,32,32], index: 3, kind: input, shape index: {}]   ;;  %s818_s4 = inlined_call_operand.vmem [shape: bf16[2,32,32], index: 4, kind: output, shape index: {}]  }
   0x1 LB: > { %s605_s16 = sadd.s32 4294967295, %s730_s15   ;;  %p609_p0 = scmp.ge.s32.totalorder %s730_s15, 1  ;;  %s730_s15 = sphi %s757_s15, %s14_s15  }
   0x2   : > { %p172_p1 = scmp.lt.s32.totalorder %s730_s15, 3 }
   0x4   : > { %p173_p2 = pnand %p609_p0, %p172_p1 }
   0x5   : > { %v714_v0 = vld [vmem:[%s815_s1] sm:$0xff] (!%p173_p2)   ;;  %p203_p3 = scmp.lt.s32.totalorder (!%p173_p2), %s605_s16, 1  ;;  %v715_v1 = vld [vmem:[%s815_s1 + $0x8] sm:$0xff] (!%p173_p2)   ;;  %v720_v3 = vld [vmem:[%s815_s1 + $0x10] sm:$0xff] (!%p173_p2)   ;;  %vm279_vm0 = vcmask (!%p173_p2), 261120   ;;  %vm409_vm1 = vcmask (!%p173_p2), 1046528  }
   0x6   : > { %176 = sbr.rel (%p173_p2) target bundleno = 261 (0x105), region = 36  ;;  %681 = vmatprep.subr.bf16.mxu0 (!%p173_p2), %v714_v0  ;;  %v719_v2 = vld [vmem:[%s815_s1 + $0x20] sm:$0xff] (!%p173_p2)   ;;  %v721_v4 = vld [vmem:[%s815_s1 + $0x18] sm:$0xff] (!%p173_p2)   ;;  %673 = vmatprep.subr.bf16.mxu1 (!%p173_p2), %v720_v3  ;;  %v722_v11 = vld [vmem:[%s815_s1 + $0x28] sm:$0xff] (!%p173_p2)   ;;  %vm246_vm2 = vsmask.f32 (!%p173_p2), 7424 }
   0x7   : > { %682 = vmatpush3.bf16.msra.mxu0 (!%p173_p2), %v714_v0  ;;  %674 = vmatpush3.bf16.msra.mxu1 (!%p173_p2), %v720_v3  ;;  %v639_v35 = vld [vmem:[%s816_s2] ss:$0 sm:$0xff] (!%p173_p2)  ;;  %vm533_vm3 = vcmask (!%p173_p2), 257024  }
   0x8   : > { %683 = vmatprep.subr.bf16.mxu0 (!%p173_p2), %v715_v1  ;;  %675 = vmatprep.subr.bf16.mxu1 (!%p173_p2), %v721_v4 }
   0xb   : > { %684 = vmatpush3.bf16.msra.mxu0 (!%p173_p2), %v715_v1  ;;  %676 = vmatpush3.bf16.msra.mxu1 (!%p173_p2), %v721_v4 }
   0xc   : > { %689 = vmatprep.subr.bf16.mxu0 (!%p173_p2), %v719_v2 }
   0xd   : > { %s820_s16 = smov (!%p203_p3, %s605_s16), 1 }
   0xe   : > { %s705_s25 = smul.u32 20, %s820_s16  ;;  %s646_s7 = sshll.u32 %s820_s16, 4 }
   0xf   : > { %s212_s10 = scalar_lea.vmem %s817_s3, %s646_s7  ;;  %s217_s17 = scalar_lea.vmem %s818_s4, %s646_s7 }
  0x10   : > { %s207_s30 = scalar_lea.vmem %s814_s0, %s705_s25  ;;  %v660_v36 = vld [vmem:[%s212_s10 + $0x8] sm:$0xff]   ;;  %v653_v39 = vld [vmem:[%s212_s10] sm:$0xff]  }
  0x11   : > { %v219_v5 = vld [vmem:[%s207_s30] sm:$0xf]  ;;  %v220_v6 = vld [vmem:[%s207_s30 + $0x4] sm:$0xf]  ;;  %v718_v10 = vld [vmem:[%s207_s30 + $0x8] sm:$0xff]   ;;  %v658_v43 = vunpack.c.l.bf16 %v660_v36  ;;  %v654_v47 = vunpack.c.l.bf16 %v653_v39  ;;  %v659_v51 = vunpack.c.h.bf16 %v660_v36  ;;  %v655_v54 = vunpack.c.h.bf16 %v653_v39 }
  0x12   : > { %v400_v7 = vld [vmem:[%s207_s30] sm:$0xe]  ;;  %v619_v8 = vcombine.low %v219_v5, %v220_v6  ;;  %v723_v12 = vld [vmem:[%s207_s30 + $0x10] ss:$0 sps:$4 sm:$0x11]   ;;  %v255_v16 = vshll.u32 %v718_v10, 16 }
  0x13   : > { %v634_v9 = vcombine.low %v400_v7, %v220_v6  ;;  %v259_v17 = vshrl.u32 %v718_v10, 16  ;;  %v263_v18 = vshll.u32 %v723_v12, 16  ;;  %v411_v19 = vrot.slane %v718_v10, 1 }
  0x14   : > { %685 = vmatprep.mubr.msk.bf16.mxu0 %vm279_vm0, %v619_v8  ;;  %v248_v14 = vshrl.u32 %v619_v8, 16  ;;  %v250_v15 = vshll.u32 %v619_v8, 16  ;;  %v257_v21 = vrot.slane %v255_v16, 1  ;;  %v413_v28 = vrot.slane %v723_v12, 1 }
  0x15   : > { %v410_v13 = vrot.slane %v634_v9, 1  ;;  %686 = vmatmul.mubr.msk.bf16.vlgmr.msra.gmra.mrb[0].mxu0 %vm279_vm0, %v718_v10  ;;  %v265_v22 = vrot.slane %v263_v18, 1 }
  0x16   : > { %690 = vmatpush3.bf16.msra.mxu0 %v719_v2  ;;  %v252_v20 = vrot.slane %v250_v15, 1  ;;  %v261_v25 = vor.u32 %v259_v17, %v257_v21  ;;  %v414_v29 = vsel %vm409_vm1, %v411_v19, %v413_v28 }
  0x17   : > { %691 = vmatprep.subr.bf16.mxu0 %v722_v11  ;;  %v412_v23 = vsel %vm409_vm1, %v410_v13, %v411_v19 }
  0x18   : > { %v253_v24 = vor.u32 %v252_v20, %v248_v14  ;;  %693 = vmatprep.mubr.msk.bf16.mxu0 %vm279_vm0, %v412_v23  ;;  %v266_v27 = vsel %vm246_vm2, %v261_v25, %v265_v22 }
  0x1a   : > { %692 = vmatpush3.bf16.msra.mxu0 %v722_v11  ;;  %v258_v26 = vsel %vm246_vm2, %v253_v24, %v257_v21 }
  0x1b   : > { %677 = vmatprep.mubr.msk.bf16.mxu1 %vm279_vm0, %v258_v26 }
  0x1c   : > { %678 = vmatmul.mubr.msk.bf16.vlgmr.msra.gmra.mrb[0].mxu1 %vm279_vm0, %v266_v27 }
  0x21   : > { %694 = vmatmul.mubr.msk.bf16.vlgmr.msra.gmra.mrb[0].mxu0 %vm279_vm0, %v414_v29 }
  0xef   : > { %v679_v30 = vpop.f32.mrb[0].mxu1 }
  0xf0   : > { %v320_v31 = vpop.f32.mrb[1].mxu1 }
  0xf1   : > { %v680_v32 = vpop.f32.mrb[2].mxu1 }
  0xf2   : > { %v323_v33 = vpop.f32.mrb[3].mxu1 }
  0xf4   : > { %v695_v34 = vpop.f32.mrb[0].mxu0 }
  0xf5   : > { %v697_v37 = vadd.f32 %v695_v34, %v679_v30  ;;  %v467_v38 = vpop.f32.mrb[1].mxu0 }
  0xf6   : > { %v698_v40 = vadd.f32 %v467_v38, %v320_v31  ;;  %v696_v41 = vpop.f32.mrb[2].mxu0 }
  0xf7   : > { %v495_v42 = vadd.f32 %v697_v37, %v639_v35  ;;  %v699_v44 = vadd.f32 %v696_v41, %v680_v32  ;;  %v470_v45 = vpop.f32.mrb[3].mxu0 }
  0xf8   : > { %v493_v46 = vadd.f32 %v698_v40, %v639_v35  ;;  %v700_v48 = vadd.f32 %v470_v45, %v323_v33 }
  0xf9   : > { %v499_v49 = vmax.f32 %v495_v42, 0.0  ;;  %v496_v50 = vadd.f32 %v699_v44, %v639_v35 }
  0xfa   : > { %v497_v52 = vmax.f32 %v493_v46, 0.0  ;;  %v494_v53 = vadd.f32 %v700_v48, %v639_v35 }
  0xfb   : > { %v511_v55 = vadd.f32 %v658_v43, %v499_v49  ;;  %v500_v56 = vmax.f32 %v496_v50, 0.0 }
  0xfc   : > { %v509_v57 = vadd.f32 %v654_v47, %v497_v52  ;;  %v498_v58 = vmax.f32 %v494_v53, 0.0 }
  0xfd   : > { %v515_v59 = vmax.f32 %v511_v55, 0.0  ;;  %v512_v60 = vadd.f32 %v659_v51, %v500_v56 }
  0xfe   : > { %v513_v61 = vmax.f32 %v509_v57, 0.0  ;;  %v510_v62 = vadd.f32 %v655_v54, %v498_v58 }
  0xff   : > { %v650_v63 = vpack.c.bf16 %v515_v59, %v515_v59  ;;  %v516_v0 = vmax.f32 %v512_v60, 0.0 }
 0x100   : > { %v648_v1 = vpack.c.bf16 %v513_v61, %v513_v61  ;;  %v514_v2 = vmax.f32 %v510_v62, 0.0 }
 0x101   : > { %536 = vst.msk [vmem:[%s217_s17 + $0x8] sm:$0xf] %vm533_vm3, %v650_v63  ;;  %v651_v3 = vpack.c.bf16 %v516_v0, %v516_v0 }
 0x102   : > { %534 = vst.msk [vmem:[%s217_s17] sm:$0xf] %vm533_vm3, %v648_v1  ;;  %v649_v4 = vpack.c.bf16 %v514_v2, %v514_v2 }
 0x103   : > { %537 = vst.msk [vmem:[%s217_s17 + $0xc] sm:$0xf] %vm533_vm3, %v651_v3 }
 0x104   : > { %535 = vst.msk [vmem:[%s217_s17 + $0x4] sm:$0xf] %vm533_vm3, %v649_v4 }
 0x105 PF: > { %s14_s15 = sadd.s32 1, %s730_s15  }
 0x106   : > { %p11_p4 = scmp.ge.s32.totalorder %s14_s15, 4  }
 0x108   :  { %13 = sbr.rel (!%p11_p4) target bundleno = 1 (0x1), region = 71 }

// kernel: deep_model_forward.15
= control target key start
LH: loop header
LB: loop body
LE: loop exit
PB: predicated region body
PF: predicated region fallthrough
CT: control target
= control target key end

     0   :  { %s601_s12 = smov 0   ;;  %s640_s0 = inlined_call_operand.vmem [shape: bf16[2,33,2], index: 0, kind: input, shape index: {}]   ;;  %s641_s1 = inlined_call_operand.vmem [shape: bf16[3,1,32], index: 1, kind: input, shape index: {}]   ;;  %s642_s2 = inlined_call_operand.vmem [shape: f32[1,32], index: 2, kind: input, shape index: {}]   ;;  %s643_s3 = inlined_call_operand.vmem [shape: bf16[2,32,32], index: 3, kind: output, shape index: {}]  }
   0x1 LB: > { %s491_s13 = sadd.s32 4294967295, %s577_s12   ;;  %p495_p0 = scmp.ge.s32.totalorder %s577_s12, 1  ;;  %s577_s12 = sphi %s601_s12, %s13_s12  }
   0x2   : > { %p137_p1 = scmp.lt.s32.totalorder %s577_s12, 3 }
   0x4   : > { %p138_p2 = pnand %p495_p0, %p137_p1 }
   0x5   : > { %p161_p3 = scmp.lt.s32.totalorder (!%p138_p2), %s491_s13, 1  ;;  %v177_v0 = vld [vmem:[%s641_s1] sm:$0x1] (!%p138_p2)  ;;  %vm201_vm0 = vcmask (!%p138_p2), 1040384   ;;  %v579_v1 = vmov (!%p138_p2), 0   ;;  %vm194_vm1 = vcmask (!%p138_p2), 7168  }
   0x6   : > { %141 = sbr.rel (%p138_p2) target bundleno = 361 (0x169), region = 32  ;;  %v203_v2 = vsel (!%p138_p2), %vm201_vm0, 65535, %v579_v1  ;;  %v506_v3 = vld [vmem:[%s641_s1 + $0x2] sm:$0x1] (!%p138_p2)  ;;  %v499_v6 = vld [vmem:[%s641_s1 + $0x1] sm:$0x1] (!%p138_p2) }
   0x7   : > { %v263_v4 = vand.u32 (!%p138_p2), %v203_v2, %v177_v0  ;;  %v345_v5 = vand.u32 (!%p138_p2), %v506_v3, %v203_v2  ;;  %v205_v7 = vand.u32 (!%p138_p2), %v499_v6, %v203_v2  ;;  %s580_s24 = smov (!%p138_p2), 127   ;;  %vm319_vm2 = vsmask.f32 (!%p138_p2), 7424  ;;  %v510_v30 = vld [vmem:[%s642_s2] ss:$0 sm:$0xff] (!%p138_p2) }
   0x8   : > { %vm431_vm3 = vcmask (!%p138_p2), 257024  }
   0x9   : > { %537 = vmatprep.subr.bf16.mxu0 (!%p138_p2), %v263_v4  ;;  %531 = vmatprep.subr.bf16.mxu1 (!%p138_p2), %v205_v7 }
   0xa   : > { %538 = vmatpush3.bf16.msra.mxu0 (!%p138_p2), %v263_v4  ;;  %532 = vmatpush3.bf16.msra.mxu1 (!%p138_p2), %v205_v7 }
   0xb   : > { %543 = vmatprep.subr.bf16.mxu0 (!%p138_p2), %v345_v5 }
   0xd   : > { %s645_s13 = smov (!%p161_p3, %s491_s13), 1 }
   0xe   : > { %s557_s20 = smul.u32 20, %s645_s13  ;;  %s517_s27 = sshll.u32 %s645_s13, 4 }
   0xf   : > { %s170_s30 = scalar_lea.vmem %s643_s3, %s517_s27 }
  0x10   : > { %s165_s23 = scalar_lea.vmem %s640_s0, %s557_s20 }
  0x11   : > { %v568_v8 = vld [vmem:[%s165_s23] sm:$0xff]   ;;  %v569_v9 = vld [vmem:[%s165_s23 + $0x8] sm:$0xff]   ;;  %v570_v13 = vld [vmem:[%s165_s23 + $0x10] ss:$0 sps:$4 sm:$0x11]  }
  0x12   : > { %190 = vrot.lane.b32.xlu0 %v568_v8, %s580_s24  ;;  %539 = vmatprep.mubr.msk.bf16.mxu0 %vm194_vm1, %v568_v8  ;;  %v320_v10 = vshrl.u32 %v568_v8, 16  ;;  %v322_v11 = vshll.u32 %v568_v8, 16  ;;  %v326_v12 = vshll.u32 %v569_v9, 16  ;;  %v330_v15 = vshrl.u32 %v569_v9, 16 }
  0x13   : > { %540 = vmatmul.mubr.msk.bf16.vlgmr.msra.gmra.mrb[0].mxu0 %vm194_vm1, %v569_v9  ;;  %v334_v17 = vshll.u32 %v570_v13, 16 }
  0x14   : > { %544 = vmatpush3.bf16.msra.mxu0 %v345_v5  ;;  %v324_v14 = vrot.slane %v322_v11, 1  ;;  %v328_v16 = vrot.slane %v326_v12, 1 }
  0x15   : > { %v336_v21 = vrot.slane %v334_v17, 1 }
  0x16   : > { %192 = vrot.lane.b32.xlu0 %v569_v9, %s580_s24  ;;  %v325_v18 = vor.u32 %v324_v14, %v320_v10  ;;  %v332_v20 = vor.u32 %v330_v15, %v328_v16 }
  0x18   : > { %v329_v19 = vsel %vm319_vm2, %v325_v18, %v328_v16  ;;  %v337_v22 = vsel %vm319_vm2, %v332_v20, %v336_v21 }
  0x19   : > { %545 = vmatprep.mubr.msk.bf16.mxu0 %vm194_vm1, %v329_v19 }
  0x1f   : > { %546 = vmatmul.mubr.msk.bf16.vlgmr.msra.gmra.mrb[0].mxu0 %vm194_vm1, %v337_v22 }
  0x84   : > { %v191_v23 = vpop.permute.xlu0 %190 }
  0x85   : > { %533 = vmatprep.mubr.msk.bf16.mxu1 %vm194_vm1, %v191_v23 }
  0x88   : > { %v193_v24 = vpop.permute.xlu0 %192 }
  0x89   : > { %534 = vmatmul.mubr.msk.bf16.vlgmr.msra.gmra.mrb[0].mxu1 %vm194_vm1, %v193_v24 }
  0xf2   : > { %v547_v25 = vpop.f32.mrb[0].mxu0 }
  0xf3   : > { %v381_v26 = vpop.f32.mrb[1].mxu0 }
  0xf4   : > { %v548_v27 = vpop.f32.mrb[2].mxu0 }
  0xf5   : > { %v384_v28 = vpop.f32.mrb[3].mxu0 }
 0x15c   : > { %v535_v29 = vpop.f32.mrb[0].mxu1 }
 0x15d   : > { %v549_v31 = vadd.f32 %v547_v25, %v535_v29  ;;  %v241_v32 = vpop.f32.mrb[1].mxu1 }
 0x15e   : > { %v550_v33 = vadd.f32 %v381_v26, %v241_v32  ;;  %v536_v34 = vpop.f32.mrb[2].mxu1 }
 0x15f   : > { %v409_v35 = vadd.f32 %v549_v31, %v510_v30  ;;  %v551_v36 = vadd.f32 %v548_v27, %v536_v34  ;;  %v244_v37 = vpop.f32.mrb[3].mxu1 }
 0x160   : > { %v407_v38 = vadd.f32 %v550_v33, %v510_v30  ;;  %v552_v39 = vadd.f32 %v384_v28, %v244_v37 }
 0x161   : > { %v413_v40 = vmax.f32 %v409_v35, 0.0  ;;  %v410_v41 = vadd.f32 %v551_v36, %v510_v30 }
 0x162   : > { %v411_v42 = vmax.f32 %v407_v38, 0.0  ;;  %v408_v43 = vadd.f32 %v552_v39, %v510_v30 }
 0x163   : > { %v520_v44 = vpack.c.bf16 %v413_v40, %v413_v40  ;;  %v414_v45 = vmax.f32 %v410_v41, 0.0 }
 0x164   : > { %v518_v46 = vpack.c.bf16 %v411_v42, %v411_v42  ;;  %v412_v47 = vmax.f32 %v408_v43, 0.0 }
 0x165   : > { %434 = vst.msk [vmem:[%s170_s30 + $0x8] sm:$0xf] %vm431_vm3, %v520_v44  ;;  %v521_v48 = vpack.c.bf16 %v414_v45, %v414_v45 }
 0x166   : > { %432 = vst.msk [vmem:[%s170_s30] sm:$0xf] %vm431_vm3, %v518_v46  ;;  %v519_v49 = vpack.c.bf16 %v412_v47, %v412_v47 }
 0x167   : > { %435 = vst.msk [vmem:[%s170_s30 + $0xc] sm:$0xf] %vm431_vm3, %v521_v48 }
 0x168   : > { %433 = vst.msk [vmem:[%s170_s30 + $0x4] sm:$0xf] %vm431_vm3, %v519_v49 }
 0x169 PF: > { %s13_s12 = sadd.s32 1, %s577_s12  }
 0x16a   : > { %p10_p4 = scmp.ge.s32.totalorder %s13_s12, 4  }
 0x16c   :  { %12 = sbr.rel (!%p10_p4) target bundleno = 1 (0x1), region = 64 }

// kernel: deep_model_forward.16
= control target key start
LH: loop header
LB: loop body
LE: loop exit
PB: predicated region body
PF: predicated region fallthrough
CT: control target
= control target key end

     0   :  { %s665_s12 = smov 0   ;;  %s715_s0 = inlined_call_operand.vmem [shape: bf16[2,34,32], index: 0, kind: input, shape index: {}]   ;;  %s716_s1 = inlined_call_operand.vmem [shape: bf16[3,32,32], index: 1, kind: input, shape index: {}]   ;;  %s717_s2 = inlined_call_operand.vmem [shape: f32[1,32], index: 2, kind: input, shape index: {}]   ;;  %s718_s3 = inlined_call_operand.vmem [shape: bf16[2,32,32], index: 3, kind: output, shape index: {}]  }
   0x1 LB: > { %s530_s13 = sadd.s32 4294967295, %s643_s12   ;;  %p534_p0 = scmp.ge.s32.totalorder %s643_s12, 1  ;;  %s643_s12 = sphi %s665_s12, %s13_s12  }
   0x2   : > { %p137_p1 = scmp.lt.s32.totalorder %s643_s12, 3 }
   0x4   : > { %p138_p2 = pnand %p534_p0, %p137_p1 }
   0x5   : > { %v627_v0 = vld [vmem:[%s716_s1] sm:$0xff] (!%p138_p2)   ;;  %p161_p3 = scmp.lt.s32.totalorder (!%p138_p2), %s530_s13, 1  ;;  %v628_v1 = vld [vmem:[%s716_s1 + $0x8] sm:$0xff] (!%p138_p2)   ;;  %v633_v3 = vld [vmem:[%s716_s1 + $0x10] sm:$0xff] (!%p138_p2)   ;;  %vm232_vm0 = vcmask (!%p138_p2), 261120   ;;  %vm362_vm1 = vcmask (!%p138_p2), 1046528  }
   0x6   : > { %141 = sbr.rel (%p138_p2) target bundleno = 257 (0x101), region = 32  ;;  %594 = vmatprep.subr.bf16.mxu0 (!%p138_p2), %v627_v0  ;;  %v632_v2 = vld [vmem:[%s716_s1 + $0x20] sm:$0xff] (!%p138_p2)   ;;  %v634_v4 = vld [vmem:[%s716_s1 + $0x18] sm:$0xff] (!%p138_p2)   ;;  %586 = vmatprep.subr.bf16.mxu1 (!%p138_p2), %v633_v3  ;;  %v635_v11 = vld [vmem:[%s716_s1 + $0x28] sm:$0xff] (!%p138_p2)   ;;  %vm199_vm2 = vsmask.f32 (!%p138_p2), 7424 }
   0x7   : > { %595 = vmatpush3.bf16.msra.mxu0 (!%p138_p2), %v627_v0  ;;  %587 = vmatpush3.bf16.msra.mxu1 (!%p138_p2), %v633_v3  ;;  %v562_v35 = vld [vmem:[%s717_s2] ss:$0 sm:$0xff] (!%p138_p2)  ;;  %vm470_vm3 = vcmask (!%p138_p2), 257024  }
   0x8   : > { %596 = vmatprep.subr.bf16.mxu0 (!%p138_p2), %v628_v1  ;;  %588 = vmatprep.subr.bf16.mxu1 (!%p138_p2), %v634_v4 }
   0xb   : > { %597 = vmatpush3.bf16.msra.mxu0 (!%p138_p2), %v628_v1  ;;  %589 = vmatpush3.bf16.msra.mxu1 (!%p138_p2), %v634_v4 }
   0xc   : > { %602 = vmatprep.subr.bf16.mxu0 (!%p138_p2), %v632_v2 }
   0xd   : > { %s720_s13 = smov (!%p161_p3, %s530_s13), 1 }
   0xe   : > { %s618_s22 = smul.u32 20, %s720_s13  ;;  %s569_s5 = sshll.u32 %s720_s13, 4 }
   0xf   : > { %s170_s8 = scalar_lea.vmem %s718_s3, %s569_s5 }
  0x10   : > { %s165_s27 = scalar_lea.vmem %s715_s0, %s618_s22 }
  0x11   : > { %v172_v5 = vld [vmem:[%s165_s27] sm:$0xf]  ;;  %v173_v6 = vld [vmem:[%s165_s27 + $0x4] sm:$0xf]  ;;  %v631_v10 = vld [vmem:[%s165_s27 + $0x8] sm:$0xff]  }
  0x12   : > { %v353_v7 = vld [vmem:[%s165_s27] sm:$0xe]  ;;  %v542_v8 = vcombine.low %v172_v5, %v173_v6  ;;  %v636_v12 = vld [vmem:[%s165_s27 + $0x10] ss:$0 sps:$4 sm:$0x11]   ;;  %v208_v16 = vshll.u32 %v631_v10, 16 }
  0x13   : > { %v557_v9 = vcombine.low %v353_v7, %v173_v6  ;;  %v212_v17 = vshrl.u32 %v631_v10, 16  ;;  %v216_v18 = vshll.u32 %v636_v12, 16  ;;  %v364_v19 = vrot.slane %v631_v10, 1 }
  0x14   : > { %598 = vmatprep.mubr.msk.bf16.mxu0 %vm232_vm0, %v542_v8  ;;  %v201_v14 = vshrl.u32 %v542_v8, 16  ;;  %v203_v15 = vshll.u32 %v542_v8, 16  ;;  %v210_v21 = vrot.slane %v208_v16, 1  ;;  %v366_v28 = vrot.slane %v636_v12, 1 }
  0x15   : > { %v363_v13 = vrot.slane %v557_v9, 1  ;;  %599 = vmatmul.mubr.msk.bf16.vlgmr.msra.gmra.mrb[0].mxu0 %vm232_vm0, %v631_v10  ;;  %v218_v22 = vrot.slane %v216_v18, 1 }
  0x16   : > { %603 = vmatpush3.bf16.msra.mxu0 %v632_v2  ;;  %v205_v20 = vrot.slane %v203_v15, 1  ;;  %v214_v25 = vor.u32 %v212_v17, %v210_v21  ;;  %v367_v29 = vsel %vm362_vm1, %v364_v19, %v366_v28 }
  0x17   : > { %604 = vmatprep.subr.bf16.mxu0 %v635_v11  ;;  %v365_v23 = vsel %vm362_vm1, %v363_v13, %v364_v19 }
  0x18   : > { %v206_v24 = vor.u32 %v205_v20, %v201_v14  ;;  %606 = vmatprep.mubr.msk.bf16.mxu0 %vm232_vm0, %v365_v23  ;;  %v219_v27 = vsel %vm199_vm2, %v214_v25, %v218_v22 }
  0x1a   : > { %605 = vmatpush3.bf16.msra.mxu0 %v635_v11  ;;  %v211_v26 = vsel %vm199_vm2, %v206_v24, %v210_v21 }
  0x1b   : > { %590 = vmatprep.mubr.msk.bf16.mxu1 %vm232_vm0, %v211_v26 }
  0x1c   : > { %591 = vmatmul.mubr.msk.bf16.vlgmr.msra.gmra.mrb[0].mxu1 %vm232_vm0, %v219_v27 }
  0x21   : > { %607 = vmatmul.mubr.msk.bf16.vlgmr.msra.gmra.mrb[0].mxu0 %vm232_vm0, %v367_v29 }
  0xef   : > { %v592_v30 = vpop.f32.mrb[0].mxu1 }
  0xf0   : > { %v273_v31 = vpop.f32.mrb[1].mxu1 }
  0xf1   : > { %v593_v32 = vpop.f32.mrb[2].mxu1 }
  0xf2   : > { %v276_v33 = vpop.f32.mrb[3].mxu1 }
  0xf4   : > { %v608_v34 = vpop.f32.mrb[0].mxu0 }
  0xf5   : > { %v610_v36 = vadd.f32 %v608_v34, %v592_v30  ;;  %v420_v37 = vpop.f32.mrb[1].mxu0 }
  0xf6   : > { %v611_v38 = vadd.f32 %v420_v37, %v273_v31  ;;  %v609_v39 = vpop.f32.mrb[2].mxu0 }
  0xf7   : > { %v448_v40 = vadd.f32 %v610_v36, %v562_v35  ;;  %v612_v41 = vadd.f32 %v609_v39, %v593_v32  ;;  %v423_v42 = vpop.f32.mrb[3].mxu0 }
  0xf8   : > { %v446_v43 = vadd.f32 %v611_v38, %v562_v35  ;;  %v613_v44 = vadd.f32 %v423_v42, %v276_v33 }
  0xf9   : > { %v452_v45 = vmax.f32 %v448_v40, 0.0  ;;  %v449_v46 = vadd.f32 %v612_v41, %v562_v35 }
  0xfa   : > { %v450_v47 = vmax.f32 %v446_v43, 0.0  ;;  %v447_v48 = vadd.f32 %v613_v44, %v562_v35 }
  0xfb   : > { %v572_v49 = vpack.c.bf16 %v452_v45, %v452_v45  ;;  %v453_v50 = vmax.f32 %v449_v46, 0.0 }
  0xfc   : > { %v570_v51 = vpack.c.bf16 %v450_v47, %v450_v47  ;;  %v451_v52 = vmax.f32 %v447_v48, 0.0 }
  0xfd   : > { %473 = vst.msk [vmem:[%s170_s8 + $0x8] sm:$0xf] %vm470_vm3, %v572_v49  ;;  %v573_v53 = vpack.c.bf16 %v453_v50, %v453_v50 }
  0xfe   : > { %471 = vst.msk [vmem:[%s170_s8] sm:$0xf] %vm470_vm3, %v570_v51  ;;  %v571_v54 = vpack.c.bf16 %v451_v52, %v451_v52 }
  0xff   : > { %474 = vst.msk [vmem:[%s170_s8 + $0xc] sm:$0xf] %vm470_vm3, %v573_v53 }
 0x100   : > { %472 = vst.msk [vmem:[%s170_s8 + $0x4] sm:$0xf] %vm470_vm3, %v571_v54 }
 0x101 PF: > { %s13_s12 = sadd.s32 1, %s643_s12  }
 0x102   : > { %p10_p4 = scmp.ge.s32.totalorder %s13_s12, 4  }
 0x104   :  { %12 = sbr.rel (!%p10_p4) target bundleno = 1 (0x1), region = 64 }

// kernel: deep_model_forward.18
= control target key start
LH: loop header
LB: loop body
LE: loop exit
PB: predicated region body
PF: predicated region fallthrough
CT: control target
= control target key end

     0   :  { %s578_s12 = smov 0   ;;  %s626_s0 = inlined_call_operand.vmem [shape: bf16[2,17,64], index: 0, kind: input, shape index: {}]   ;;  %s627_s1 = inlined_call_operand.vmem [shape: bf16[3,32,64], index: 1, kind: input, shape index: {}]   ;;  %s628_s2 = inlined_call_operand.vmem [shape: f32[1,64], index: 2, kind: input, shape index: {}]   ;;  %s629_s3 = inlined_call_operand.vmem [shape: bf16[2,16,64], index: 3, kind: output, shape index: {}]  }
   0x1 LB: > { %s459_s13 = sadd.s32 4294967295, %s553_s12   ;;  %p463_p0 = scmp.ge.s32.totalorder %s553_s12, 1  ;;  %s553_s12 = sphi %s578_s12, %s13_s12  }
   0x2   : > { %p137_p1 = scmp.lt.s32.totalorder %s553_s12, 3 }
   0x4   : > { %p138_p2 = pnand %p463_p0, %p137_p1 }
   0x5   : > { %p161_p3 = scmp.lt.s32.totalorder (!%p138_p2), %s459_s13, 1  ;;  %v540_v0 = vld [vmem:[%s627_s1 + $0x10] sm:$0xff] (!%p138_p2)   ;;  %v555_v1 = vmov (!%p138_p2), 0.0   ;;  %v541_v2 = vld [vmem:[%s627_s1] sm:$0xff] (!%p138_p2)   ;;  %v542_v3 = vld [vmem:[%s627_s1 + $0x18] sm:$0xff] (!%p138_p2)   ;;  %vm556_vm0 = vmmov (!%p138_p2), 0  }
   0x6   : > { %141 = sbr.rel (%p138_p2) target bundleno = 364 (0x16c), region = 32  ;;  %503 = vmatprep.subr.bf16.mxu0 (!%p138_p2), %v555_v1  ;;  %511 = vmatprep.subr.bf16.mxu1 (!%p138_p2), %v555_v1  ;;  %v543_v4 = vld [vmem:[%s627_s1 + $0x8] sm:$0xff] (!%p138_p2)   ;;  %vm203_vm1 = vcmask (!%p138_p2), 261120   ;;  %s557_s26 = smov (!%p138_p2), 96   ;;  %vm312_vm2 = vsmask.f32 (!%p138_p2), 7424 }
   0x7   : > { %504 = vmatpush3.bf16.msra.mxu0 (!%p138_p2), %v540_v0  ;;  %512 = vmatpush3.bf16.msra.mxu1 (!%p138_p2), %v541_v2  ;;  %v544_v14 = vld [vmem:[%s627_s1 + $0x20] sm:$0xff] (!%p138_p2)   ;;  %v545_v16 = vld [vmem:[%s627_s1 + $0x28] sm:$0xff] (!%p138_p2)   ;;  %vm401_vm3 = vcmask (!%p138_p2), 519168  }
   0x8   : > { %505 = vmatprep.subr.bf16.mxu0 (!%p138_p2), %v555_v1  ;;  %507 = vmatprep.mubr.msk.bf16.mxu0 (!%p138_p2), %vm556_vm0, %v555_v1  ;;  %v486_v28 = vld [vmem:[%s628_s2] ss:$0 sm:$0xff] (!%p138_p2) }
   0x9   : > { %513 = vmatprep.subr.bf16.mxu1 (!%p138_p2), %v555_v1  ;;  %515 = vmatprep.mubr.msk.bf16.mxu1 (!%p138_p2), %vm556_vm0, %v555_v1 }
   0xb   : > { %506 = vmatpush3.bf16.msra.mxu0 (!%p138_p2), %v542_v3  ;;  %514 = vmatpush3.bf16.msra.mxu1 (!%p138_p2), %v543_v4 }
   0xc   : > { %519 = vmatprep.subr.bf16.mxu0 (!%p138_p2), %v555_v1 }
   0xd   : > { %s631_s13 = smov (!%p161_p3, %s459_s13), 1 }
   0xe   : > { %s527_s20 = smul.u32 12, %s631_s13  ;;  %s491_s6 = sshll.u32 %s631_s13, 3 }
   0xf   : > { %s170_s9 = scalar_lea.vmem %s629_s3, %s491_s6 }
  0x10   : > { %s165_s25 = scalar_lea.vmem %s626_s0, %s527_s20 }
  0x11   : > { %v539_v5 = vld [vmem:[%s165_s25] sm:$0xff]   ;;  %v546_v6 = vld [vmem:[%s165_s25 + $0x8] ss:$0 sps:$4 sm:$0x11]  }
  0x12   : > { %189 = vrot.lane.b32.xlu0 %v539_v5, %s557_s26  ;;  %v313_v7 = vshrl.u32 %v539_v5, 16  ;;  %v315_v8 = vshll.u32 %v539_v5, 16  ;;  %v320_v9 = vshll.u32 %v546_v6, 16  ;;  %516 = vmatmul.mubr.msk.bf16.vlgmr.msra.gmra.mrb[0].mxu1 %vm203_vm1, %v539_v5 }
  0x14   : > { %v317_v10 = vrot.slane %v315_v8, 1  ;;  %v322_v11 = vrot.slane %v320_v9, 1 }
  0x16   : > { %v318_v12 = vor.u32 %v317_v10, %v313_v7 }
  0x18   : > { %v323_v13 = vsel %vm312_vm2, %v318_v12, %v322_v11 }
  0x84   : > { %v190_v15 = vpop.permute.xlu0 %189 }
  0x85   : > { %508 = vmatmul.mubr.msk.bf16.vlgmr.msra.gmra.mrb[0].mxu0 %vm203_vm1, %v190_v15 }
  0x86   : > { %520 = vmatpush3.bf16.msra.mxu0 %v544_v14  ;;  %523 = vmatprep.mubr.msk.bf16.mxu0 %vm556_vm0, %v555_v1 }
  0x87   : > { %521 = vmatprep.subr.bf16.mxu0 %v555_v1 }
  0x8a   : > { %522 = vmatpush3.bf16.msra.mxu0 %v545_v16 }
  0x8d   : > { %524 = vmatmul.mubr.msk.bf16.vlgmr.msra.gmra.mrb[4].mxu0 %vm203_vm1, %v323_v13 }
  0xe5   : > { %v297_v17 = vpop.f32.mrb[0].mxu1 }
  0xe6   : > { %v517_v18 = vpop.f32.mrb[1].mxu1 }
  0xe7   : > { %v300_v19 = vpop.f32.mrb[2].mxu1 }
  0xe8   : > { %v518_v20 = vpop.f32.mrb[3].mxu1 }
 0x158   : > { %v241_v21 = vpop.f32.mrb[0].mxu0 }
 0x159   : > { %v298_v22 = vadd.f32 %v297_v17, %v241_v21  ;;  %v509_v23 = vpop.f32.mrb[1].mxu0 }
 0x15a   : > { %v244_v24 = vpop.f32.mrb[2].mxu0 }
 0x15b   : > { %v301_v25 = vadd.f32 %v300_v19, %v244_v24  ;;  %v510_v26 = vpop.f32.mrb[3].mxu0 }
 0x160   : > { %v373_v27 = vpop.f32.mrb[4].mxu0 }
 0x161   : > { %v380_v29 = vadd.f32 %v373_v27, %v298_v22  ;;  %v525_v30 = vpop.f32.mrb[5].mxu0 }
 0x162   : > { %v376_v31 = vpop.f32.mrb[6].mxu0 }
 0x163   : > { %v389_v32 = vadd.f32 %v486_v28, %v380_v29  ;;  %v381_v33 = vadd.f32 %v376_v31, %v301_v25  ;;  %v526_v34 = vpop.f32.mrb[7].mxu0 }
 0x165   : > { %v391_v35 = vmax.f32 %v389_v32, 0.0  ;;  %v390_v36 = vadd.f32 %v486_v28, %v381_v33 }
 0x167   : > { %v492_v37 = vpack.c.bf16 %v391_v35, %v391_v35  ;;  %v392_v38 = vmax.f32 %v390_v36, 0.0 }
 0x169   : > { %402 = vst.msk [vmem:[%s170_s9] sm:$0xf] %vm401_vm3, %v492_v37  ;;  %v493_v39 = vpack.c.bf16 %v392_v38, %v392_v38 }
 0x16b   : > { %403 = vst.msk [vmem:[%s170_s9 + $0x4] sm:$0xf] %vm401_vm3, %v493_v39 }
 0x16c PF: > { %s13_s12 = sadd.s32 1, %s553_s12  }
 0x16d   : > { %p10_p4 = scmp.ge.s32.totalorder %s13_s12, 4  }
 0x16f   :  { %12 = sbr.rel (!%p10_p4) target bundleno = 1 (0x1), region = 64 }

// kernel: deep_model_forward.19
= control target key start
LH: loop header
LB: loop body
LE: loop exit
PB: predicated region body
PF: predicated region fallthrough
CT: control target
= control target key end

     0   :  { %s670_s12 = smov 0   ;;  %s736_s0 = inlined_call_operand.vmem [shape: bf16[2,18,64], index: 0, kind: input, shape index: {}]   ;;  %s737_s1 = inlined_call_operand.vmem [shape: bf16[3,64,64], index: 1, kind: input, shape index: {}]   ;;  %s738_s2 = inlined_call_operand.vmem [shape: f32[1,64], index: 2, kind: input, shape index: {}]   ;;  %s739_s3 = inlined_call_operand.vmem [shape: bf16[2,16,64], index: 3, kind: output, shape index: {}]  }
   0x1 LB: > { %s513_s13 = sadd.s32 4294967295, %s646_s12   ;;  %p517_p0 = scmp.ge.s32.totalorder %s646_s12, 1  ;;  %s646_s12 = sphi %s670_s12, %s13_s12  }
   0x2   : > { %p137_p1 = scmp.lt.s32.totalorder %s646_s12, 3 }
   0x4   : > { %p138_p2 = pnand %p517_p0, %p137_p1 }
   0x5   : > { %v625_v0 = vld [vmem:[%s737_s1 + $0x20] sm:$0xff] (!%p138_p2)   ;;  %v648_v1 = vmov (!%p138_p2), 0.0   ;;  %v627_v3 = vld [vmem:[%s737_s1 + $0x28] sm:$0xff] (!%p138_p2)   ;;  %vm649_vm0 = vmmov (!%p138_p2), 0   ;;  %p161_p3 = scmp.lt.s32.totalorder (!%p138_p2), %s513_s13, 1  ;;  %v629_v5 = vld [vmem:[%s737_s1 + $0x30] sm:$0xff] (!%p138_p2)  }
   0x6   : > { %141 = sbr.rel (%p138_p2) target bundleno = 266 (0x10a), region = 32  ;;  %578 = vmatprep.subr.bf16.mxu0 (!%p138_p2), %v648_v1  ;;  %590 = vmatprep.subr.bf16.mxu1 (!%p138_p2), %v648_v1  ;;  %v626_v2 = vld [vmem:[%s737_s1] sm:$0xff] (!%p138_p2)   ;;  %v628_v4 = vld [vmem:[%s737_s1 + $0x8] sm:$0xff] (!%p138_p2)   ;;  %v630_v6 = vld [vmem:[%s737_s1 + $0x10] sm:$0xff] (!%p138_p2)   ;;  %vm200_vm1 = vsmask.f32 (!%p138_p2), 7424 }
   0x7   : > { %579 = vmatpush3.bf16.msra.mxu0 (!%p138_p2), %v625_v0  ;;  %586 = vmatprep.mubr.msk.bf16.mxu0 (!%p138_p2), %vm649_vm0, %v648_v1  ;;  %v631_v9 = vld [vmem:[%s737_s1 + $0x38] sm:$0xff] (!%p138_p2)   ;;  %vm237_vm2 = vcmask (!%p138_p2), 523264   ;;  %v635_v19 = vld [vmem:[%s737_s1 + $0x40] sm:$0xff] (!%p138_p2)   ;;  %v636_v21 = vld [vmem:[%s737_s1 + $0x48] sm:$0xff] (!%p138_p2)   ;;  %vm362_vm3 = vcmask (!%p138_p2), 1046528   ;;  %vm455_vm4 = vcmask (!%p138_p2), 519168  }
   0x8   : > { %591 = vmatpush3.bf16.msra.mxu1 (!%p138_p2), %v626_v2  ;;  %580 = vmatprep.subr.bf16.mxu0 (!%p138_p2), %v648_v1  ;;  %v632_v12 = vld [vmem:[%s737_s1 + $0x18] sm:$0xff] (!%p138_p2)   ;;  %v637_v23 = vld [vmem:[%s737_s1 + $0x50] sm:$0xff] (!%p138_p2)   ;;  %v555_v40 = vld [vmem:[%s738_s2] ss:$0 sm:$0xff] (!%p138_p2) }
   0x9   : > { %592 = vmatprep.subr.bf16.mxu1 (!%p138_p2), %v648_v1  ;;  %598 = vmatprep.mubr.msk.bf16.mxu1 (!%p138_p2), %vm649_vm0, %v648_v1  ;;  %v638_v25 = vld [vmem:[%s737_s1 + $0x58] sm:$0xff] (!%p138_p2)  }
   0xb   : > { %581 = vmatpush3.bf16.msra.mxu0 (!%p138_p2), %v627_v3 }
   0xc   : > { %593 = vmatpush3.bf16.msra.mxu1 (!%p138_p2), %v628_v4  ;;  %582 = vmatprep.subr.bf16.mxu0 (!%p138_p2), %v648_v1 }
   0xd   : > { %s741_s13 = smov (!%p161_p3, %s513_s13), 1  ;;  %594 = vmatprep.subr.bf16.mxu1 %v648_v1 }
   0xe   : > { %s614_s24 = smul.u32 12, %s741_s13  ;;  %s560_s19 = sshll.u32 %s741_s13, 3 }
   0xf   : > { %583 = vmatpush3.bf16.msra.mxu0 %v629_v5  ;;  %s170_s22 = scalar_lea.vmem %s739_s3, %s560_s19 }
  0x10   : > { %s165_s29 = scalar_lea.vmem %s736_s0, %s614_s24  ;;  %595 = vmatpush3.bf16.msra.mxu1 %v630_v6  ;;  %584 = vmatprep.subr.bf16.mxu0 %v648_v1 }
  0x11   : > { %v172_v7 = vld [vmem:[%s165_s29] sm:$0xf]  ;;  %v173_v8 = vld [vmem:[%s165_s29 + $0x4] sm:$0xf]  ;;  %596 = vmatprep.subr.bf16.mxu1 %v648_v1 }
  0x12   : > { %v529_v10 = vcombine.low %v172_v7, %v173_v8  ;;  %v634_v11 = vld [vmem:[%s165_s29 + $0x8] ss:$0 sps:$4 sm:$0x11]   ;;  %v349_v22 = vld [vmem:[%s165_s29] sm:$0xe] }
  0x13   : > { %v209_v15 = vshll.u32 %v634_v11, 16  ;;  %585 = vmatpush3.bf16.msra.mxu0 %v631_v9  ;;  %v549_v24 = vcombine.low %v349_v22, %v173_v8  ;;  %v364_v27 = vrot.slane %v634_v11, 1 }
  0x14   : > { %v202_v13 = vshrl.u32 %v529_v10, 16  ;;  %v204_v14 = vshll.u32 %v529_v10, 16  ;;  %597 = vmatpush3.bf16.msra.mxu1 %v632_v12  ;;  %602 = vmatprep.subr.bf16.mxu0 %v648_v1 }
  0x15   : > { %v211_v17 = vrot.slane %v209_v15, 1  ;;  %v363_v26 = vrot.slane %v549_v24, 1 }
  0x16   : > { %v206_v16 = vrot.slane %v204_v14, 1 }
  0x17   : > { %599 = vmatmul.mubr.msk.bf16.vlgmr.msra.gmra.mrb[0].mxu1 %vm237_vm2, %v529_v10  ;;  %v365_v28 = vsel %vm362_vm3, %v363_v26, %v364_v27 }
  0x18   : > { %v207_v18 = vor.u32 %v206_v16, %v202_v13 }
  0x1a   : > { %v212_v20 = vsel %vm200_vm1, %v207_v18, %v211_v17 }
  0x1b   : > { %587 = vmatmul.mubr.msk.bf16.vlgmr.msra.gmra.mrb[0].mxu0 %vm237_vm2, %v212_v20 }
  0x1c   : > { %603 = vmatpush3.bf16.msra.mxu0 %v635_v19  ;;  %610 = vmatprep.mubr.msk.bf16.mxu0 %vm649_vm0, %v648_v1 }
  0x1d   : > { %604 = vmatprep.subr.bf16.mxu0 %v648_v1 }
  0x20   : > { %605 = vmatpush3.bf16.msra.mxu0 %v636_v21 }
  0x21   : > { %606 = vmatprep.subr.bf16.mxu0 %v648_v1 }
  0x24   : > { %607 = vmatpush3.bf16.msra.mxu0 %v637_v23 }
  0x25   : > { %608 = vmatprep.subr.bf16.mxu0 %v648_v1 }
  0x28   : > { %609 = vmatpush3.bf16.msra.mxu0 %v638_v25 }
  0x2b   : > { %611 = vmatmul.mubr.msk.bf16.vlgmr.msra.gmra.mrb[4].mxu0 %vm237_vm2, %v365_v28 }
  0xea   : > { %v342_v29 = vpop.f32.mrb[0].mxu1 }
  0xeb   : > { %v600_v31 = vpop.f32.mrb[1].mxu1 }
  0xec   : > { %v345_v34 = vpop.f32.mrb[2].mxu1 }
  0xed   : > { %v601_v36 = vpop.f32.mrb[3].mxu1 }
  0xee   : > { %v275_v30 = vpop.f32.mrb[0].mxu0 }
  0xef   : > { %v343_v32 = vadd.f32 %v342_v29, %v275_v30  ;;  %v588_v33 = vpop.f32.mrb[1].mxu0 }
  0xf0   : > { %v278_v35 = vpop.f32.mrb[2].mxu0 }
  0xf1   : > { %v346_v37 = vadd.f32 %v345_v34, %v278_v35  ;;  %v589_v38 = vpop.f32.mrb[3].mxu0 }
  0xfe   : > { %v427_v39 = vpop.f32.mrb[4].mxu0 }
  0xff   : > { %v434_v41 = vadd.f32 %v427_v39, %v343_v32  ;;  %v612_v42 = vpop.f32.mrb[5].mxu0 }
 0x100   : > { %v430_v43 = vpop.f32.mrb[6].mxu0 }
 0x101   : > { %v443_v44 = vadd.f32 %v555_v40, %v434_v41  ;;  %v435_v45 = vadd.f32 %v430_v43, %v346_v37  ;;  %v613_v46 = vpop.f32.mrb[7].mxu0 }
 0x103   : > { %v445_v47 = vmax.f32 %v443_v44, 0.0  ;;  %v444_v48 = vadd.f32 %v555_v40, %v435_v45 }
 0x105   : > { %v561_v49 = vpack.c.bf16 %v445_v47, %v445_v47  ;;  %v446_v50 = vmax.f32 %v444_v48, 0.0 }
 0x107   : > { %456 = vst.msk [vmem:[%s170_s22] sm:$0xf] %vm455_vm4, %v561_v49  ;;  %v562_v51 = vpack.c.bf16 %v446_v50, %v446_v50 }
 0x109   : > { %457 = vst.msk [vmem:[%s170_s22 + $0x4] sm:$0xf] %vm455_vm4, %v562_v51 }
 0x10a PF: > { %s13_s12 = sadd.s32 1, %s646_s12  }
 0x10b   : > { %p10_p4 = scmp.ge.s32.totalorder %s13_s12, 4  }
 0x10d   :  { %12 = sbr.rel (!%p10_p4) target bundleno = 1 (0x1), region = 64 }

// kernel: deep_model_forward.21
= control target key start
LH: loop header
LB: loop body
LE: loop exit
PB: predicated region body
PF: predicated region fallthrough
CT: control target
= control target key end

     0   :  { %s632_s12 = smov 0   ;;  %s698_s0 = inlined_call_operand.vmem [shape: bf16[2,9,128], index: 0, kind: input, shape index: {}]   ;;  %s699_s1 = inlined_call_operand.vmem [shape: bf16[3,64,128], index: 1, kind: input, shape index: {}]   ;;  %s700_s2 = inlined_call_operand.vmem [shape: f32[1,128], index: 2, kind: input, shape index: {}]   ;;  %s701_s3 = inlined_call_operand.vmem [shape: bf16[2,8,128], index: 3, kind: output, shape index: {}]  }
   0x1 LB: > { %s480_s13 = sadd.s32 4294967295, %s607_s12   ;;  %p484_p0 = scmp.ge.s32.totalorder %s607_s12, 1  ;;  %s607_s12 = sphi %s632_s12, %s13_s12  }
   0x2   : > { %p137_p1 = scmp.lt.s32.totalorder %s607_s12, 3 }
   0x4   : > { %p138_p2 = pnand %p484_p0, %p137_p1 }
   0x5   : > { %p160_p3 = scmp.lt.s32.totalorder (!%p138_p2), %s480_s13, 1  ;;  %v589_v0 = vld [vmem:[%s699_s1 + $0x20] sm:$0xff] (!%p138_p2)   ;;  %v609_v1 = vmov (!%p138_p2), 0.0   ;;  %v591_v3 = vld [vmem:[%s699_s1 + $0x28] sm:$0xff] (!%p138_p2)   ;;  %vm610_vm0 = vmmov (!%p138_p2), 0   ;;  %v593_v7 = vld [vmem:[%s699_s1 + $0x30] sm:$0xff] (!%p138_p2)  }
   0x6   : > { %141 = sbr.rel (%p138_p2) target bundleno = 371 (0x173), region = 32  ;;  %540 = vmatprep.subr.bf16.mxu0 (!%p138_p2), %v609_v1  ;;  %552 = vmatprep.subr.bf16.mxu1 (!%p138_p2), %v609_v1  ;;  %v590_v2 = vld [vmem:[%s699_s1] sm:$0xff] (!%p138_p2)   ;;  %v592_v4 = vld [vmem:[%s699_s1 + $0x8] sm:$0xff] (!%p138_p2)   ;;  %v594_v10 = vld [vmem:[%s699_s1 + $0x10] sm:$0xff] (!%p138_p2)   ;;  %s611_s30 = smov (!%p138_p2), 64   ;;  %vm218_vm1 = vcmask (!%p138_p2), 523264  }
   0x7   : > { %541 = vmatpush3.bf16.msra.mxu0 (!%p138_p2), %v589_v0  ;;  %553 = vmatpush3.bf16.msra.mxu1 (!%p138_p2), %v590_v2  ;;  %v595_v11 = vld [vmem:[%s699_s1 + $0x38] sm:$0xff] (!%p138_p2)   ;;  %v597_v13 = vld [vmem:[%s699_s1 + $0x40] sm:$0xff] (!%p138_p2)   ;;  %v598_v15 = vld [vmem:[%s699_s1 + $0x48] sm:$0xff] (!%p138_p2)  }
   0x8   : > { %542 = vmatprep.subr.bf16.mxu0 (!%p138_p2), %v609_v1  ;;  %548 = vmatprep.mubr.msk.bf16.mxu0 (!%p138_p2), %vm610_vm0, %v609_v1  ;;  %v596_v12 = vld [vmem:[%s699_s1 + $0x18] sm:$0xff] (!%p138_p2)   ;;  %v599_v17 = vld [vmem:[%s699_s1 + $0x50] sm:$0xff] (!%p138_p2)   ;;  %v521_v32 = vld [vmem:[%s700_s2] ss:$0 sm:$0xff] (!%p138_p2) }
   0x9   : > { %554 = vmatprep.subr.bf16.mxu1 (!%p138_p2), %v609_v1  ;;  %560 = vmatprep.mubr.msk.bf16.mxu1 (!%p138_p2), %vm610_vm0, %v609_v1  ;;  %v600_v20 = vld [vmem:[%s699_s1 + $0x58] sm:$0xff] (!%p138_p2)  }
   0xb   : > { %543 = vmatpush3.bf16.msra.mxu0 (!%p138_p2), %v591_v3  ;;  %555 = vmatpush3.bf16.msra.mxu1 (!%p138_p2), %v592_v4 }
   0xc   : > { %544 = vmatprep.subr.bf16.mxu0 (!%p138_p2), %v609_v1  ;;  %556 = vmatprep.subr.bf16.mxu1 (!%p138_p2), %v609_v1 }
   0xd   : > { %s703_s13 = smov (!%p160_p3, %s480_s13), 1 }
   0xe   : > { %s524_s20 = sshll.u32 %s703_s13, 3 }
   0xf   : > { %s164_s25 = scalar_lea.vmem %s698_s0, %s524_s20  ;;  %545 = vmatpush3.bf16.msra.mxu0 %v593_v7  ;;  %557 = vmatpush3.bf16.msra.mxu1 %v594_v10  ;;  %s487_s20 = sshll.u32 %s703_s13, 2 }
  0x10   : > { %v170_v5 = vld [vmem:[%s164_s25] sm:$0xf]  ;;  %v171_v6 = vld [vmem:[%s164_s25 + $0x4] sm:$0x1]  ;;  %546 = vmatprep.subr.bf16.mxu0 %v609_v1  ;;  %558 = vmatprep.subr.bf16.mxu1 %v609_v1  ;;  %s168_s23 = scalar_lea.vmem %s701_s3, %s487_s20 }
  0x11   : > { %v496_v8 = vcombine.low %v170_v5, %v170_v5  ;;  %v515_v9 = vcombine.low %v170_v5, %v171_v6 }
  0x13   : > { %192 = vrot.lane.b32.xlu0 %v496_v8, %s611_s30  ;;  %547 = vmatpush3.bf16.msra.mxu0 %v595_v11  ;;  %v344_v16 = vshll.u32 %v515_v9, 16  ;;  %v342_v18 = vshrl.u32 %v515_v9, 16 }
  0x14   : > { %564 = vmatprep.subr.bf16.mxu0 %v609_v1  ;;  %559 = vmatpush3.bf16.msra.mxu1 %v596_v12 }
  0x15   : > { %v346_v19 = vrot.slane %v344_v16, 1 }
  0x17   : > { %561 = vmatmul.mubr.msk.bf16.vlgmr.msra.gmra.mrb[0].mxu1 %vm218_vm1, %v170_v5  ;;  %v347_v21 = vor.u32 %v346_v19, %v342_v18 }
  0x85   : > { %v193_v14 = vpop.permute.xlu0 %192 }
  0x86   : > { %549 = vmatmul.mubr.msk.bf16.vlgmr.msra.gmra.mrb[0].mxu0 %vm218_vm1, %v193_v14 }
  0x87   : > { %565 = vmatpush3.bf16.msra.mxu0 %v597_v13  ;;  %572 = vmatprep.mubr.msk.bf16.mxu0 %vm610_vm0, %v609_v1 }
  0x88   : > { %566 = vmatprep.subr.bf16.mxu0 %v609_v1 }
  0x8b   : > { %567 = vmatpush3.bf16.msra.mxu0 %v598_v15 }
  0x8c   : > { %568 = vmatprep.subr.bf16.mxu0 %v609_v1 }
  0x8f   : > { %569 = vmatpush3.bf16.msra.mxu0 %v599_v17 }
  0x90   : > { %570 = vmatprep.subr.bf16.mxu0 %v609_v1 }
  0x93   : > { %571 = vmatpush3.bf16.msra.mxu0 %v600_v20 }
  0x96   : > { %573 = vmatmul.mubr.msk.bf16.vlgmr.msra.gmra.mrb[4].mxu0 %vm218_vm1, %v347_v21 }
  0xea   : > { %v323_v22 = vpop.f32.mrb[0].mxu1 }
  0xeb   : > { %v562_v23 = vpop.f32.mrb[1].mxu1 }
  0xec   : > { %v326_v24 = vpop.f32.mrb[2].mxu1 }
  0xed   : > { %v563_v25 = vpop.f32.mrb[3].mxu1 }
 0x159   : > { %v256_v26 = vpop.f32.mrb[0].mxu0 }
 0x15a   : > { %v324_v27 = vadd.f32 %v323_v22, %v256_v26  ;;  %v550_v28 = vpop.f32.mrb[1].mxu0 }
 0x15b   : > { %v259_v29 = vpop.f32.mrb[2].mxu0 }
 0x15c   : > { %v551_v30 = vpop.f32.mrb[3].mxu0 }
 0x169   : > { %v409_v31 = vpop.f32.mrb[4].mxu0 }
 0x16a   : > { %v415_v33 = vadd.f32 %v409_v31, %v324_v27  ;;  %v574_v34 = vpop.f32.mrb[5].mxu0 }
 0x16b   : > { %v412_v35 = vpop.f32.mrb[6].mxu0 }
 0x16c   : > { %v423_v36 = vadd.f32 %v521_v32, %v415_v33  ;;  %v575_v37 = vpop.f32.mrb[7].mxu0 }
 0x16e   : > { %v424_v38 = vmax.f32 %v423_v36, 0.0 }
 0x170   : > { %v425_v39 = vpack.c.bf16 %v424_v38, %v424_v38 }
 0x172   : > { %426 = vst [vmem:[%s168_s23] sm:$0xf] %v425_v39 }
 0x173 PF: > { %s13_s12 = sadd.s32 1, %s607_s12  }
 0x174   : > { %p10_p4 = scmp.ge.s32.totalorder %s13_s12, 4  }
 0x176   :  { %12 = sbr.rel (!%p10_p4) target bundleno = 1 (0x1), region = 64 }

// kernel: deep_model_forward.20
= control target key start
LH: loop header
LB: loop body
LE: loop exit
PB: predicated region body
PF: predicated region fallthrough
CT: control target
= control target key end

     0   :  { %s749_s15 = smov 0   ;;  %s818_s0 = inlined_call_operand.vmem [shape: bf16[2,18,64], index: 0, kind: input, shape index: {}]   ;;  %s819_s1 = inlined_call_operand.vmem [shape: bf16[3,64,64], index: 1, kind: input, shape index: {}]   ;;  %s820_s2 = inlined_call_operand.vmem [shape: f32[1,64], index: 2, kind: input, shape index: {}]   ;;  %s821_s3 = inlined_call_operand.vmem [shape: bf16[2,16,64], index: 3, kind: input, shape index: {}]   ;;  %s822_s4 = inlined_call_operand.vmem [shape: bf16[2,16,64], index: 4, kind: output, shape index: {}]  }
   0x1 LB: > { %s580_s16 = sadd.s32 4294967295, %s720_s15   ;;  %p584_p0 = scmp.ge.s32.totalorder %s720_s15, 1  ;;  %s720_s15 = sphi %s749_s15, %s14_s15  }
   0x2   : > { %p172_p1 = scmp.lt.s32.totalorder %s720_s15, 3 }
   0x4   : > { %p173_p2 = pnand %p584_p0, %p172_p1 }
   0x5   : > { %v699_v0 = vld [vmem:[%s819_s1 + $0x20] sm:$0xff] (!%p173_p2)   ;;  %v722_v1 = vmov (!%p173_p2), 0.0   ;;  %v701_v3 = vld [vmem:[%s819_s1 + $0x28] sm:$0xff] (!%p173_p2)   ;;  %vm723_vm0 = vmmov (!%p173_p2), 0   ;;  %p203_p3 = scmp.lt.s32.totalorder (!%p173_p2), %s580_s16, 1  ;;  %v703_v5 = vld [vmem:[%s819_s1 + $0x30] sm:$0xff] (!%p173_p2)  }
   0x6   : > { %176 = sbr.rel (%p173_p2) target bundleno = 270 (0x10e), region = 36  ;;  %652 = vmatprep.subr.bf16.mxu0 (!%p173_p2), %v722_v1  ;;  %664 = vmatprep.subr.bf16.mxu1 (!%p173_p2), %v722_v1  ;;  %v700_v2 = vld [vmem:[%s819_s1] sm:$0xff] (!%p173_p2)   ;;  %v702_v4 = vld [vmem:[%s819_s1 + $0x8] sm:$0xff] (!%p173_p2)   ;;  %v704_v6 = vld [vmem:[%s819_s1 + $0x10] sm:$0xff] (!%p173_p2)   ;;  %vm247_vm1 = vsmask.f32 (!%p173_p2), 7424 }
   0x7   : > { %653 = vmatpush3.bf16.msra.mxu0 (!%p173_p2), %v699_v0  ;;  %660 = vmatprep.mubr.msk.bf16.mxu0 (!%p173_p2), %vm723_vm0, %v722_v1  ;;  %v705_v9 = vld [vmem:[%s819_s1 + $0x38] sm:$0xff] (!%p173_p2)   ;;  %vm284_vm2 = vcmask (!%p173_p2), 523264   ;;  %v709_v19 = vld [vmem:[%s819_s1 + $0x40] sm:$0xff] (!%p173_p2)   ;;  %v710_v21 = vld [vmem:[%s819_s1 + $0x48] sm:$0xff] (!%p173_p2)   ;;  %vm409_vm3 = vcmask (!%p173_p2), 1046528   ;;  %vm510_vm4 = vcmask (!%p173_p2), 519168  }
   0x8   : > { %665 = vmatpush3.bf16.msra.mxu1 (!%p173_p2), %v700_v2  ;;  %654 = vmatprep.subr.bf16.mxu0 (!%p173_p2), %v722_v1  ;;  %v706_v12 = vld [vmem:[%s819_s1 + $0x18] sm:$0xff] (!%p173_p2)   ;;  %v711_v23 = vld [vmem:[%s819_s1 + $0x50] sm:$0xff] (!%p173_p2)   ;;  %v624_v40 = vld [vmem:[%s820_s2] ss:$0 sm:$0xff] (!%p173_p2) }
   0x9   : > { %666 = vmatprep.subr.bf16.mxu1 (!%p173_p2), %v722_v1  ;;  %672 = vmatprep.mubr.msk.bf16.mxu1 (!%p173_p2), %vm723_vm0, %v722_v1  ;;  %v712_v25 = vld [vmem:[%s819_s1 + $0x58] sm:$0xff] (!%p173_p2)  }
   0xb   : > { %655 = vmatpush3.bf16.msra.mxu0 (!%p173_p2), %v701_v3 }
   0xc   : > { %667 = vmatpush3.bf16.msra.mxu1 (!%p173_p2), %v702_v4  ;;  %656 = vmatprep.subr.bf16.mxu0 (!%p173_p2), %v722_v1 }
   0xd   : > { %s824_s16 = smov (!%p203_p3, %s580_s16), 1  ;;  %668 = vmatprep.subr.bf16.mxu1 %v722_v1 }
   0xe   : > { %s688_s27 = smul.u32 12, %s824_s16  ;;  %s629_s21 = sshll.u32 %s824_s16, 3 }
   0xf   : > { %657 = vmatpush3.bf16.msra.mxu0 %v703_v5  ;;  %s212_s24 = scalar_lea.vmem %s821_s3, %s629_s21  ;;  %s217_s28 = scalar_lea.vmem %s822_s4, %s629_s21 }
  0x10   : > { %s207_s6 = scalar_lea.vmem %s818_s0, %s688_s27  ;;  %669 = vmatpush3.bf16.msra.mxu1 %v704_v6  ;;  %658 = vmatprep.subr.bf16.mxu0 %v722_v1  ;;  %v634_v41 = vld [vmem:[%s212_s24] sm:$0xff]  }
  0x11   : > { %v219_v7 = vld [vmem:[%s207_s6] sm:$0xf]  ;;  %v220_v8 = vld [vmem:[%s207_s6 + $0x4] sm:$0xf]  ;;  %670 = vmatprep.subr.bf16.mxu1 %v722_v1  ;;  %v635_v46 = vunpack.c.l.bf16 %v634_v41  ;;  %v636_v51 = vunpack.c.h.bf16 %v634_v41 }
  0x12   : > { %v598_v10 = vcombine.low %v219_v7, %v220_v8  ;;  %v708_v11 = vld [vmem:[%s207_s6 + $0x8] ss:$0 sps:$4 sm:$0x11]   ;;  %v396_v22 = vld [vmem:[%s207_s6] sm:$0xe] }
  0x13   : > { %v256_v15 = vshll.u32 %v708_v11, 16  ;;  %659 = vmatpush3.bf16.msra.mxu0 %v705_v9  ;;  %v618_v24 = vcombine.low %v396_v22, %v220_v8  ;;  %v411_v27 = vrot.slane %v708_v11, 1 }
  0x14   : > { %v249_v13 = vshrl.u32 %v598_v10, 16  ;;  %v251_v14 = vshll.u32 %v598_v10, 16  ;;  %671 = vmatpush3.bf16.msra.mxu1 %v706_v12  ;;  %676 = vmatprep.subr.bf16.mxu0 %v722_v1 }
  0x15   : > { %v258_v17 = vrot.slane %v256_v15, 1  ;;  %v410_v26 = vrot.slane %v618_v24, 1 }
  0x16   : > { %v253_v16 = vrot.slane %v251_v14, 1 }
  0x17   : > { %673 = vmatmul.mubr.msk.bf16.vlgmr.msra.gmra.mrb[0].mxu1 %vm284_vm2, %v598_v10  ;;  %v412_v28 = vsel %vm409_vm3, %v410_v26, %v411_v27 }
  0x18   : > { %v254_v18 = vor.u32 %v253_v16, %v249_v13 }
  0x1a   : > { %v259_v20 = vsel %vm247_vm1, %v254_v18, %v258_v17 }
  0x1b   : > { %661 = vmatmul.mubr.msk.bf16.vlgmr.msra.gmra.mrb[0].mxu0 %vm284_vm2, %v259_v20 }
  0x1c   : > { %677 = vmatpush3.bf16.msra.mxu0 %v709_v19  ;;  %684 = vmatprep.mubr.msk.bf16.mxu0 %vm723_vm0, %v722_v1 }
  0x1d   : > { %678 = vmatprep.subr.bf16.mxu0 %v722_v1 }
  0x20   : > { %679 = vmatpush3.bf16.msra.mxu0 %v710_v21 }
  0x21   : > { %680 = vmatprep.subr.bf16.mxu0 %v722_v1 }
  0x24   : > { %681 = vmatpush3.bf16.msra.mxu0 %v711_v23 }
  0x25   : > { %682 = vmatprep.subr.bf16.mxu0 %v722_v1 }
  0x28   : > { %683 = vmatpush3.bf16.msra.mxu0 %v712_v25 }
  0x2b   : > { %685 = vmatmul.mubr.msk.bf16.vlgmr.msra.gmra.mrb[4].mxu0 %vm284_vm2, %v412_v28 }
  0xea   : > { %v389_v29 = vpop.f32.mrb[0].mxu1 }
  0xeb   : > { %v674_v31 = vpop.f32.mrb[1].mxu1 }
  0xec   : > { %v392_v34 = vpop.f32.mrb[2].mxu1 }
  0xed   : > { %v675_v36 = vpop.f32.mrb[3].mxu1 }
  0xee   : > { %v322_v30 = vpop.f32.mrb[0].mxu0 }
  0xef   : > { %v390_v32 = vadd.f32 %v389_v29, %v322_v30  ;;  %v662_v33 = vpop.f32.mrb[1].mxu0 }
  0xf0   : > { %v325_v35 = vpop.f32.mrb[2].mxu0 }
  0xf1   : > { %v393_v37 = vadd.f32 %v392_v34, %v325_v35  ;;  %v663_v38 = vpop.f32.mrb[3].mxu0 }
  0xfe   : > { %v474_v39 = vpop.f32.mrb[4].mxu0 }
  0xff   : > { %v481_v42 = vadd.f32 %v474_v39, %v390_v32  ;;  %v686_v43 = vpop.f32.mrb[5].mxu0 }
 0x100   : > { %v477_v44 = vpop.f32.mrb[6].mxu0 }
 0x101   : > { %v490_v45 = vadd.f32 %v624_v40, %v481_v42  ;;  %v482_v47 = vadd.f32 %v477_v44, %v393_v37  ;;  %v687_v48 = vpop.f32.mrb[7].mxu0 }
 0x103   : > { %v492_v49 = vmax.f32 %v490_v45, 0.0  ;;  %v491_v50 = vadd.f32 %v624_v40, %v482_v47 }
 0x105   : > { %v498_v52 = vadd.f32 %v635_v46, %v492_v49  ;;  %v493_v53 = vmax.f32 %v491_v50, 0.0 }
 0x107   : > { %v500_v54 = vmax.f32 %v498_v52, 0.0  ;;  %v499_v55 = vadd.f32 %v636_v51, %v493_v53 }
 0x109   : > { %v631_v56 = vpack.c.bf16 %v500_v54, %v500_v54  ;;  %v501_v57 = vmax.f32 %v499_v55, 0.0 }
 0x10b   : > { %511 = vst.msk [vmem:[%s217_s28] sm:$0xf] %vm510_vm4, %v631_v56  ;;  %v632_v58 = vpack.c.bf16 %v501_v57, %v501_v57 }
 0x10d   : > { %512 = vst.msk [vmem:[%s217_s28 + $0x4] sm:$0xf] %vm510_vm4, %v632_v58 }
 0x10e PF: > { %s14_s15 = sadd.s32 1, %s720_s15  }
 0x10f   : > { %p11_p4 = scmp.ge.s32.totalorder %s14_s15, 4  }
 0x111   :  { %13 = sbr.rel (!%p11_p4) target bundleno = 1 (0x1), region = 71 }

// kernel: deep_model_forward.22
= control target key start
LH: loop header
LB: loop body
LE: loop exit
PB: predicated region body
PF: predicated region fallthrough
CT: control target
= control target key end

     0   :  { %s792_s12 = smov 0   ;;  %s918_s0 = inlined_call_operand.vmem [shape: bf16[2,9,128], index: 0, kind: input, shape index: {}]   ;;  %s919_s1 = inlined_call_operand.vmem [shape: bf16[3,128,64], index: 1, kind: input, shape index: {}]   ;;  %s920_s2 = inlined_call_operand.vmem [shape: f32[1,64], index: 2, kind: input, shape index: {}]   ;;  %s921_s3 = inlined_call_operand.vmem [shape: bf16[2,8,128], index: 3, kind: output, shape index: {}]  }
   0x1 LB: > { %s569_s13 = sadd.s32 4294967295, %s767_s12   ;;  %p573_p0 = scmp.ge.s32.totalorder %s767_s12, 1  ;;  %s767_s12 = sphi %s792_s12, %s13_s12  }
   0x2   : > { %p137_p1 = scmp.lt.s32.totalorder %s767_s12, 3 }
   0x4   : > { %p138_p2 = pnand %p573_p0, %p137_p1 }
   0x5   : > { %v736_v0 = vld [vmem:[%s919_s1 + $0x40] sm:$0xff] (!%p138_p2)   ;;  %v769_v1 = vmov (!%p138_p2), 0.0   ;;  %v737_v2 = vld [vmem:[%s919_s1 + $0x48] sm:$0xff] (!%p138_p2)   ;;  %vm770_vm0 = vmmov (!%p138_p2), 0   ;;  %v738_v3 = vld [vmem:[%s919_s1 + $0x50] sm:$0xff] (!%p138_p2)   ;;  %p160_p3 = scmp.lt.s32.totalorder (!%p138_p2), %s569_s13, 1 }
   0x6   : > { %141 = sbr.rel (%p138_p2) target bundleno = 407 (0x197), region = 32  ;;  %665 = vmatprep.subr.bf16.mxu0 (!%p138_p2), %v769_v1  ;;  %685 = vmatprep.subr.bf16.mxu1 (!%p138_p2), %v769_v1  ;;  %v744_v4 = vld [vmem:[%s919_s1 + $0x80] sm:$0xff] (!%p138_p2)   ;;  %v739_v5 = vld [vmem:[%s919_s1 + $0x58] sm:$0xff] (!%p138_p2)   ;;  %v747_v6 = vld [vmem:[%s919_s1 + $0x88] sm:$0xff] (!%p138_p2)   ;;  %s771_s18 = smov (!%p138_p2), 64   ;;  %vm511_vm1 = vcmask (!%p138_p2), 523264  }
   0x7   : > { %666 = vmatpush3.bf16.msra.mxu0 (!%p138_p2), %v736_v0  ;;  %681 = vmatprep.mubr.msk.bf16.mxu0 (!%p138_p2), %vm770_vm0, %v769_v1  ;;  %v740_v7 = vld [vmem:[%s919_s1 + $0x60] sm:$0xff] (!%p138_p2)   ;;  %v749_v8 = vld [vmem:[%s919_s1 + $0x90] sm:$0xff] (!%p138_p2)   ;;  %v741_v9 = vld [vmem:[%s919_s1 + $0x68] sm:$0xff] (!%p138_p2)  }
   0x8   : > { %667 = vmatprep.subr.bf16.mxu0 (!%p138_p2), %v769_v1  ;;  %701 = vmatprep.mubr.msk.bf16.mxu1 (!%p138_p2), %vm770_vm0, %v769_v1  ;;  %v751_v10 = vld [vmem:[%s919_s1 + $0x98] sm:$0xff] (!%p138_p2)   ;;  %v742_v11 = vld [vmem:[%s919_s1 + $0x70] sm:$0xff] (!%p138_p2)   ;;  %v753_v13 = vld [vmem:[%s919_s1 + $0xa0] sm:$0xff] (!%p138_p2)  }
   0x9   : > { %686 = vmatpush3.bf16.msra.mxu1 (!%p138_p2), %v744_v4  ;;  %v743_v16 = vld [vmem:[%s919_s1 + $0x78] sm:$0xff] (!%p138_p2)   ;;  %v755_v17 = vld [vmem:[%s919_s1 + $0xa8] sm:$0xff] (!%p138_p2)   ;;  %v746_v19 = vld [vmem:[%s919_s1] sm:$0xff] (!%p138_p2)  }
   0xa   : > { %687 = vmatprep.subr.bf16.mxu1 (!%p138_p2), %v769_v1  ;;  %v757_v20 = vld [vmem:[%s919_s1 + $0xb0] sm:$0xff] (!%p138_p2)   ;;  %v748_v23 = vld [vmem:[%s919_s1 + $0x8] sm:$0xff] (!%p138_p2)   ;;  %v759_v24 = vld [vmem:[%s919_s1 + $0xb8] sm:$0xff] (!%p138_p2)  }
   0xb   : > { %668 = vmatpush3.bf16.msra.mxu0 (!%p138_p2), %v737_v2  ;;  %v750_v26 = vld [vmem:[%s919_s1 + $0x10] sm:$0xff] (!%p138_p2)   ;;  %v752_v27 = vld [vmem:[%s919_s1 + $0x18] sm:$0xff] (!%p138_p2)   ;;  %v754_v28 = vld [vmem:[%s919_s1 + $0x20] sm:$0xff] (!%p138_p2)  }
   0xc   : > { %669 = vmatprep.subr.bf16.mxu0 (!%p138_p2), %v769_v1  ;;  %v756_v29 = vld [vmem:[%s919_s1 + $0x28] sm:$0xff] (!%p138_p2)   ;;  %v758_v30 = vld [vmem:[%s919_s1 + $0x30] sm:$0xff] (!%p138_p2)   ;;  %v760_v31 = vld [vmem:[%s919_s1 + $0x38] sm:$0xff] (!%p138_p2)  }
   0xd   : > { %s923_s13 = smov (!%p160_p3, %s569_s13), 1  ;;  %688 = vmatpush3.bf16.msra.mxu1 %v747_v6  ;;  %v593_v32 = vld [vmem:[%s920_s2] ss:$0 sm:$0xff] }
   0xe   : > { %689 = vmatprep.subr.bf16.mxu1 %v769_v1  ;;  %s637_s5 = sshll.u32 %s923_s13, 3  ;;  %s576_s19 = sshll.u32 %s923_s13, 2 }
   0xf   : > { %670 = vmatpush3.bf16.msra.mxu0 %v738_v3  ;;  %s164_s14 = scalar_lea.vmem %s918_s0, %s637_s5  ;;  %s168_s22 = scalar_lea.vmem %s921_s3, %s576_s19 }
  0x10   : > { %671 = vmatprep.subr.bf16.mxu0 %v769_v1  ;;  %v171_v12 = vld [vmem:[%s164_s14 + $0x4] sm:$0x1]  ;;  %v170_v14 = vld [vmem:[%s164_s14] sm:$0xf] }
  0x11   : > { %690 = vmatpush3.bf16.msra.mxu1 %v749_v8  ;;  %v618_v15 = vcombine.low %v170_v14, %v171_v12 }
  0x12   : > { %691 = vmatprep.subr.bf16.mxu1 %v769_v1 }
  0x13   : > { %672 = vmatpush3.bf16.msra.mxu0 %v739_v5  ;;  %v325_v18 = vshll.u32 %v618_v15, 16  ;;  %v323_v21 = vshrl.u32 %v618_v15, 16 }
  0x14   : > { %673 = vmatprep.subr.bf16.mxu0 %v769_v1 }
  0x15   : > { %692 = vmatpush3.bf16.msra.mxu1 %v751_v10  ;;  %v327_v22 = vrot.slane %v325_v18, 1 }
  0x16   : > { %693 = vmatprep.subr.bf16.mxu1 %v769_v1 }
  0x17   : > { %674 = vmatpush3.bf16.msra.mxu0 %v740_v7  ;;  %v328_v25 = vor.u32 %v327_v22, %v323_v21 }
  0x18   : > { %675 = vmatprep.subr.bf16.mxu0 %v769_v1 }
  0x19   : > { %694 = vmatpush3.bf16.msra.mxu1 %v753_v13 }
  0x1a   : > { %695 = vmatprep.subr.bf16.mxu1 %v769_v1 }
  0x1b   : > { %676 = vmatpush3.bf16.msra.mxu0 %v741_v9 }
  0x1c   : > { %677 = vmatprep.subr.bf16.mxu0 %v769_v1 }
  0x1d   : > { %696 = vmatpush3.bf16.msra.mxu1 %v755_v17 }
  0x1e   : > { %697 = vmatprep.subr.bf16.mxu1 %v769_v1 }
  0x1f   : > { %678 = vmatpush3.bf16.msra.mxu0 %v742_v11 }
  0x20   : > { %679 = vmatprep.subr.bf16.mxu0 %v769_v1 }
  0x21   : > { %698 = vmatpush3.bf16.msra.mxu1 %v757_v20 }
  0x22   : > { %699 = vmatprep.subr.bf16.mxu1 %v769_v1 }
  0x23   : > { %680 = vmatpush3.bf16.msra.mxu0 %v743_v16 }
  0x24   : > { %705 = vmatprep.subr.bf16.mxu0 %v769_v1 }
  0x25   : > { %700 = vmatpush3.bf16.msra.mxu1 %v759_v24 }
  0x26   : > { %682 = vmatmul.mubr.bf16.vlgmr.msra.gmra.mrb[0].mxu0 %v170_v14 }
  0x27   : > { %706 = vmatpush3.bf16.msra.mxu0 %v746_v19  ;;  %721 = vmatprep.mubr.msk.bf16.mxu0 %vm770_vm0, %v769_v1 }
  0x28   : > { %707 = vmatprep.subr.bf16.mxu0 %v769_v1  ;;  %702 = vmatmul.mubr.bf16.vlgmr.msra.gmra.mrb[0].mxu1 %v328_v25 }
  0x2b   : > { %708 = vmatpush3.bf16.msra.mxu0 %v748_v23 }
  0x2c   : > { %709 = vmatprep.subr.bf16.mxu0 %v769_v1 }
  0x2f   : > { %710 = vmatpush3.bf16.msra.mxu0 %v750_v26 }
  0x30   : > { %711 = vmatprep.subr.bf16.mxu0 %v769_v1 }
  0x33   : > { %712 = vmatpush3.bf16.msra.mxu0 %v752_v27 }
  0x34   : > { %713 = vmatprep.subr.bf16.mxu0 %v769_v1 }
  0x37   : > { %714 = vmatpush3.bf16.msra.mxu0 %v754_v28 }
  0x38   : > { %715 = vmatprep.subr.bf16.mxu0 %v769_v1 }
  0x3b   : > { %716 = vmatpush3.bf16.msra.mxu0 %v756_v29 }
  0x3c   : > { %717 = vmatprep.subr.bf16.mxu0 %v769_v1 }
  0x3f   : > { %718 = vmatpush3.bf16.msra.mxu0 %v758_v30 }
  0x40   : > { %719 = vmatprep.subr.bf16.mxu0 %v769_v1 }
  0x43   : > { %720 = vmatpush3.bf16.msra.mxu0 %v760_v31 }
  0x46   : > { %722 = vmatmul.mubr.bf16.vlgmr.msra.gmra.mrb[4].mxu0 %v170_v14 }
  0xf9   : > { %v278_v33 = vpop.f32.mrb[0].mxu0 }
  0xfa   : > { %v279_v34 = vadd.f32 %v593_v32, %v278_v33  ;;  %v683_v35 = vpop.f32.mrb[1].mxu0 }
  0xfb   : > { %v281_v36 = vpop.f32.mrb[2].mxu0  ;;  %v412_v38 = vpop.f32.mrb[0].mxu1 }
  0xfc   : > { %v684_v37 = vpop.f32.mrb[3].mxu0  ;;  %v703_v39 = vpop.f32.mrb[1].mxu1 }
  0xfd   : > { %v415_v40 = vpop.f32.mrb[2].mxu1 }
  0xfe   : > { %v704_v41 = vpop.f32.mrb[3].mxu1 }
 0x119   : > { %v500_v42 = vpop.f32.mrb[4].mxu0 }
 0x11a   : > { %v501_v43 = vadd.f32 %v500_v42, %v412_v38  ;;  %v723_v44 = vpop.f32.mrb[5].mxu0 }
 0x11b   : > { %v503_v45 = vpop.f32.mrb[6].mxu0 }
 0x11c   : > { %v724_v46 = vpop.f32.mrb[7].mxu0  ;;  %v506_v47 = vadd.f32 %v593_v32, %v501_v43 }
 0x11e   : > { %508 = vrot.lane.b32.xlu0 %v506_v47, %s771_s18 }
 0x190   : > { %v509_v48 = vpop.permute.xlu0 %508 }
 0x191   : > { %v512_v49 = vsel %vm511_vm1, %v279_v34, %v509_v48 }
 0x192   : > { %v513_v50 = vmax.f32 %v512_v49, 0.0 }
 0x194   : > { %v514_v51 = vpack.c.bf16 %v513_v50, %v513_v50 }
 0x196   : > { %515 = vst [vmem:[%s168_s22] sm:$0xf] %v514_v51 }
 0x197 PF: > { %s13_s12 = sadd.s32 1, %s767_s12  }
 0x198   : > { %p10_p4 = scmp.ge.s32.totalorder %s13_s12, 4  }
 0x19a   :  { %12 = sbr.rel (!%p10_p4) target bundleno = 1 (0x1), region = 64 }

// kernel: deep_model_forward.25
= control target key start
LH: loop header
LB: loop body
LE: loop exit
PB: predicated region body
PF: predicated region fallthrough
CT: control target
= control target key end

     0   :  { %s673_s12 = smov 0   ;;  %s739_s0 = inlined_call_operand.vmem [shape: bf16[2,17,64], index: 0, kind: input, shape index: {}]   ;;  %s740_s1 = inlined_call_operand.vmem [shape: bf16[3,64,32], index: 1, kind: input, shape index: {}]   ;;  %s741_s2 = inlined_call_operand.vmem [shape: f32[1,32], index: 2, kind: input, shape index: {}]   ;;  %s742_s3 = inlined_call_operand.vmem [shape: bf16[2,16,64], index: 3, kind: output, shape index: {}]  }
   0x1 LB: > { %s511_s13 = sadd.s32 4294967295, %s648_s12   ;;  %p515_p0 = scmp.ge.s32.totalorder %s648_s12, 1  ;;  %s648_s12 = sphi %s673_s12, %s13_s12  }
   0x2   : > { %p137_p1 = scmp.lt.s32.totalorder %s648_s12, 3 }
   0x4   : > { %p138_p2 = pnand %p515_p0, %p137_p1 }
   0x5   : > { %v628_v0 = vld [vmem:[%s740_s1 + $0x20] sm:$0xff] (!%p138_p2)   ;;  %v650_v1 = vmov (!%p138_p2), 0.0   ;;  %v629_v2 = vld [vmem:[%s740_s1 + $0x28] sm:$0xff] (!%p138_p2)   ;;  %vm651_vm0 = vmmov (!%p138_p2), 0   ;;  %p161_p3 = scmp.lt.s32.totalorder (!%p138_p2), %s511_s13, 1  ;;  %v630_v4 = vld [vmem:[%s740_s1 + $0x30] sm:$0xff] (!%p138_p2)  }
   0x6   : > { %141 = sbr.rel (%p138_p2) target bundleno = 381 (0x17d), region = 32  ;;  %575 = vmatprep.subr.bf16.mxu0 (!%p138_p2), %v650_v1  ;;  %587 = vmatprep.subr.bf16.mxu1 (!%p138_p2), %v650_v1  ;;  %v632_v3 = vld [vmem:[%s740_s1 + $0x40] sm:$0xff] (!%p138_p2)   ;;  %v635_v5 = vld [vmem:[%s740_s1 + $0x48] sm:$0xff] (!%p138_p2)   ;;  %v631_v6 = vld [vmem:[%s740_s1 + $0x38] sm:$0xff] (!%p138_p2)   ;;  %vm220_vm1 = vcmask (!%p138_p2), 523264   ;;  %s652_s19 = smov (!%p138_p2), 32  }
   0x7   : > { %576 = vmatpush3.bf16.msra.mxu0 (!%p138_p2), %v628_v0  ;;  %583 = vmatprep.mubr.msk.bf16.mxu0 (!%p138_p2), %vm651_vm0, %v650_v1  ;;  %v637_v8 = vld [vmem:[%s740_s1 + $0x50] sm:$0xff] (!%p138_p2)   ;;  %v634_v12 = vld [vmem:[%s740_s1] sm:$0xff] (!%p138_p2)   ;;  %v639_v13 = vld [vmem:[%s740_s1 + $0x58] sm:$0xff] (!%p138_p2)   ;;  %vm285_vm2 = vsmask.f32 (!%p138_p2), 7424  ;;  %vm440_vm3 = vcmask (!%p138_p2), 261120  }
   0x8   : > { %577 = vmatprep.subr.bf16.mxu0 (!%p138_p2), %v650_v1  ;;  %595 = vmatprep.mubr.msk.bf16.mxu1 (!%p138_p2), %vm651_vm0, %v650_v1  ;;  %v636_v18 = vld [vmem:[%s740_s1 + $0x8] sm:$0xff] (!%p138_p2)   ;;  %v638_v20 = vld [vmem:[%s740_s1 + $0x10] sm:$0xff] (!%p138_p2)   ;;  %v641_v21 = vld [vmem:[%s740_s1 + $0x18] sm:$0xff] (!%p138_p2)   ;;  %vm453_vm4 = vcmask (!%p138_p2), 519168  }
   0x9   : > { %588 = vmatpush3.bf16.msra.mxu1 (!%p138_p2), %v632_v3  ;;  %v527_v22 = vld [vmem:[%s741_s2] ss:$0 sm:$0xff] (!%p138_p2) }
   0xa   : > { %589 = vmatprep.subr.bf16.mxu1 (!%p138_p2), %v650_v1 }
   0xb   : > { %578 = vmatpush3.bf16.msra.mxu0 (!%p138_p2), %v629_v2 }
   0xc   : > { %579 = vmatprep.subr.bf16.mxu0 (!%p138_p2), %v650_v1 }
   0xd   : > { %s744_s13 = smov (!%p161_p3, %s511_s13), 1  ;;  %590 = vmatpush3.bf16.msra.mxu1 %v635_v5 }
   0xe   : > { %s611_s22 = smul.u32 12, %s744_s13  ;;  %591 = vmatprep.subr.bf16.mxu1 %v650_v1  ;;  %s557_s20 = sshll.u32 %s744_s13, 3 }
   0xf   : > { %580 = vmatpush3.bf16.msra.mxu0 %v630_v4  ;;  %s170_s23 = scalar_lea.vmem %s742_s3, %s557_s20 }
  0x10   : > { %s165_s29 = scalar_lea.vmem %s739_s0, %s611_s22  ;;  %581 = vmatprep.subr.bf16.mxu0 %v650_v1 }
  0x11   : > { %v633_v7 = vld [vmem:[%s165_s29] sm:$0xff]   ;;  %v640_v10 = vld [vmem:[%s165_s29 + $0x8] ss:$0 sps:$4 sm:$0x11]   ;;  %592 = vmatpush3.bf16.msra.mxu1 %v637_v8 }
  0x12   : > { %v286_v9 = vshrl.u32 %v633_v7, 16  ;;  %v288_v11 = vshll.u32 %v633_v7, 16  ;;  %v293_v15 = vshll.u32 %v640_v10, 16  ;;  %593 = vmatprep.subr.bf16.mxu1 %v650_v1 }
  0x13   : > { %582 = vmatpush3.bf16.msra.mxu0 %v631_v6 }
  0x14   : > { %v290_v14 = vrot.slane %v288_v11, 1  ;;  %599 = vmatprep.subr.bf16.mxu0 %v650_v1  ;;  %v295_v17 = vrot.slane %v293_v15, 1 }
  0x15   : > { %594 = vmatpush3.bf16.msra.mxu1 %v639_v13 }
  0x16   : > { %v291_v16 = vor.u32 %v290_v14, %v286_v9  ;;  %584 = vmatmul.mubr.msk.bf16.vlgmr.msra.gmra.mrb[0].mxu0 %vm220_vm1, %v633_v7 }
  0x17   : > { %600 = vmatpush3.bf16.msra.mxu0 %v634_v12  ;;  %607 = vmatprep.mubr.msk.bf16.mxu0 %vm651_vm0, %v650_v1 }
  0x18   : > { %v296_v19 = vsel %vm285_vm2, %v291_v16, %v295_v17  ;;  %601 = vmatprep.subr.bf16.mxu0 %v650_v1 }
  0x19   : > { %596 = vmatmul.mubr.msk.bf16.vlgmr.msra.gmra.mrb[0].mxu1 %vm220_vm1, %v296_v19 }
  0x1b   : > { %602 = vmatpush3.bf16.msra.mxu0 %v636_v18 }
  0x1c   : > { %603 = vmatprep.subr.bf16.mxu0 %v650_v1 }
  0x1f   : > { %604 = vmatpush3.bf16.msra.mxu0 %v638_v20 }
  0x20   : > { %605 = vmatprep.subr.bf16.mxu0 %v650_v1 }
  0x23   : > { %606 = vmatpush3.bf16.msra.mxu0 %v641_v21 }
  0x26   : > { %608 = vmatmul.mubr.msk.bf16.vlgmr.msra.gmra.mrb[4].mxu0 %vm220_vm1, %v633_v7 }
  0xe9   : > { %v258_v23 = vpop.f32.mrb[0].mxu0 }
  0xea   : > { %v259_v24 = vadd.f32 %v527_v22, %v258_v23  ;;  %v585_v25 = vpop.f32.mrb[1].mxu0 }
  0xeb   : > { %v261_v26 = vpop.f32.mrb[2].mxu0 }
  0xec   : > { %v262_v27 = vadd.f32 %v527_v22, %v261_v26  ;;  %v586_v28 = vpop.f32.mrb[3].mxu0  ;;  %v358_v29 = vpop.f32.mrb[0].mxu1 }
  0xed   : > { %v597_v30 = vpop.f32.mrb[1].mxu1 }
  0xee   : > { %v361_v31 = vpop.f32.mrb[2].mxu1 }
  0xef   : > { %v598_v32 = vpop.f32.mrb[3].mxu1 }
  0xf9   : > { %v423_v33 = vpop.f32.mrb[4].mxu0 }
  0xfa   : > { %v424_v34 = vadd.f32 %v423_v33, %v358_v29  ;;  %v609_v35 = vpop.f32.mrb[5].mxu0 }
  0xfb   : > { %v426_v36 = vpop.f32.mrb[6].mxu0 }
  0xfc   : > { %v427_v37 = vadd.f32 %v426_v36, %v361_v31  ;;  %v610_v38 = vpop.f32.mrb[7].mxu0  ;;  %v430_v39 = vadd.f32 %v527_v22, %v424_v34 }
  0xfe   : > { %v431_v40 = vadd.f32 %v527_v22, %v427_v37 }
 0x100   : > { %v623_v41 = vpack.i.bf16 %v431_v40, %v430_v39 }
 0x102   : > { %624 = vrot.lane.b32.xlu0 %v623_v41, %s652_s19 }
 0x174   : > { %v625_v42 = vpop.permute.xlu0 %624 }
 0x175   : > { %v627_v43 = vunpack.i.h.bf16 %v625_v42  ;;  %v626_v44 = vunpack.i.l.bf16 %v625_v42 }
 0x177   : > { %v442_v45 = vsel %vm440_vm3, %v262_v27, %v627_v43  ;;  %v441_v46 = vsel %vm440_vm3, %v259_v24, %v626_v44 }
 0x178   : > { %v444_v47 = vmax.f32 %v442_v45, 0.0  ;;  %v443_v48 = vmax.f32 %v441_v46, 0.0 }
 0x17a   : > { %v559_v49 = vpack.c.bf16 %v444_v47, %v444_v47  ;;  %v558_v50 = vpack.c.bf16 %v443_v48, %v443_v48 }
 0x17c   : > { %455 = vst.msk [vmem:[%s170_s23 + $0x4] sm:$0xf] %vm453_vm4, %v559_v49  ;;  %454 = vst.msk [vmem:[%s170_s23] sm:$0xf] %vm453_vm4, %v558_v50 }
 0x17d PF: > { %s13_s12 = sadd.s32 1, %s648_s12  }
 0x17e   : > { %p10_p4 = scmp.ge.s32.totalorder %s13_s12, 4  }
 0x180   :  { %12 = sbr.rel (!%p10_p4) target bundleno = 1 (0x1), region = 64 }

// kernel: deep_model_forward.28
= control target key start
LH: loop header
LB: loop body
LE: loop exit
PB: predicated region body
PF: predicated region fallthrough
CT: control target
= control target key end

     0   :  { %s677_s14 = smov 0   ;;  %s726_s0 = inlined_call_operand.vmem [shape: bf16[2,33,32], index: 0, kind: input, shape index: {}]   ;;  %s727_s1 = inlined_call_operand.vmem [shape: bf16[3,32,1], index: 1, kind: input, shape index: {}]   ;;  %s728_s2 = inlined_call_operand.<no memory space> [shape: f32[1,1], index: 2, kind: input, shape index: {}]   ;;  %s729_s3 = inlined_call_operand.vmem [shape: bf16[2,32,2], index: 3, kind: output, shape index: {}]  }
   0x1   :  { %v8_v0 = vstv %s728_s2 }
   0x2   :  { %9 = vst [vmem:[#allocation2] sm:$0x1] %v8_v0 }
   0x3 LB: > { %s533_s15 = sadd.s32 4294967295, %s651_s14   ;;  %p537_p0 = scmp.ge.s32.totalorder %s651_s14, 1  ;;  %s651_s14 = sphi %s677_s14, %s15_s14  }
   0x4   : > { %p139_p1 = scmp.lt.s32.totalorder %s651_s14, 3 }
   0x6   : > { %p140_p2 = pnand %p537_p0, %p139_p1 }
   0x7   : > { %v636_v1 = vld [vmem:[%s727_s1 + $0x20] sm:$0xff] (!%p140_p2)   ;;  %p163_p3 = scmp.lt.s32.totalorder (!%p140_p2), %s533_s15, 1  ;;  %v637_v2 = vld [vmem:[%s727_s1 + $0x28] sm:$0xff] (!%p140_p2)   ;;  %v643_v4 = vld [vmem:[%s727_s1 + $0x10] sm:$0xff] (!%p140_p2)   ;;  %vm213_vm0 = vcmask (!%p140_p2), 261120   ;;  %s653_s4 = smov (!%p140_p2), 1  }
   0x8   : > { %143 = sbr.rel (%p140_p2) target bundleno = 386 (0x182), region = 32  ;;  %596 = vmatprep.subr.bf16.mxu1 (!%p140_p2), %v636_v1  ;;  %v640_v3 = vld [vmem:[%s727_s1] sm:$0xff] (!%p140_p2)   ;;  %v644_v5 = vld [vmem:[%s727_s1 + $0x18] sm:$0xff] (!%p140_p2)   ;;  %588 = vmatprep.subr.bf16.mxu0 (!%p140_p2), %v643_v4  ;;  %vm281_vm1 = vsmask.f32 (!%p140_p2), 7424  ;;  %v642_v21 = vld [vmem:[%s727_s1 + $0x8] sm:$0xff] (!%p140_p2)  }
   0x9   : > { %597 = vmatpush3.bf16.msra.mxu1 (!%p140_p2), %v636_v1  ;;  %589 = vmatpush3.bf16.msra.mxu0 (!%p140_p2), %v643_v4  ;;  %v545_v22 = vld [vmem:[#allocation2] ss:$0 sm:$0xff] (!%p140_p2)  ;;  %vm448_vm2 = vcmask (!%p140_p2), 7168   ;;  %vm473_vm3 = vcmask (!%p140_p2), 11264  }
   0xa   : > { %598 = vmatprep.subr.bf16.mxu1 (!%p140_p2), %v637_v2  ;;  %590 = vmatprep.subr.bf16.mxu0 (!%p140_p2), %v644_v5 }
   0xd   : > { %599 = vmatpush3.bf16.msra.mxu1 (!%p140_p2), %v637_v2  ;;  %591 = vmatpush3.bf16.msra.mxu0 (!%p140_p2), %v644_v5 }
   0xe   : > { %604 = vmatprep.subr.bf16.mxu1 (!%p140_p2), %v640_v3 }
   0xf   : > { %s731_s15 = smov (!%p163_p3, %s533_s15), 1 }
  0x10   : > { %s616_s19 = smul.u32 20, %s731_s15  ;;  %s571_s5 = sshll.u32 %s731_s15, 4 }
  0x11   : > { %s172_s8 = scalar_lea.vmem %s729_s3, %s571_s5 }
  0x12   : > { %s167_s26 = scalar_lea.vmem %s726_s0, %s616_s19 }
  0x13   : > { %v638_v6 = vld [vmem:[%s167_s26] sm:$0xff]   ;;  %v639_v7 = vld [vmem:[%s167_s26 + $0x8] sm:$0xff]   ;;  %v641_v8 = vld [vmem:[%s167_s26 + $0x10] ss:$0 sps:$4 sm:$0x11]  }
  0x14   : > { %v282_v9 = vshrl.u32 %v638_v6, 16  ;;  %v284_v10 = vshll.u32 %v638_v6, 16  ;;  %v288_v11 = vshll.u32 %v639_v7, 16  ;;  %v292_v12 = vshrl.u32 %v639_v7, 16  ;;  %592 = vmatprep.mubr.msk.bf16.mxu0 %vm213_vm0, %v638_v6 }
  0x15   : > { %v296_v13 = vshll.u32 %v641_v8, 16  ;;  %593 = vmatmul.mubr.msk.bf16.vlgmr.msra.gmra.mrb[0].mxu0 %vm213_vm0, %v639_v7 }
  0x16   : > { %v286_v14 = vrot.slane %v284_v10, 1  ;;  %v290_v15 = vrot.slane %v288_v11, 1 }
  0x17   : > { %v298_v16 = vrot.slane %v296_v13, 1 }
  0x18   : > { %v287_v17 = vor.u32 %v286_v14, %v282_v9  ;;  %v294_v18 = vor.u32 %v292_v12, %v290_v15 }
  0x1a   : > { %v291_v19 = vsel %vm281_vm1, %v287_v17, %v290_v15  ;;  %v299_v20 = vsel %vm281_vm1, %v294_v18, %v298_v16 }
  0x1b   : > { %600 = vmatprep.mubr.msk.bf16.mxu1 %vm213_vm0, %v291_v19 }
  0x1c   : > { %601 = vmatmul.mubr.msk.bf16.vlgmr.msra.gmra.mrb[0].mxu1 %vm213_vm0, %v299_v20 }
  0x1d   : > { %605 = vmatpush3.bf16.msra.mxu1 %v640_v3  ;;  %608 = vmatprep.mubr.msk.bf16.mxu1 %vm213_vm0, %v638_v6 }
  0x1e   : > { %606 = vmatprep.subr.bf16.mxu1 %v642_v21 }
  0x21   : > { %607 = vmatpush3.bf16.msra.mxu1 %v642_v21 }
  0x28   : > { %609 = vmatmul.mubr.msk.bf16.vlgmr.msra.gmra.mrb[0].mxu1 %vm213_vm0, %v639_v7 }
  0xe8   : > { %v594_v23 = vpop.f32.mrb[0].mxu0 }
  0xe9   : > { %v263_v24 = vadd.f32 %v594_v23, %v545_v22  ;;  %v254_v25 = vpop.f32.mrb[1].mxu0 }
  0xea   : > { %v255_v26 = vadd.f32 %v545_v22, %v254_v25  ;;  %v595_v27 = vpop.f32.mrb[2].mxu0 }
  0xeb   : > { %v266_v28 = vadd.f32 %v595_v27, %v545_v22  ;;  %v257_v29 = vpop.f32.mrb[3].mxu0 }
  0xec   : > { %v258_v30 = vadd.f32 %v545_v22, %v257_v29 }
  0xfb   : > { %v610_v31 = vpop.f32.mrb[0].mxu1 }
  0xfc   : > { %v413_v32 = vpop.f32.mrb[1].mxu1  ;;  %v430_v34 = vadd.f32 %v610_v31, %v545_v22 }
  0xfd   : > { %v611_v33 = vpop.f32.mrb[2].mxu1  ;;  %v428_v37 = vadd.f32 %v545_v22, %v413_v32 }
  0xfe   : > { %v431_v35 = vadd.f32 %v611_v33, %v545_v22  ;;  %v416_v36 = vpop.f32.mrb[3].mxu1 }
  0xff   : > { %v429_v38 = vadd.f32 %v545_v22, %v416_v36 }
 0x100   : > { %v631_v39 = vpack.i.bf16 %v431_v35, %v430_v34 }
 0x101   : > { %v626_v40 = vpack.i.bf16 %v429_v38, %v428_v37 }
 0x103   : > { %627 = vrot.lane.b32.xlu0 %v626_v40, %s653_s4 }
 0x107   : > { %632 = vrot.lane.b32.xlu0 %v631_v39, %s653_s4 }
 0x175   : > { %v628_v41 = vpop.permute.xlu0 %627 }
 0x176   : > { %v630_v42 = vunpack.i.h.bf16 %v628_v41  ;;  %v629_v43 = vunpack.i.l.bf16 %v628_v41 }
 0x178   : > { %v449_v44 = vsel %vm448_vm2, %v255_v26, %v629_v43  ;;  %v450_v45 = vsel %vm448_vm2, %v258_v30, %v630_v42 }
 0x179   : > { %v453_v46 = vmax.f32 %v449_v44, 0.0  ;;  %v454_v47 = vmax.f32 %v450_v45, 0.0  ;;  %v633_v48 = vpop.permute.xlu0 %632 }
 0x17a   : > { %v635_v49 = vunpack.i.h.bf16 %v633_v48  ;;  %v634_v50 = vunpack.i.l.bf16 %v633_v48 }
 0x17b   : > { %v572_v51 = vpack.c.bf16 %v453_v46, %v453_v46  ;;  %v573_v52 = vpack.c.bf16 %v454_v47, %v454_v47 }
 0x17c   : > { %v451_v53 = vsel %vm448_vm2, %v263_v24, %v634_v50  ;;  %v452_v54 = vsel %vm448_vm2, %v266_v28, %v635_v49 }
 0x17d   : > { %474 = vst.msk [vmem:[%s172_s8] sm:$0xf] %vm473_vm3, %v572_v51  ;;  %475 = vst.msk [vmem:[%s172_s8 + $0x4] sm:$0xf] %vm473_vm3, %v573_v52  ;;  %v455_v55 = vmax.f32 %v451_v53, 0.0  ;;  %v456_v56 = vmax.f32 %v452_v54, 0.0 }
 0x17f   : > { %v574_v57 = vpack.c.bf16 %v455_v55, %v455_v55  ;;  %v575_v58 = vpack.c.bf16 %v456_v56, %v456_v56 }
 0x181   : > { %476 = vst.msk [vmem:[%s172_s8 + $0x8] sm:$0xf] %vm473_vm3, %v574_v57  ;;  %477 = vst.msk [vmem:[%s172_s8 + $0xc] sm:$0xf] %vm473_vm3, %v575_v58 }
 0x182 PF: > { %s15_s14 = sadd.s32 1, %s651_s14  }
 0x183   : > { %p12_p4 = scmp.ge.s32.totalorder %s15_s14, 4  }
 0x185   :  { %14 = sbr.rel (!%p12_p4) target bundleno = 3 (0x3), region = 64 }

// kernel: deep_model_forward.29
= control target key start
LH: loop header
LB: loop body
LE: loop exit
PB: predicated region body
PF: predicated region fallthrough
CT: control target
= control target key end

     0   :  { %v168_v28 = vlaneseq  ;;  %v1312_v36 = vmov 1966171168   ;;  %s1636_s0 = inlined_call_operand.vmem [shape: bf16[2,1024], index: 0, kind: input, shape index: {}]   ;;  %s1637_s1 = inlined_call_operand.vmem [shape: bf16[1024,128], index: 1, kind: input, shape index: {}]   ;;  %s1638_s2 = inlined_call_operand.vmem [shape: f32[1,128], index: 2, kind: input, shape index: {}]   ;;  %s1639_s3 = inlined_call_operand.vmem [shape: bf16[128,64], index: 3, kind: input, shape index: {}]   ;;  %s1640_s4 = inlined_call_operand.vmem [shape: f32[1,64], index: 4, kind: input, shape index: {}]   ;;  %s1641_s5 = inlined_call_operand.vmem [shape: bf16[64,5], index: 5, kind: input, shape index: {}]   ;;  %s1642_s6 = inlined_call_operand.vmem [shape: f32[1,5], index: 6, kind: input, shape index: {}]   ;;  %s1643_s7 = inlined_call_operand.hbm [shape: f32[2,5], index: 7, kind: output, shape index: {}]  }
   0x1   :  { %v1211_v0 = vld [vmem:[%s1637_s1 + $0x40] sm:$0xff]   ;;  %v1215_v4 = vld [vmem:[%s1637_s1 + $0x48] sm:$0xff]   ;;  %v1219_v8 = vld [vmem:[%s1637_s1 + $0x50] sm:$0xff]   ;;  %v166_v37 = vunpack.c.l.s4 %v1312_v36 }
   0x2   :  { %v1212_v1 = vld [vmem:[%s1637_s1 + $0xc0] sm:$0xff]   ;;  %1073 = vmatprep.subr.bf16.mxu0 %v1211_v0  ;;  %v1216_v5 = vld [vmem:[%s1637_s1 + $0xc8] sm:$0xff]   ;;  %v1220_v9 = vld [vmem:[%s1637_s1 + $0xd0] sm:$0xff]   ;;  %v169_v33 = vshrl.u32 %v168_v28, 7 }
   0x3   :  { %v1213_v2 = vld [vmem:[%s1637_s1] sm:$0xff]   ;;  %1095 = vmatprep.subr.bf16.mxu1 %v1212_v1  ;;  %v1217_v6 = vld [vmem:[%s1637_s1 + $0x8] sm:$0xff]   ;;  %v1221_v10 = vld [vmem:[%s1637_s1 + $0x10] sm:$0xff]   ;;  %v167_v40 = vunpack.c.0.s8 %v166_v37 }
   0x4   :  { %v1214_v3 = vld [vmem:[%s1637_s1 + $0x80] sm:$0xff]   ;;  %1074 = vmatpush3.bf16.msra.mxu0 %v1213_v2  ;;  %v1218_v7 = vld [vmem:[%s1637_s1 + $0x88] sm:$0xff]   ;;  %v1222_v11 = vld [vmem:[%s1637_s1 + $0x90] sm:$0xff]  }
   0x5   :  { %1096 = vmatpush3.bf16.msra.mxu1 %v1214_v3  ;;  %1075 = vmatprep.subr.bf16.mxu0 %v1215_v4  ;;  %v1223_v12 = vld [vmem:[%s1637_s1 + $0x58] sm:$0xff]   ;;  %v1227_v16 = vld [vmem:[%s1637_s1 + $0x60] sm:$0xff]   ;;  %v1231_v20 = vld [vmem:[%s1637_s1 + $0x68] sm:$0xff]   ;;  %v1461_v41 = vsub.s32 %v167_v40, %v169_v33 }
   0x6   :  { %1097 = vmatprep.subr.bf16.mxu1 %v1216_v5  ;;  %v1224_v13 = vld [vmem:[%s1637_s1 + $0xd8] sm:$0xff]   ;;  %v1228_v17 = vld [vmem:[%s1637_s1 + $0xe0] sm:$0xff]   ;;  %v1232_v21 = vld [vmem:[%s1637_s1 + $0xe8] sm:$0xff]  }
   0x7   :  { %v1225_v14 = vld [vmem:[%s1637_s1 + $0x18] sm:$0xff]   ;;  %v1229_v18 = vld [vmem:[%s1637_s1 + $0x20] sm:$0xff]   ;;  %v1233_v22 = vld [vmem:[%s1637_s1 + $0x28] sm:$0xff]  }
   0x8   :  { %1076 = vmatpush3.bf16.msra.mxu0 %v1217_v6  ;;  %v1226_v15 = vld [vmem:[%s1637_s1 + $0x98] sm:$0xff]   ;;  %v1230_v19 = vld [vmem:[%s1637_s1 + $0xa0] sm:$0xff]   ;;  %v1234_v23 = vld [vmem:[%s1637_s1 + $0xa8] sm:$0xff]  }
   0x9   :  { %1098 = vmatpush3.bf16.msra.mxu1 %v1218_v7  ;;  %1077 = vmatprep.subr.bf16.mxu0 %v1219_v8  ;;  %v1235_v24 = vld [vmem:[%s1637_s1 + $0x70] sm:$0xff]   ;;  %v1239_v29 = vld [vmem:[%s1637_s1 + $0x78] sm:$0xff]   ;;  %v34_v34 = vld [vmem:[%s1636_s0] sm:$0xff] }
   0xa   :  { %1099 = vmatprep.subr.bf16.mxu1 %v1220_v9  ;;  %v1236_v25 = vld [vmem:[%s1637_s1 + $0xf0] sm:$0xff]   ;;  %v1240_v30 = vld [vmem:[%s1637_s1 + $0xf8] sm:$0xff]   ;;  %v1244_v35 = vld [vmem:[%s1637_s1 + $0x140] sm:$0xff]   ;;  %v164_v39 = vcombine.high %v34_v34, %v34_v34  ;;  %v171_v42 = vrot.slane %v34_v34, %v1461_v41 }
   0xb   :  { %v1237_v26 = vld [vmem:[%s1637_s1 + $0x30] sm:$0xff]   ;;  %v1241_v31 = vld [vmem:[%s1637_s1 + $0x38] sm:$0xff]   ;;  %v1245_v38 = vld [vmem:[%s1637_s1 + $0x1c0] sm:$0xff]  }
   0xc   :  { %1078 = vmatpush3.bf16.msra.mxu0 %v1221_v10  ;;  %v1238_v27 = vld [vmem:[%s1637_s1 + $0xb0] sm:$0xff]   ;;  %v1242_v32 = vld [vmem:[%s1637_s1 + $0xb8] sm:$0xff]   ;;  %v1465_v43 = vrot.slane %v164_v39, %v1461_v41  ;;  %v179_v44 = vcombine.high %v171_v42, %v171_v42  ;;  %v187_v45 = vrot.slane %v171_v42, %v1461_v41  ;;  %v1246_v47 = vld [vmem:[%s1637_s1 + $0x100] sm:$0xff]  }
   0xd   :  { %1100 = vmatpush3.bf16.msra.mxu1 %v1222_v11  ;;  %1079 = vmatprep.subr.bf16.mxu0 %v1223_v12  ;;  %v1247_v49 = vld [vmem:[%s1637_s1 + $0x180] sm:$0xff]   ;;  %v1248_v52 = vld [vmem:[%s1637_s1 + $0x148] sm:$0xff]   ;;  %v1252_v58 = vld [vmem:[%s1637_s1 + $0x150] sm:$0xff]  }
   0xe   :  { %1101 = vmatprep.subr.bf16.mxu1 %v1224_v13  ;;  %v180_v46 = vcombine.high %v1465_v43, %v1465_v43  ;;  %v201_v48 = vrot.slane %v179_v44, %v1461_v41  ;;  %v209_v51 = vcombine.high %v187_v45, %v187_v45  ;;  %v1249_v54 = vld [vmem:[%s1637_s1 + $0x1c8] sm:$0xff]   ;;  %v1253_v59 = vld [vmem:[%s1637_s1 + $0x1d0] sm:$0xff]   ;;  %v1256_v62 = vld [vmem:[%s1637_s1 + $0x158] sm:$0xff]  }
   0xf   :  { %v1250_v55 = vld [vmem:[%s1637_s1 + $0x108] sm:$0xff]   ;;  %v1254_v60 = vld [vmem:[%s1637_s1 + $0x110] sm:$0xff]   ;;  %v1257_v63 = vld [vmem:[%s1637_s1 + $0x1d8] sm:$0xff]  }
  0x10   :  { %1080 = vmatpush3.bf16.msra.mxu0 %v1225_v14  ;;  %v208_v50 = vrot.slane %v180_v46, %v1461_v41  ;;  %637 = vmatprep.mubr.bf16.mxu0 %v201_v48  ;;  %v211_v53 = vcombine.high %v201_v48, %v201_v48  ;;  %v1251_v57 = vld [vmem:[%s1637_s1 + $0x188] sm:$0xff]   ;;  %v1255_v61 = vld [vmem:[%s1637_s1 + $0x190] sm:$0xff]   ;;  %v1258_v0 = vld [vmem:[%s1637_s1 + $0x118] sm:$0xff]  }
  0x11   :  { %1102 = vmatpush3.bf16.msra.mxu1 %v1226_v15  ;;  %1081 = vmatprep.subr.bf16.mxu0 %v1227_v16  ;;  %v1259_v1 = vld [vmem:[%s1637_s1 + $0x198] sm:$0xff]   ;;  %v1260_v2 = vld [vmem:[%s1637_s1 + $0x160] sm:$0xff]   ;;  %v1264_v6 = vld [vmem:[%s1637_s1 + $0x168] sm:$0xff]  }
  0x12   :  { %1103 = vmatprep.subr.bf16.mxu1 %v1228_v17  ;;  %v212_v56 = vcombine.high %v208_v50, %v208_v50  ;;  %677 = vmatprep.mubr.bf16.mxu1 %v211_v53  ;;  %v1261_v3 = vld [vmem:[%s1637_s1 + $0x1e0] sm:$0xff]   ;;  %v1265_v7 = vld [vmem:[%s1637_s1 + $0x1e8] sm:$0xff]   ;;  %v1268_v10 = vld [vmem:[%s1637_s1 + $0x170] sm:$0xff]   ;;  %v194_v17 = vrot.slane %v1465_v43, %v1461_v41 }
  0x13   :  { %v1262_v4 = vld [vmem:[%s1637_s1 + $0x120] sm:$0xff]   ;;  %v1266_v8 = vld [vmem:[%s1637_s1 + $0x128] sm:$0xff]   ;;  %v1269_v11 = vld [vmem:[%s1637_s1 + $0x1f0] sm:$0xff]  }
  0x14   :  { %1082 = vmatpush3.bf16.msra.mxu0 %v1229_v18  ;;  %v1263_v5 = vld [vmem:[%s1637_s1 + $0x1a0] sm:$0xff]   ;;  %v1267_v9 = vld [vmem:[%s1637_s1 + $0x1a8] sm:$0xff]   ;;  %v1270_v12 = vld [vmem:[%s1637_s1 + $0x130] sm:$0xff]  }
  0x15   :  { %1104 = vmatpush3.bf16.msra.mxu1 %v1230_v19  ;;  %1083 = vmatprep.subr.bf16.mxu0 %v1231_v20  ;;  %v1272_v13 = vld [vmem:[%s1637_s1 + $0x178] sm:$0xff]   ;;  %v1271_v14 = vld [vmem:[%s1637_s1 + $0x1b0] sm:$0xff]  }
  0x16   :  { %1105 = vmatprep.subr.bf16.mxu1 %v1232_v21  ;;  %v1273_v15 = vld [vmem:[%s1637_s1 + $0x1f8] sm:$0xff]  }
  0x17   :  { %v1274_v16 = vld [vmem:[%s1637_s1 + $0x138] sm:$0xff]  }
  0x18   :  { %1084 = vmatpush3.bf16.msra.mxu0 %v1233_v22 }
  0x19   :  { %1106 = vmatpush3.bf16.msra.mxu1 %v1234_v23  ;;  %1085 = vmatprep.subr.bf16.mxu0 %v1235_v24 }
  0x1a   :  { %1107 = vmatprep.subr.bf16.mxu1 %v1236_v25 }
  0x1c   :  { %1086 = vmatpush3.bf16.msra.mxu0 %v1237_v26 }
  0x1d   :  { %1108 = vmatpush3.bf16.msra.mxu1 %v1238_v27  ;;  %1087 = vmatprep.subr.bf16.mxu0 %v1239_v29 }
  0x1e   :  { %1109 = vmatprep.subr.bf16.mxu1 %v1240_v30 }
  0x20   :  { %1088 = vmatpush3.bf16.msra.mxu0 %v1241_v31 }
  0x21   :  { %1110 = vmatpush3.bf16.msra.mxu1 %v1242_v32  ;;  %1117 = vmatprep.subr.bf16.mxu0 %v1244_v35 }
  0x22   :  { %1139 = vmatprep.subr.bf16.mxu1 %v1245_v38 }
  0x23   :  { %638 = vmatmul.mubr.bf16.vlgmr.msra.gmra.mrb[0].mxu0 %v187_v45 }
  0x24   :  { %1118 = vmatpush3.bf16.msra.mxu0 %v1246_v47  ;;  %678 = vmatmul.mubr.bf16.vlgmr.msra.gmra.mrb[0].mxu1 %v209_v51 }
  0x25   :  { %1119 = vmatprep.subr.bf16.mxu0 %v1248_v52  ;;  %1140 = vmatpush3.bf16.msra.mxu1 %v1247_v49 }
  0x26   :  { %717 = vmatprep.mubr.bf16.mxu0 %v208_v50  ;;  %1141 = vmatprep.subr.bf16.mxu1 %v1249_v54 }
  0x27   :  { %757 = vmatprep.mubr.bf16.mxu1 %v212_v56 }
  0x28   :  { %1120 = vmatpush3.bf16.msra.mxu0 %v1250_v55 }
  0x29   :  { %1121 = vmatprep.subr.bf16.mxu0 %v1252_v58  ;;  %1142 = vmatpush3.bf16.msra.mxu1 %v1251_v57 }
  0x2a   :  { %1143 = vmatprep.subr.bf16.mxu1 %v1253_v59 }
  0x2c   :  { %1122 = vmatpush3.bf16.msra.mxu0 %v1254_v60 }
  0x2d   :  { %1123 = vmatprep.subr.bf16.mxu0 %v1256_v62  ;;  %1144 = vmatpush3.bf16.msra.mxu1 %v1255_v61 }
  0x2e   :  { %1145 = vmatprep.subr.bf16.mxu1 %v1257_v63 }
  0x30   :  { %1124 = vmatpush3.bf16.msra.mxu0 %v1258_v0 }
  0x31   :  { %1125 = vmatprep.subr.bf16.mxu0 %v1260_v2  ;;  %1146 = vmatpush3.bf16.msra.mxu1 %v1259_v1 }
  0x32   :  { %1147 = vmatprep.subr.bf16.mxu1 %v1261_v3 }
  0x34   :  { %1126 = vmatpush3.bf16.msra.mxu0 %v1262_v4 }
  0x35   :  { %1127 = vmatprep.subr.bf16.mxu0 %v1264_v6  ;;  %1148 = vmatpush3.bf16.msra.mxu1 %v1263_v5 }
  0x36   :  { %1149 = vmatprep.subr.bf16.mxu1 %v1265_v7 }
  0x38   :  { %1128 = vmatpush3.bf16.msra.mxu0 %v1266_v8 }
  0x39   :  { %1129 = vmatprep.subr.bf16.mxu0 %v1268_v10  ;;  %1150 = vmatpush3.bf16.msra.mxu1 %v1267_v9 }
  0x3a   :  { %1151 = vmatprep.subr.bf16.mxu1 %v1269_v11 }
  0x3c   :  { %1130 = vmatpush3.bf16.msra.mxu0 %v1270_v12 }
  0x3d   :  { %1131 = vmatprep.subr.bf16.mxu0 %v1272_v13 }
  0x3e   :  { %12 = vsyncpa [#allocation4], 0  ;;  %1152 = vmatpush3.bf16.msra.mxu1 %v1271_v14  ;;  %v1275_v18 = vld [vmem:[%s1637_s1 + $0x1b8] sm:$0xff]   ;;  %v210_v19 = vcombine.high %v194_v17, %v194_v17  ;;  %v1276_v20 = vld [vmem:[%s1639_s3] sm:$0xff]   ;;  %v1313_v21 = vmov 0.0   ;;  %vm1314_vm0 = vmmov 0  }
  0x3f   :  { %1153 = vmatprep.subr.bf16.mxu1 %v1273_v15  ;;  %32 = vst [vmem:[#allocation2] sm:$0x3] %v1313_v21  ;;  %v1277_v22 = vld [vmem:[%s1639_s3 + $0x8] sm:$0xff]   ;;  %v1278_v23 = vld [vmem:[%s1639_s3 + $0x10] sm:$0xff]   ;;  %v1279_v24 = vld [vmem:[%s1639_s3 + $0x18] sm:$0xff]   ;;  %vm933_vm1 = vcmask 523264  }
  0x40   :  { %1132 = vmatpush3.bf16.msra.mxu0 %v1274_v16  ;;  %v1280_v25 = vld [vmem:[%s1639_s3 + $0x20] sm:$0xff]   ;;  %v1281_v26 = vld [vmem:[%s1639_s3 + $0x28] sm:$0xff]   ;;  %v1282_v27 = vld [vmem:[%s1639_s3 + $0x30] sm:$0xff]   ;;  %s1315_s1 = smov [#allocation3]   ;;  %vm977_vm2 = vcmask 33792  }
  0x41   :  { %1175 = vmatprep.subr.bf16.mxu0 %v1313_v21  ;;  %v1283_v28 = vld [vmem:[%s1639_s3 + $0x38] sm:$0xff]   ;;  %v1284_v29 = vld [vmem:[%s1641_s5] sm:$0xff]   ;;  %v1285_v30 = vld [vmem:[%s1641_s5 + $0x8] sm:$0xff]  }
  0x42   :  { %1154 = vmatpush3.bf16.msra.mxu1 %v1275_v18  ;;  %v1057_v56 = vld [vmem:[%s1638_s2] ss:$0 sm:$0xff]  ;;  %v1286_v61 = vld [vmem:[%s1641_s5 + $0x10] sm:$0xff]   ;;  %v1287_v62 = vld [vmem:[%s1641_s5 + $0x18] sm:$0xff]   ;;  %s985_s5 = sshll.u32 %s1315_s1, 4  ;;  %s986_s5 = int_to_ptr.vmem [resolvable:$true] %s985_s5 }
  0x43   :  { %718 = vmatmul.mubr.bf16.vlgmr.msra.gmra.mrb[4].mxu0 %v194_v17  ;;  %1195 = vmatprep.subr.bf16.mxu1 %v1313_v21  ;;  %v1058_v63 = vld [vmem:[%s1640_s4] ss:$0 sm:$0xff]  ;;  %s1288_s4 = scalar_lea.vmem %s986_s5, 32  ;;  %p1293_p1 = scmp.lt.s32.totalorder %s986_s5, %s986_s5 }
  0x44   :  { %1176 = vmatpush3.bf16.msra.mxu0 %v1276_v20  ;;  %1191 = vmatprep.mubr.msk.bf16.mxu0 %vm1314_vm0, %v1313_v21  ;;  %v1067_v7 = vld [vmem:[%s1642_s6] ss:$0 sm:$0xff]  ;;  %p1289_p0 = scmp.ne.s32.totalorder %s986_s5, %s1288_s4  ;;  %p1294_p2 = scmp.lt.s32.totalorder %s1288_s4, %s1288_s4 }
  0x45   :  { %758 = vmatmul.mubr.bf16.vlgmr.msra.gmra.mrb[4].mxu1 %v210_v19  ;;  %1177 = vmatprep.subr.bf16.mxu0 %v1313_v21 }
  0x46   :  { %1203 = vmatprep.mubr.msk.bf16.mxu1 %vm1314_vm0, %v1313_v21  ;;  %1196 = vmatpush3.bf16.msra.mxu1 %v1284_v29  ;;  %v33_v52 = vld [vmem:[#allocation2] sm:$0x3]  ;;  %p1295_p3 = por %p1294_p2, %p1293_p1 }
  0x47   :  { %1197 = vmatprep.subr.bf16.mxu1 %v1313_v21 }
  0x48   :  { %1178 = vmatpush3.bf16.msra.mxu0 %v1277_v22  ;;  %p1296_p4 = pnand %p1295_p3, %p1289_p0 }
  0x49   :  { %1179 = vmatprep.subr.bf16.mxu0 %v1313_v21 }
  0x4a   :  { %1198 = vmatpush3.bf16.msra.mxu1 %v1285_v30 }
  0x4b   :  { %1199 = vmatprep.subr.bf16.mxu1 %v1313_v21 }
  0x4c   :  { %1180 = vmatpush3.bf16.msra.mxu0 %v1278_v23 }
  0x4d   :  { %1181 = vmatprep.subr.bf16.mxu0 %v1313_v21 }
  0x4e   :  { %1200 = vmatpush3.bf16.msra.mxu1 %v1286_v61 }
  0x4f   :  { %1201 = vmatprep.subr.bf16.mxu1 %v1313_v21 }
  0x50   :  { %1182 = vmatpush3.bf16.msra.mxu0 %v1279_v24 }
  0x51   :  { %1183 = vmatprep.subr.bf16.mxu0 %v1313_v21 }
  0x52   :  { %1202 = vmatpush3.bf16.msra.mxu1 %v1287_v62 }
  0x54   :  { %1184 = vmatpush3.bf16.msra.mxu0 %v1280_v25 }
  0x55   :  { %1185 = vmatprep.subr.bf16.mxu0 %v1313_v21 }
  0x58   :  { %1186 = vmatpush3.bf16.msra.mxu0 %v1281_v26 }
  0x59   :  { %1187 = vmatprep.subr.bf16.mxu0 %v1313_v21 }
  0x5c   :  { %1188 = vmatpush3.bf16.msra.mxu0 %v1282_v27 }
  0x5d   :  { %1189 = vmatprep.subr.bf16.mxu0 %v1313_v21 }
  0x60   :  { %1190 = vmatpush3.bf16.msra.mxu0 %v1283_v28 }
  0xf6   :  { %v1089_v31 = vpop.f32.mrb[0].mxu0 }
  0xf7   :  { %v1090_v32 = vpop.f32.mrb[1].mxu0  ;;  %v1111_v33 = vpop.f32.mrb[0].mxu1 }
  0xf8   :  { %v1091_v34 = vadd.f32 %v1090_v32, %v1089_v31  ;;  %v1092_v35 = vpop.f32.mrb[2].mxu0  ;;  %v1112_v36 = vpop.f32.mrb[1].mxu1 }
  0xf9   :  { %v1093_v37 = vpop.f32.mrb[3].mxu0  ;;  %v1113_v38 = vadd.f32 %v1112_v36, %v1111_v33  ;;  %v1114_v39 = vpop.f32.mrb[2].mxu1 }
  0xfa   :  { %v1115_v40 = vpop.f32.mrb[3].mxu1 }
  0xfb   :  { %v680_v41 = vadd.f32 %v1113_v38, %v1091_v34 }
 0x116   :  { %v1133_v42 = vpop.f32.mrb[4].mxu0 }
 0x117   :  { %v1134_v43 = vpop.f32.mrb[5].mxu0 }
 0x118   :  { %v1155_v44 = vpop.f32.mrb[4].mxu1  ;;  %v1135_v45 = vadd.f32 %v1134_v43, %v1133_v42  ;;  %v1136_v46 = vpop.f32.mrb[6].mxu0 }
 0x119   :  { %v1156_v47 = vpop.f32.mrb[5].mxu1  ;;  %v1137_v48 = vpop.f32.mrb[7].mxu0 }
 0x11a   :  { %v720_v49 = vadd.f32 %v1135_v45, %v680_v41  ;;  %v1157_v50 = vadd.f32 %v1156_v47, %v1155_v44  ;;  %v1158_v51 = vpop.f32.mrb[6].mxu1 }
 0x11b   :  { %v1159_v53 = vpop.f32.mrb[7].mxu1 }
 0x11c   :  { %v760_v54 = vadd.f32 %v1157_v50, %v720_v49 }
 0x11e   :  { %v765_v55 = vadd.f32 %v760_v54, %v33_v52 }
 0x120   :  { %766 = vst [vmem:[#allocation2] sm:$0x3] %v765_v55 }
 0x127   :  { %v770_v57 = vld [vmem:[#allocation2] sm:$0x3] }
 0x128   :  { %v778_v58 = vadd.f32 %v1057_v56, %v770_v57 }
 0x12a   :  { %v779_v59 = vmax.f32 %v778_v58, 0.0 }
 0x12c   :  { %v780_v60 = vpack.c.bf16 %v779_v59, %v779_v59 }
 0x12e   :  { %1192 = vmatmul.mubr.bf16.vlgmr.msra.gmra.mrb[8].mxu0 %v780_v60 }
 0x201   :  { %v886_v0 = vpop.f32.mrb[8].mxu0 }
 0x202   :  { %v887_v1 = vadd.f32 %v1058_v63, %v886_v0  ;;  %v1193_v2 = vpop.f32.mrb[9].mxu0 }
 0x203   :  { %v889_v3 = vpop.f32.mrb[10].mxu0 }
 0x204   :  { %v892_v4 = vmax.f32 %v887_v1, 0.0  ;;  %v1194_v5 = vpop.f32.mrb[11].mxu0 }
 0x206   :  { %v893_v6 = vpack.c.bf16 %v892_v4, %v892_v4 }
 0x208   :  { %1204 = vmatmul.mubr.msk.bf16.vlgmr.msra.gmra.mrb[8].mxu1 %vm933_vm1, %v893_v6 }
 0x2db   :  { %v971_v8 = vpop.f32.mrb[8].mxu1 }
 0x2dc   :  { %v972_v9 = vadd.f32 %v1067_v7, %v971_v8  ;;  %v1205_v10 = vpop.f32.mrb[9].mxu1 }
 0x2dd   :  { %v974_v11 = vpop.f32.mrb[10].mxu1 }
 0x2de   :  { %v1206_v12 = vpop.f32.mrb[11].mxu1  ;;  %978 = vst.msk [vmem:[#allocation3] sm:$0x3] %vm977_vm2, %v972_v9 }
 0x2df   :  { %1299 = shalt.err (!%p1296_p4)
}
 0x2e0   :  { %s1300_s6 = scalar_lea.hbm %s1643_s7, 32 }
 0x2e1   :  { %p1301_p5 = scmp.ne.s32.totalorder %s1643_s7, %s1300_s6  ;;  %p1304_p6 = scmp.lt.u32.totalorder %s1300_s6, %s1643_s7 }
 0x2e3   :  { %p1306_p7 = pnand %p1304_p6, %p1301_p5 }
 0x2e5   :  { %1309 = shalt.err (!%p1306_p7)
}
 0x2e6   :  { %988 = dma.vmem_to_hbm [thread:$0]  %s986_s5, 32, %s1643_s7, [#allocation4]  }
 0x2e7   :  { %1310 = dma.done.wait [#allocation4], 32  }
 0x2e8   :  { %1311 = vsyncadd [#allocation4], 4294967264 }
 0x2e9   :  { %992 = vsyncpa [#allocation4], 1 }

</bundles_post_ra>
